<compile_context>
chip_gen: v7x
topology: tpu7x:2x2x1
jax: 0.10.0
libtpu: 0.0.40
codegen_flags: <defaults>
</compile_context>

<pallas_src>
import math

import numpy as np
import jax
import jax.numpy as jnp
from jax import lax
from jax.experimental import pallas as pl
from jax.experimental.pallas import tpu as pltpu

# ----------------------------- configuration -------------------------------
PHONEME_SIZE = 40
PHONEME_EMB = 16
SPEAKER_SIZE = 4
SPEAKER_EMB = 8
HIDDEN = 32
BLOCK_NUM = 2
POST_LAYER_NUM = 2           # kernel below is specialized to 2 postnet layers
HEADS = 2
DK = HIDDEN // HEADS
FF_UNITS = HIDDEN * 4
CNN_KERNEL = 31
FF_KERNEL = 3
POSTNET_KERNEL = 5

B = 2
T = 8
LENGTHS = [8, 6]

IN_SIZE = PHONEME_EMB + 4 + SPEAKER_EMB
REL_LEN = 2 * T - 1
SLAB_WIDTH = 128


# --------------------------- parameter slab layout ---------------------------
def _r8(n):
    return ((n + 7) // 8) * 8


def _param_layout():
    """Static (name -> (row_offset, rows, cols)) layout of the packed slab."""
    entries = []

    def add(name, r, c):
        entries.append((name, r, c))

    add('pre_w', IN_SIZE, HIDDEN)
    add('pre_b', 1, HIDDEN)
    for b in range(BLOCK_NUM):
        s = '_%d' % b
        add('norm_g' + s, 5, HIDDEN)
        add('norm_b' + s, 5, HIDDEN)
        for ff in ('ffm', 'ff'):
            add(ff + '_w1' + s, FF_KERNEL * HIDDEN, FF_UNITS)
            add(ff + '_b1' + s, 1, FF_UNITS)
            add(ff + '_w2' + s, FF_KERNEL * FF_UNITS, HIDDEN)
            add(ff + '_b2' + s, 1, HIDDEN)
        add('qkv_w' + s, HIDDEN, 3 * HIDDEN)
        add('qkv_b' + s, 1, 3 * HIDDEN)
        add('ppad' + s, HIDDEN, HEADS * REL_LEN)     # block-diag pos projection
        add('pbu' + s, 1, HIDDEN)
        add('pbv' + s, 1, HIDDEN)
        add('out_w' + s, HIDDEN, HIDDEN)
        add('out_b' + s, 1, HIDDEN)
        add('pw1_w' + s, HIDDEN, 2 * HIDDEN)
        add('pw1_b' + s, 1, 2 * HIDDEN)
        add('dw_full' + s, T * T, HIDDEN)            # dense depthwise operator
        add('dw_b' + s, 1, HIDDEN)
        add('pw2_w' + s, HIDDEN, HIDDEN)
        add('pw2_b' + s, 1, HIDDEN)
    add('after_g', 1, HIDDEN)
    add('after_b', 1, HIDDEN)
    add('post_w', HIDDEN, 1)
    add('post_b', 1, 1)
    add('pn0_w', POSTNET_KERNEL * 1, HIDDEN)
    add('pn0_b', 1, HIDDEN)
    add('pn1_w', POSTNET_KERNEL * HIDDEN, 1)
    add('pn1_b', 1, 1)

    offs = {}
    row = 0
    for name, r, c in entries:
        offs[name] = (row, r, c)
        row += _r8(r)                 # every entry starts at an 8-aligned row
    return offs, row


_OFFSETS, _TOTAL_ROWS = _param_layout()


# ------------------------------ fused kernel --------------------------------
def _make_kernel(offsets, bsz, t):
    hid = HIDDEN
    heads = HEADS
    dk = DK
    bt = bsz * t
    L = 2 * t - 1
    scale = 1.0 / math.sqrt(dk)

    def kernel(h0_ref, mask_ref, slab_ref, out_ref):
        def P(name):
            off, r, c = offsets[name]
            return slab_ref[off:off + r, :c]

        def dot(a, w):
            return jnp.dot(a, w, preferred_element_type=jnp.float32)

        def ln(x2, g, b):
            # ESPnet LayerNorm (eps=1e-12), biased variance
            m = jnp.mean(x2, axis=-1, keepdims=True)
            v = jnp.mean(jnp.square(x2 - m), axis=-1, keepdims=True)
            return (x2 - m) * lax.rsqrt(v + 1e-12) * g + b

        def conv1d_same(x2, wname, bname, ksz, cin):
            # "same" 1-D conv over time: im2col from shifted copies of the
            # unpadded (B,T,C) block + one wide MXU matmul.
            x3 = x2.reshape(bsz, t, cin)
            pad = (ksz - 1) // 2
            parts = []
            for s in range(-pad, pad + 1):
                if abs(s) >= t:
                    parts.append(jnp.zeros_like(x3))
                elif s == 0:
                    parts.append(x3)
                elif s > 0:
                    parts.append(jnp.concatenate(
                        [x3[:, s:, :],
                         jnp.zeros((bsz, s, cin), jnp.float32)], axis=1))
                else:
                    parts.append(jnp.concatenate(
                        [jnp.zeros((bsz, -s, cin), jnp.float32),
                         x3[:, :t + s, :]], axis=1))
            cols = jnp.concatenate(parts, axis=-1).reshape(bt, ksz * cin)
            return dot(cols, P(wname)) + P(bname)

        def feed_forward(x2, base, sfx):
            # ESPnet MultiLayeredConv1d: conv(k=3) -> ReLU -> conv(k=3)
            h1 = jax.nn.relu(conv1d_same(x2, base + '_w1' + sfx,
                                         base + '_b1' + sfx, FF_KERNEL, hid))
            return conv1d_same(h1, base + '_w2' + sfx, base + '_b2' + sfx,
                               FF_KERNEL, FF_UNITS)

        maskf = mask_ref[...]                                 # (B, T)
        kmask = jnp.concatenate([maskf[:, None, :] > 0.0] * heads,
                                axis=0)                       # (heads*B, 1, T)
        neg = jnp.float32(-1e30)

        # pre linear (RelPositionalEncoding xscale folded into weights)
        x = dot(h0_ref[...].reshape(bt, -1), P('pre_w')) + P('pre_b')  # (BT,H)

        for blk in range(BLOCK_NUM):                          # static unroll
            sfx = '_%d' % blk
            gs = P('norm_g' + sfx)                            # (5, H)
            bs = P('norm_b' + sfx)

            # 1) macaron feed-forward (half residual)
            xn = ln(x, gs[0], bs[0])
            x = x + 0.5 * feed_forward(xn, 'ffm', sfx)

            # 2) relative-position multi-head self-attention (heads merged)
            xn = ln(x, gs[1], bs[1])
            qkv = dot(xn, P('qkv_w' + sfx)) + P('qkv_b' + sfx)   # (BT, 3H)
            q2 = qkv[:, :hid]
            k3 = qkv[:, hid:2 * hid].reshape(bsz, t, hid)
            v3 = qkv[:, 2 * hid:].reshape(bsz, t, hid)

            # bd term: one block-diagonal matmul for all heads (pproj folded
            # into ppad at pack time), then a single rel_shift on merged heads.
            bdf = dot(q2 + P('pbv' + sfx), P('ppad' + sfx))      # (BT, heads*L)
            bdf_m = jnp.concatenate(
                [bdf[:, h * L:(h + 1) * L].reshape(bsz, t, L)
                 for h in range(heads)], axis=0)                 # (heads*B,T,L)
            # Transformer-XL rel_shift: bd[:, i, j] = bdf[:, i, j + t - 1 - i]
            bd = jnp.concatenate(
                [bdf_m[:, i:i + 1, t - 1 - i:2 * t - 1 - i] for i in range(t)],
                axis=1)                                          # (heads*B,T,T)

            qu3 = (q2 + P('pbu' + sfx)).reshape(bsz, t, hid)
            qu_m = jnp.concatenate([qu3[:, :, h * dk:(h + 1) * dk]
                                    for h in range(heads)], axis=0)
            k_m = jnp.concatenate([k3[:, :, h * dk:(h + 1) * dk]
                                   for h in range(heads)], axis=0)
            v_m = jnp.concatenate([v3[:, :, h * dk:(h + 1) * dk]
                                   for h in range(heads)], axis=0)

            ac = jnp.einsum('mtd,msd->mts', qu_m, k_m,
                            preferred_element_type=jnp.float32)  # (heads*B,T,T)
            scores = jnp.where(kmask, (ac + bd) * scale, neg)
            smax = jnp.max(scores, axis=-1, keepdims=True)
            e = jnp.exp(scores - smax)
            attn = e / jnp.sum(e, axis=-1, keepdims=True)
            attn = jnp.where(kmask, attn, 0.0)
            ctx = jnp.einsum('mts,msd->mtd', attn, v_m,
                             preferred_element_type=jnp.float32)  # (heads*B,T,DK)
            att = jnp.concatenate([ctx[h * bsz:(h + 1) * bsz]
                                   for h in range(heads)],
                                  axis=-1).reshape(bt, hid)
            x = x + dot(att, P('out_w' + sfx)) + P('out_b' + sfx)

            # 3) convolution module: pw1 -> GLU -> depthwise(31)+BN+Swish -> pw2
            xn = ln(x, gs[2], bs[2])
            c = dot(xn, P('pw1_w' + sfx)) + P('pw1_b' + sfx)      # (BT, 2H)
            c3 = (c[:, :hid] * jax.nn.sigmoid(c[:, hid:])).reshape(bsz, t, hid)
            dwf = P('dw_full' + sfx)                              # (T*T, H)
            acc = jnp.broadcast_to(P('dw_b' + sfx).reshape(1, 1, hid),
                                   (bsz, t, hid))
            for j in range(t):      # dense per-channel operator, 8 FMAs
                acc = acc + c3[:, j:j + 1, :] * dwf[j * t:(j + 1) * t, :][None]
            sw = acc * jax.nn.sigmoid(acc)                        # Swish
            x = x + dot(sw.reshape(bt, hid), P('pw2_w' + sfx)) + P('pw2_b' + sfx)

            # 4) feed-forward (half residual)
            xn = ln(x, gs[3], bs[3])
            x = x + 0.5 * feed_forward(xn, 'ff', sfx)

            # 5) block-final layer norm
            x = ln(x, gs[4], bs[4])

        # encoder after-norm (normalize_before=True)
        x = ln(x, P('after_g'), P('after_b'))

        # post linear -> output1
        out1 = dot(x, P('post_w')) + P('post_b')                  # (BT, 1)

        # postnet: conv(1->H,5)+BN+tanh, conv(H->1,5)+BN (BN folded, eval mode)
        y = jnp.tanh(conv1d_same(out1, 'pn0_w', 'pn0_b', POSTNET_KERNEL, 1))
        y = conv1d_same(y, 'pn1_w', 'pn1_b', POSTNET_KERNEL, hid)

        out_ref[...] = jnp.concatenate([out1, out1 + y],
                                       axis=-1).reshape(bsz, t, 2)

    return kernel


# ------------------------------ Pallas wrapper -------------------------------
def _full_spec(shape):
    nd = len(shape)
    return pl.BlockSpec(tuple(shape), lambda *args, nd=nd: (0,) * nd)


def predictor_forward(packed, vowel, consonant, sa, ea, sap, eap,
                      speaker_id, length):
    bsz, t = vowel.shape

    # embeddings + accent features (plain-JAX glue: gathers / stacks)
    ph = (jnp.take(packed['phoneme_emb'], vowel + 1, axis=0)
          + jnp.take(packed['phoneme_emb'], consonant + 1, axis=0))
    ah = jnp.stack([sa, ea, sap, eap], axis=2).astype(jnp.float32)
    s = jnp.take(packed['speaker_emb'], speaker_id, axis=0)
    s = jnp.broadcast_to(s[:, None, :], (bsz, t, s.shape[-1]))
    h0 = jnp.concatenate([ph, ah, s], axis=2)                # (B, T, 28)

    maskf = (jnp.arange(t)[None, :] < length[:, None]).astype(jnp.float32)
    slab = packed['slab']

    kernel = _make_kernel(_OFFSETS, bsz, t)
    out = pl.pallas_call(
        kernel,
        out_shape=jax.ShapeDtypeStruct((bsz, t, 2), jnp.float32),
        grid=(1,),
        in_specs=[_full_spec(h0.shape), _full_spec(maskf.shape),
                  _full_spec(slab.shape)],
        out_specs=_full_spec((bsz, t, 2)),
        compiler_params=pltpu.CompilerParams(
            dimension_semantics=("arbitrary",)),
    )(h0, maskf, slab)
    return out[..., 0], out[..., 1]


# ----------------------------- raw parameter init ----------------------------
def init_params(key):
    keys = iter(jax.random.split(key, 512))

    def nrm(shape, scale=0.1):
        return scale * jax.random.normal(next(keys), shape, jnp.float32)

    p = {}
    pe = nrm((PHONEME_SIZE + 1, PHONEME_EMB))
    p['phoneme_emb'] = pe.at[0].set(0.0)                 # padding_idx = 0
    p['speaker_emb'] = nrm((SPEAKER_SIZE, SPEAKER_EMB))
    p['pre_w'] = nrm((IN_SIZE, HIDDEN))
    p['pre_b'] = nrm((HIDDEN,))

    blocks = []
    for _ in range(BLOCK_NUM):
        blk = {}
        blk['norm_g'] = jnp.ones((5, HIDDEN), jnp.float32)
        blk['norm_b'] = jnp.zeros((5, HIDDEN), jnp.float32)
        for ff in ('ffm', 'ff'):
            blk[ff + '_w1'] = nrm((FF_KERNEL * HIDDEN, FF_UNITS))
            blk[ff + '_b1'] = nrm((FF_UNITS,))
            blk[ff + '_w2'] = nrm((FF_KERNEL * FF_UNITS, HIDDEN))
            blk[ff + '_b2'] = nrm((HIDDEN,))
        blk['qkv_w'] = nrm((HIDDEN, 3 * HIDDEN))
        blk['qkv_b'] = nrm((3 * HIDDEN,))
        blk['pos_w'] = nrm((HIDDEN, HIDDEN))             # linear_pos (no bias)
        blk['pos_bias_u'] = nrm((HEADS, DK))
        blk['pos_bias_v'] = nrm((HEADS, DK))
        blk['out_w'] = nrm((HIDDEN, HIDDEN))
        blk['out_b'] = nrm((HIDDEN,))
        blk['pw1_w'] = nrm((HIDDEN, 2 * HIDDEN))
        blk['pw1_b'] = nrm((2 * HIDDEN,))
        blk['dw_w'] = nrm((CNN_KERNEL, HIDDEN))
        blk['dw_b'] = nrm((HIDDEN,))
        blk['bn_g'] = 1.0 + nrm((HIDDEN,))
        blk['bn_b'] = nrm((HIDDEN,))
        blk['bn_mean'] = jnp.zeros((HIDDEN,), jnp.float32)   # eval running stats
        blk['bn_var'] = jnp.ones((HIDDEN,), jnp.float32)
        blk['pw2_w'] = nrm((HIDDEN, HIDDEN))
        blk['pw2_b'] = nrm((HIDDEN,))
        blocks.append(blk)
    p['blocks'] = blocks

    p['after_g'] = jnp.ones((HIDDEN,), jnp.float32)
    p['after_b'] = jnp.zeros((HIDDEN,), jnp.float32)
    p['post_w'] = nrm((HIDDEN, 1))
    p['post_b'] = nrm((1,))
    # postnet layer 0: Conv1d(1->H,5,bias=False)+BatchNorm(H)+tanh
    p['pn0_w'] = nrm((POSTNET_KERNEL * 1, HIDDEN))
    p['pn0_bn_g'] = 1.0 + nrm((HIDDEN,))
    p['pn0_bn_b'] = nrm((HIDDEN,))
    # postnet layer 1: Conv1d(H->1,5,bias=False)+BatchNorm(1)
    p['pn1_w'] = nrm((POSTNET_KERNEL * HIDDEN, 1))
    p['pn1_bn_g'] = 1.0 + nrm((1,))
    p['pn1_bn_b'] = nrm((1,))
    return p


# ----------------------- fold + pack into the param slab ---------------------
def _rel_pos_emb_np(t, d_model):
    # ESPnet RelPositionalEncoding (new, 2T-1 positions)
    pos = np.arange(t, dtype=np.float32)[:, None]
    div = np.exp(np.arange(0, d_model, 2, dtype=np.float32)
                 * -(math.log(10000.0) / d_model))
    pe_pos = np.zeros((t, d_model), np.float32)
    pe_pos[:, 0::2] = np.sin(pos * div)
    pe_pos[:, 1::2] = np.cos(pos * div)
    pe_neg = np.zeros((t, d_model), np.float32)
    pe_neg[:, 0::2] = np.sin(-pos * div)
    pe_neg[:, 1::2] = np.cos(-pos * div)
    return np.concatenate([pe_pos[::-1], pe_neg[1:]], axis=0)   # (2T-1, d)


def pack_params(params):
    slab = np.zeros((_TOTAL_ROWS, SLAB_WIDTH), np.float32)

    def put(name, arr):
        arr = np.asarray(arr, np.float32)
        if arr.ndim == 1:
            arr = arr[None, :]
        off, r, c = _OFFSETS[name]
        assert arr.shape == (r, c), (name, arr.shape, (r, c))
        slab[off:off + r, :c] = arr

    bn_eps = 1e-5
    xscale = math.sqrt(HIDDEN)
    put('pre_w', np.asarray(params['pre_w']) * xscale)        # xscale folded
    put('pre_b', np.asarray(params['pre_b']) * xscale)

    pos_emb = _rel_pos_emb_np(T, HIDDEN)                      # (2T-1, H)
    dw_pad = (CNN_KERNEL - 1) // 2

    for bi, blk in enumerate(params['blocks']):
        s = '_%d' % bi
        put('norm_g' + s, blk['norm_g'])
        put('norm_b' + s, blk['norm_b'])
        for ff in ('ffm', 'ff'):
            put(ff + '_w1' + s, blk[ff + '_w1'])
            put(ff + '_b1' + s, blk[ff + '_b1'])
            put(ff + '_w2' + s, blk[ff + '_w2'])
            put(ff + '_b2' + s, blk[ff + '_b2'])
        put('qkv_w' + s, blk['qkv_w'])
        put('qkv_b' + s, blk['qkv_b'])
        # precomputed positional projection, block-diagonal per head
        pproj = pos_emb @ np.asarray(blk['pos_w'])            # (2T-1, H)
        ppad = np.zeros((HIDDEN, HEADS * REL_LEN), np.float32)
        for h in range(HEADS):
            ppad[h * DK:(h + 1) * DK, h * REL_LEN:(h + 1) * REL_LEN] = \
                pproj[:, h * DK:(h + 1) * DK].T
        put('ppad' + s, ppad)
        put('pbu' + s, np.asarray(blk['pos_bias_u']).reshape(-1))
        put('pbv' + s, np.asarray(blk['pos_bias_v']).reshape(-1))
        put('out_w' + s, blk['out_w'])
        put('out_b' + s, blk['out_b'])
        put('pw1_w' + s, blk['pw1_w'])
        put('pw1_b' + s, blk['pw1_b'])
        # depthwise conv + eval-mode BatchNorm folded, expanded to (T,T) per chan
        scale = np.asarray(blk['bn_g']) / np.sqrt(np.asarray(blk['bn_var']) + bn_eps)
        dw_w = np.asarray(blk['dw_w']) * scale[None, :]
        dw_b = ((np.asarray(blk['dw_b']) - np.asarray(blk['bn_mean'])) * scale
                + np.asarray(blk['bn_b']))
        dw_full = np.zeros((T * T, HIDDEN), np.float32)
        for j in range(T):
            for i in range(T):
                k = dw_pad + j - i
                if 0 <= k < CNN_KERNEL:
                    dw_full[j * T + i, :] = dw_w[k, :]
        put('dw_full' + s, dw_full)
        put('dw_b' + s, dw_b)
        put('pw2_w' + s, blk['pw2_w'])
        put('pw2_b' + s, blk['pw2_b'])

    put('after_g', params['after_g'])
    put('after_b', params['after_b'])
    put('post_w', params['post_w'])
    put('post_b', params['post_b'])
    # postnet BN folding (eval mode: running mean=0, var=1; conv bias=False)
    s0 = np.asarray(params['pn0_bn_g']) / np.sqrt(1.0 + bn_eps)
    put('pn0_w', np.asarray(params['pn0_w']) * s0[None, :])
    put('pn0_b', np.asarray(params['pn0_bn_b']))
    s1 = np.asarray(params['pn1_bn_g']) / np.sqrt(1.0 + bn_eps)
    put('pn1_w', np.asarray(params['pn1_w']) * s1[None, :])
    put('pn1_b', np.asarray(params['pn1_bn_b']))

    return {'slab': jnp.asarray(slab),
            'phoneme_emb': params['phoneme_emb'],
            'speaker_emb': params['speaker_emb']}


# ----------------------------------- main ------------------------------------
if __name__ == "__main__":
    assert POST_LAYER_NUM == 2, "fused kernel is specialized to 2 postnet layers"
    key = jax.random.PRNGKey(0)
    kp, kd = jax.random.split(key)
    params = init_params(kp)
    packed = pack_params(params)

    ks = jax.random.split(kd, 8)
    vowel = jax.random.randint(ks[0], (B, T), 0, PHONEME_SIZE, dtype=jnp.int32)
    consonant = jax.random.randint(ks[1], (B, T), -1, PHONEME_SIZE, dtype=jnp.int32)
    sa = jax.random.randint(ks[2], (B, T), 0, 2, dtype=jnp.int32)
    ea = jax.random.randint(ks[3], (B, T), 0, 2, dtype=jnp.int32)
    sap = jax.random.randint(ks[4], (B, T), 0, 2, dtype=jnp.int32)
    eap = jax.random.randint(ks[5], (B, T), 0, 2, dtype=jnp.int32)
    speaker_id = jax.random.randint(ks[6], (B,), 0, SPEAKER_SIZE, dtype=jnp.int32)

    # emulate pad_sequence (pads with 0 past each sequence's length)
    tmask = jnp.arange(T)[None, :] < jnp.asarray(LENGTHS)[:, None]
    vowel = jnp.where(tmask, vowel, 0)
    consonant = jnp.where(tmask, consonant, 0)
    sa = jnp.where(tmask, sa, 0)
    ea = jnp.where(tmask, ea, 0)
    sap = jnp.where(tmask, sap, 0)
    eap = jnp.where(tmask, eap, 0)
    length = jnp.asarray(LENGTHS, dtype=jnp.int32)

    fwd = jax.jit(predictor_forward)
    out1_pad, out2_pad = fwd(packed, vowel, consonant, sa, ea, sap, eap,
                             speaker_id, length)
    jax.block_until_ready((out1_pad, out2_pad))

    # match PyTorch forward output structure: lists sliced to each length
    out1_list = [out1_pad[i, :l] for i, l in enumerate(LENGTHS)]
    out2_list = [out2_pad[i, :l] for i, l in enumerate(LENGTHS)]
    assert all(o.shape == (l,) for o, l in zip(out1_list, LENGTHS))
    assert all(o.shape == (l,) for o, l in zip(out2_list, LENGTHS))
    assert all(bool(jnp.all(jnp.isfinite(o))) for o in out1_list + out2_list)
    print("KERNEL_OK")
</pallas_src>

<mosaic_0001>
module attributes {stable_mosaic.version = 11 : i64} {
  func.func @kernel(%arg0: i32, %arg1: memref<2x8x28xf32, #tpu.memory_space<vmem>>, %arg2: memref<2x8xf32, #tpu.memory_space<vmem>>, %arg3: memref<2856x128xf32, #tpu.memory_space<vmem>>, %arg4: memref<2x8x2xf32, #tpu.memory_space<vmem>>) attributes {dimension_semantics = [#tpu.dimension_semantics<arbitrary>], iteration_bounds = array<i64: 1>, scalar_prefetch = 0 : i64, scratch_operands = 0 : i64, tpu.core_type = #tpu.core_type<tc>, window_params = [{pipeline_mode = #tpu.pipeline_mode<synchronous>, transform_indices = @transform_0, window_bounds = array<i64: 2, 8, 28>}, {pipeline_mode = #tpu.pipeline_mode<synchronous>, transform_indices = @transform_1, window_bounds = array<i64: 2, 8>}, {pipeline_mode = #tpu.pipeline_mode<synchronous>, transform_indices = @transform_2, window_bounds = array<i64: 2856, 128>}, {pipeline_mode = #tpu.pipeline_mode<synchronous>, transform_indices = @transform_3, window_bounds = array<i64: 2, 8, 2>}]} {
    %c0 = arith.constant 0 : index
    %c0_0 = arith.constant 0 : index
    %0 = vector.load %arg2[%c0, %c0_0] : memref<2x8xf32, #tpu.memory_space<vmem>>, vector<2x8xf32>
    %1 = vector.shape_cast %0 : vector<2x8xf32> to vector<2x1x8xf32>
    %cst = arith.constant 0.000000e+00 : f32
    %2 = vector.broadcast %cst : f32 to vector<2x1x8xf32>
    %3 = arith.cmpf ogt, %1, %2 : vector<2x1x8xf32>
    %4 = tpu.concatenate %3, %3 in 0 : vector<2x1x8xi1>, vector<2x1x8xi1> -> vector<4x1x8xi1>
    %c0_1 = arith.constant 0 : index
    %c0_2 = arith.constant 0 : index
    %c0_3 = arith.constant 0 : index
    %5 = vector.load %arg1[%c0_1, %c0_2, %c0_3] : memref<2x8x28xf32, #tpu.memory_space<vmem>>, vector<2x8x28xf32>
    %6 = vector.shape_cast %5 : vector<2x8x28xf32> to vector<16x28xf32>
    %c0_4 = arith.constant 0 : index
    %c0_5 = arith.constant 0 : index
    %7 = vector.load %arg3[%c0_4, %c0_5] : memref<2856x128xf32, #tpu.memory_space<vmem>>, vector<28x32xf32>
    %cst_6 = arith.constant dense<0.000000e+00> : vector<16x32xf32>
    %8 = tpu.matmul %6, %7, %cst_6 {dimension_numbers = #tpu.dot_dimension_numbers<[1], [0], [0], [1], [0, 0, 1, 1], [], []>} : vector<16x28xf32>, vector<28x32xf32>, vector<16x32xf32> -> vector<16x32xf32>
    %c32 = arith.constant 32 : index
    %c0_7 = arith.constant 0 : index
    %9 = vector.load %arg3[%c32, %c0_7] : memref<2856x128xf32, #tpu.memory_space<vmem>>, vector<1x32xf32>
    %10 = vector.broadcast %9 : vector<1x32xf32> to vector<16x32xf32>
    %11 = arith.addf %8, %10 : vector<16x32xf32>
    %c40 = arith.constant 40 : index
    %c0_8 = arith.constant 0 : index
    %12 = vector.load %arg3[%c40, %c0_8] : memref<2856x128xf32, #tpu.memory_space<vmem>>, vector<5x32xf32>
    %c48 = arith.constant 48 : index
    %c0_9 = arith.constant 0 : index
    %13 = vector.load %arg3[%c48, %c0_9] : memref<2856x128xf32, #tpu.memory_space<vmem>>, vector<5x32xf32>
    %14 = vector.extract_strided_slice %12 {offsets = [0, 0], sizes = [1, 32], strides = [1, 1]} : vector<5x32xf32> to vector<1x32xf32>
    %15 = vector.shape_cast %14 : vector<1x32xf32> to vector<32xf32>
    %16 = vector.extract_strided_slice %13 {offsets = [0, 0], sizes = [1, 32], strides = [1, 1]} : vector<5x32xf32> to vector<1x32xf32>
    %17 = vector.shape_cast %16 : vector<1x32xf32> to vector<32xf32>
    %cst_10 = arith.constant dense<0.000000e+00> : vector<16xf32>
    %18 = vector.multi_reduction <add>, %11, %cst_10 [1] : vector<16x32xf32> to vector<16xf32>
    %19 = vector.shape_cast %18 : vector<16xf32> to vector<16x1xf32>
    %cst_11 = arith.constant 3.200000e+01 : f32
    %20 = vector.broadcast %cst_11 : f32 to vector<16x1xf32>
    %21 = arith.divf %19, %20 : vector<16x1xf32>
    %22 = vector.broadcast %21 : vector<16x1xf32> to vector<16x32xf32>
    %23 = arith.subf %11, %22 : vector<16x32xf32>
    %24 = arith.mulf %23, %23 : vector<16x32xf32>
    %cst_12 = arith.constant dense<0.000000e+00> : vector<16xf32>
    %25 = vector.multi_reduction <add>, %24, %cst_12 [1] : vector<16x32xf32> to vector<16xf32>
    %26 = vector.shape_cast %25 : vector<16xf32> to vector<16x1xf32>
    %cst_13 = arith.constant 3.200000e+01 : f32
    %27 = vector.broadcast %cst_13 : f32 to vector<16x1xf32>
    %28 = arith.divf %26, %27 : vector<16x1xf32>
    %29 = vector.broadcast %21 : vector<16x1xf32> to vector<16x32xf32>
    %30 = arith.subf %11, %29 : vector<16x32xf32>
    %cst_14 = arith.constant 9.99999996E-13 : f32
    %31 = vector.broadcast %cst_14 : f32 to vector<16x1xf32>
    %32 = arith.addf %28, %31 : vector<16x1xf32>
    %33 = math.rsqrt %32 : vector<16x1xf32>
    %34 = vector.broadcast %33 : vector<16x1xf32> to vector<16x32xf32>
    %35 = arith.mulf %30, %34 : vector<16x32xf32>
    %36 = vector.shape_cast %15 : vector<32xf32> to vector<1x32xf32>
    %37 = vector.broadcast %36 : vector<1x32xf32> to vector<16x32xf32>
    %38 = arith.mulf %35, %37 : vector<16x32xf32>
    %39 = vector.shape_cast %17 : vector<32xf32> to vector<1x32xf32>
    %40 = vector.broadcast %39 : vector<1x32xf32> to vector<16x32xf32>
    %41 = arith.addf %38, %40 : vector<16x32xf32>
    %42 = vector.shape_cast %41 : vector<16x32xf32> to vector<2x8x32xf32>
    %cst_15 = arith.constant 0.000000e+00 : f32
    %43 = vector.broadcast %cst_15 : f32 to vector<2x1x32xf32>
    %44 = vector.extract_strided_slice %42 {offsets = [0, 0, 0], sizes = [2, 7, 32], strides = [1, 1, 1]} : vector<2x8x32xf32> to vector<2x7x32xf32>
    %45 = tpu.concatenate %43, %44 in 1 : vector<2x1x32xf32>, vector<2x7x32xf32> -> vector<2x8x32xf32>
    %46 = vector.extract_strided_slice %42 {offsets = [0, 1, 0], sizes = [2, 7, 32], strides = [1, 1, 1]} : vector<2x8x32xf32> to vector<2x7x32xf32>
    %cst_16 = arith.constant 0.000000e+00 : f32
    %47 = vector.broadcast %cst_16 : f32 to vector<2x1x32xf32>
    %48 = tpu.concatenate %46, %47 in 1 : vector<2x7x32xf32>, vector<2x1x32xf32> -> vector<2x8x32xf32>
    %49 = tpu.concatenate %45, %42, %48 in 2 : vector<2x8x32xf32>, vector<2x8x32xf32>, vector<2x8x32xf32> -> vector<2x8x96xf32>
    %50 = vector.shape_cast %49 : vector<2x8x96xf32> to vector<16x96xf32>
    %c56 = arith.constant 56 : index
    %c0_17 = arith.constant 0 : index
    %51 = vector.load %arg3[%c56, %c0_17] : memref<2856x128xf32, #tpu.memory_space<vmem>>, vector<96x128xf32>
    %cst_18 = arith.constant dense<0.000000e+00> : vector<16x128xf32>
    %52 = tpu.matmul %50, %51, %cst_18 {dimension_numbers = #tpu.dot_dimension_numbers<[1], [0], [0], [1], [0, 0, 1, 1], [], []>} : vector<16x96xf32>, vector<96x128xf32>, vector<16x128xf32> -> vector<16x128xf32>
    %c152 = arith.constant 152 : index
    %c0_19 = arith.constant 0 : index
    %53 = vector.load %arg3[%c152, %c0_19] : memref<2856x128xf32, #tpu.memory_space<vmem>>, vector<1x128xf32>
    %54 = vector.broadcast %53 : vector<1x128xf32> to vector<16x128xf32>
    %55 = arith.addf %52, %54 : vector<16x128xf32>
    %cst_20 = arith.constant 0.000000e+00 : f32
    %56 = vector.broadcast %cst_20 : f32 to vector<16x128xf32>
    %57 = arith.maximumf %55, %56 : vector<16x128xf32>
    %58 = vector.shape_cast %57 : vector<16x128xf32> to vector<2x8x128xf32>
    %cst_21 = arith.constant 0.000000e+00 : f32
    %59 = vector.broadcast %cst_21 : f32 to vector<2x1x128xf32>
    %60 = vector.extract_strided_slice %58 {offsets = [0, 0, 0], sizes = [2, 7, 128], strides = [1, 1, 1]} : vector<2x8x128xf32> to vector<2x7x128xf32>
    %61 = tpu.concatenate %59, %60 in 1 : vector<2x1x128xf32>, vector<2x7x128xf32> -> vector<2x8x128xf32>
    %62 = vector.extract_strided_slice %58 {offsets = [0, 1, 0], sizes = [2, 7, 128], strides = [1, 1, 1]} : vector<2x8x128xf32> to vector<2x7x128xf32>
    %cst_22 = arith.constant 0.000000e+00 : f32
    %63 = vector.broadcast %cst_22 : f32 to vector<2x1x128xf32>
    %64 = tpu.concatenate %62, %63 in 1 : vector<2x7x128xf32>, vector<2x1x128xf32> -> vector<2x8x128xf32>
    %65 = tpu.concatenate %61, %58, %64 in 2 : vector<2x8x128xf32>, vector<2x8x128xf32>, vector<2x8x128xf32> -> vector<2x8x384xf32>
    %66 = vector.shape_cast %65 : vector<2x8x384xf32> to vector<16x384xf32>
    %c160 = arith.constant 160 : index
    %c0_23 = arith.constant 0 : index
    %67 = vector.load %arg3[%c160, %c0_23] : memref<2856x128xf32, #tpu.memory_space<vmem>>, vector<384x32xf32>
    %cst_24 = arith.constant dense<0.000000e+00> : vector<16x32xf32>
    %68 = tpu.matmul %66, %67, %cst_24 {dimension_numbers = #tpu.dot_dimension_numbers<[1], [0], [0], [1], [0, 0, 1, 1], [], []>} : vector<16x384xf32>, vector<384x32xf32>, vector<16x32xf32> -> vector<16x32xf32>
    %c544 = arith.constant 544 : index
    %c0_25 = arith.constant 0 : index
    %69 = vector.load %arg3[%c544, %c0_25] : memref<2856x128xf32, #tpu.memory_space<vmem>>, vector<1x32xf32>
    %70 = vector.broadcast %69 : vector<1x32xf32> to vector<16x32xf32>
    %71 = arith.addf %68, %70 : vector<16x32xf32>
    %cst_26 = arith.constant 5.000000e-01 : f32
    %72 = vector.broadcast %cst_26 : f32 to vector<16x32xf32>
    %73 = arith.mulf %72, %71 : vector<16x32xf32>
    %74 = arith.addf %11, %73 : vector<16x32xf32>
    %75 = vector.extract_strided_slice %12 {offsets = [1, 0], sizes = [1, 32], strides = [1, 1]} : vector<5x32xf32> to vector<1x32xf32>
    %76 = vector.shape_cast %75 : vector<1x32xf32> to vector<32xf32>
    %77 = vector.extract_strided_slice %13 {offsets = [1, 0], sizes = [1, 32], strides = [1, 1]} : vector<5x32xf32> to vector<1x32xf32>
    %78 = vector.shape_cast %77 : vector<1x32xf32> to vector<32xf32>
    %cst_27 = arith.constant dense<0.000000e+00> : vector<16xf32>
    %79 = vector.multi_reduction <add>, %74, %cst_27 [1] : vector<16x32xf32> to vector<16xf32>
    %80 = vector.shape_cast %79 : vector<16xf32> to vector<16x1xf32>
    %cst_28 = arith.constant 3.200000e+01 : f32
    %81 = vector.broadcast %cst_28 : f32 to vector<16x1xf32>
    %82 = arith.divf %80, %81 : vector<16x1xf32>
    %83 = vector.broadcast %82 : vector<16x1xf32> to vector<16x32xf32>
    %84 = arith.subf %74, %83 : vector<16x32xf32>
    %85 = arith.mulf %84, %84 : vector<16x32xf32>
    %cst_29 = arith.constant dense<0.000000e+00> : vector<16xf32>
    %86 = vector.multi_reduction <add>, %85, %cst_29 [1] : vector<16x32xf32> to vector<16xf32>
    %87 = vector.shape_cast %86 : vector<16xf32> to vector<16x1xf32>
    %cst_30 = arith.constant 3.200000e+01 : f32
    %88 = vector.broadcast %cst_30 : f32 to vector<16x1xf32>
    %89 = arith.divf %87, %88 : vector<16x1xf32>
    %90 = vector.broadcast %82 : vector<16x1xf32> to vector<16x32xf32>
    %91 = arith.subf %74, %90 : vector<16x32xf32>
    %cst_31 = arith.constant 9.99999996E-13 : f32
    %92 = vector.broadcast %cst_31 : f32 to vector<16x1xf32>
    %93 = arith.addf %89, %92 : vector<16x1xf32>
    %94 = math.rsqrt %93 : vector<16x1xf32>
    %95 = vector.broadcast %94 : vector<16x1xf32> to vector<16x32xf32>
    %96 = arith.mulf %91, %95 : vector<16x32xf32>
    %97 = vector.shape_cast %76 : vector<32xf32> to vector<1x32xf32>
    %98 = vector.broadcast %97 : vector<1x32xf32> to vector<16x32xf32>
    %99 = arith.mulf %96, %98 : vector<16x32xf32>
    %100 = vector.shape_cast %78 : vector<32xf32> to vector<1x32xf32>
    %101 = vector.broadcast %100 : vector<1x32xf32> to vector<16x32xf32>
    %102 = arith.addf %99, %101 : vector<16x32xf32>
    %c1048 = arith.constant 1048 : index
    %c0_32 = arith.constant 0 : index
    %103 = vector.load %arg3[%c1048, %c0_32] : memref<2856x128xf32, #tpu.memory_space<vmem>>, vector<32x96xf32>
    %cst_33 = arith.constant dense<0.000000e+00> : vector<16x96xf32>
    %104 = tpu.matmul %102, %103, %cst_33 {dimension_numbers = #tpu.dot_dimension_numbers<[1], [0], [0], [1], [0, 0, 1, 1], [], []>} : vector<16x32xf32>, vector<32x96xf32>, vector<16x96xf32> -> vector<16x96xf32>
    %c1080 = arith.constant 1080 : index
    %c0_34 = arith.constant 0 : index
    %105 = vector.load %arg3[%c1080, %c0_34] : memref<2856x128xf32, #tpu.memory_space<vmem>>, vector<1x96xf32>
    %106 = vector.broadcast %105 : vector<1x96xf32> to vector<16x96xf32>
    %107 = arith.addf %104, %106 : vector<16x96xf32>
    %108 = vector.extract_strided_slice %107 {offsets = [0, 0], sizes = [16, 32], strides = [1, 1]} : vector<16x96xf32> to vector<16x32xf32>
    %109 = vector.extract_strided_slice %107 {offsets = [0, 32], sizes = [16, 32], strides = [1, 1]} : vector<16x96xf32> to vector<16x32xf32>
    %110 = vector.shape_cast %109 : vector<16x32xf32> to vector<2x8x32xf32>
    %111 = vector.extract_strided_slice %107 {offsets = [0, 64], sizes = [16, 32], strides = [1, 1]} : vector<16x96xf32> to vector<16x32xf32>
    %112 = vector.shape_cast %111 : vector<16x32xf32> to vector<2x8x32xf32>
    %c1128 = arith.constant 1128 : index
    %c0_35 = arith.constant 0 : index
    %113 = vector.load %arg3[%c1128, %c0_35] : memref<2856x128xf32, #tpu.memory_space<vmem>>, vector<1x32xf32>
    %114 = vector.broadcast %113 : vector<1x32xf32> to vector<16x32xf32>
    %115 = arith.addf %108, %114 : vector<16x32xf32>
    %c1088 = arith.constant 1088 : index
    %c0_36 = arith.constant 0 : index
    %116 = vector.load %arg3[%c1088, %c0_36] : memref<2856x128xf32, #tpu.memory_space<vmem>>, vector<32x30xf32>
    %cst_37 = arith.constant dense<0.000000e+00> : vector<16x30xf32>
    %117 = tpu.matmul %115, %116, %cst_37 {dimension_numbers = #tpu.dot_dimension_numbers<[1], [0], [0], [1], [0, 0, 1, 1], [], []>} : vector<16x32xf32>, vector<32x30xf32>, vector<16x30xf32> -> vector<16x30xf32>
    %118 = vector.extract_strided_slice %117 {offsets = [0, 0], sizes = [16, 15], strides = [1, 1]} : vector<16x30xf32> to vector<16x15xf32>
    %119 = vector.shape_cast %118 : vector<16x15xf32> to vector<2x8x15xf32>
    %120 = vector.extract_strided_slice %117 {offsets = [0, 15], sizes = [16, 15], strides = [1, 1]} : vector<16x30xf32> to vector<16x15xf32>
    %121 = vector.shape_cast %120 : vector<16x15xf32> to vector<2x8x15xf32>
    %122 = tpu.concatenate %119, %121 in 0 : vector<2x8x15xf32>, vector<2x8x15xf32> -> vector<4x8x15xf32>
    %123 = vector.extract_strided_slice %122 {offsets = [0, 0, 7], sizes = [4, 1, 8], strides = [1, 1, 1]} : vector<4x8x15xf32> to vector<4x1x8xf32>
    %124 = vector.extract_strided_slice %122 {offsets = [0, 1, 6], sizes = [4, 1, 8], strides = [1, 1, 1]} : vector<4x8x15xf32> to vector<4x1x8xf32>
    %125 = vector.extract_strided_slice %122 {offsets = [0, 2, 5], sizes = [4, 1, 8], strides = [1, 1, 1]} : vector<4x8x15xf32> to vector<4x1x8xf32>
    %126 = vector.extract_strided_slice %122 {offsets = [0, 3, 4], sizes = [4, 1, 8], strides = [1, 1, 1]} : vector<4x8x15xf32> to vector<4x1x8xf32>
    %127 = vector.extract_strided_slice %122 {offsets = [0, 4, 3], sizes = [4, 1, 8], strides = [1, 1, 1]} : vector<4x8x15xf32> to vector<4x1x8xf32>
    %128 = vector.extract_strided_slice %122 {offsets = [0, 5, 2], sizes = [4, 1, 8], strides = [1, 1, 1]} : vector<4x8x15xf32> to vector<4x1x8xf32>
    %129 = vector.extract_strided_slice %122 {offsets = [0, 6, 1], sizes = [4, 1, 8], strides = [1, 1, 1]} : vector<4x8x15xf32> to vector<4x1x8xf32>
    %130 = vector.extract_strided_slice %122 {offsets = [0, 7, 0], sizes = [4, 1, 8], strides = [1, 1, 1]} : vector<4x8x15xf32> to vector<4x1x8xf32>
    %131 = tpu.concatenate %123, %124, %125, %126, %127, %128, %129, %130 in 1 : vector<4x1x8xf32>, vector<4x1x8xf32>, vector<4x1x8xf32>, vector<4x1x8xf32>, vector<4x1x8xf32>, vector<4x1x8xf32>, vector<4x1x8xf32>, vector<4x1x8xf32> -> vector<4x8x8xf32>
    %c1120 = arith.constant 1120 : index
    %c0_38 = arith.constant 0 : index
    %132 = vector.load %arg3[%c1120, %c0_38] : memref<2856x128xf32, #tpu.memory_space<vmem>>, vector<1x32xf32>
    %133 = vector.broadcast %132 : vector<1x32xf32> to vector<16x32xf32>
    %134 = arith.addf %108, %133 : vector<16x32xf32>
    %135 = vector.shape_cast %134 : vector<16x32xf32> to vector<2x8x32xf32>
    %136 = vector.extract_strided_slice %135 {offsets = [0, 0, 0], sizes = [2, 8, 16], strides = [1, 1, 1]} : vector<2x8x32xf32> to vector<2x8x16xf32>
    %137 = vector.extract_strided_slice %135 {offsets = [0, 0, 16], sizes = [2, 8, 16], strides = [1, 1, 1]} : vector<2x8x32xf32> to vector<2x8x16xf32>
    %138 = tpu.concatenate %136, %137 in 0 : vector<2x8x16xf32>, vector<2x8x16xf32> -> vector<4x8x16xf32>
    %139 = vector.extract_strided_slice %110 {offsets = [0, 0, 0], sizes = [2, 8, 16], strides = [1, 1, 1]} : vector<2x8x32xf32> to vector<2x8x16xf32>
    %140 = vector.extract_strided_slice %110 {offsets = [0, 0, 16], sizes = [2, 8, 16], strides = [1, 1, 1]} : vector<2x8x32xf32> to vector<2x8x16xf32>
    %141 = tpu.concatenate %139, %140 in 0 : vector<2x8x16xf32>, vector<2x8x16xf32> -> vector<4x8x16xf32>
    %142 = vector.extract_strided_slice %112 {offsets = [0, 0, 0], sizes = [2, 8, 16], strides = [1, 1, 1]} : vector<2x8x32xf32> to vector<2x8x16xf32>
    %143 = vector.extract_strided_slice %112 {offsets = [0, 0, 16], sizes = [2, 8, 16], strides = [1, 1, 1]} : vector<2x8x32xf32> to vector<2x8x16xf32>
    %144 = tpu.concatenate %142, %143 in 0 : vector<2x8x16xf32>, vector<2x8x16xf32> -> vector<4x8x16xf32>
    "tpu.trace_start"() <{level = 10 : i32, message = "mtd,msd->mts"}> : () -> ()
    %cst_39 = arith.constant dense<0.000000e+00> : vector<4x8x8xf32>
    %145 = tpu.matmul %138, %141, %cst_39 {dimension_numbers = #tpu.dot_dimension_numbers<[2], [2], [1], [1], [0, 0, 0, 1, 1, 1], [0], [0]>} : vector<4x8x16xf32>, vector<4x8x16xf32>, vector<4x8x8xf32> -> vector<4x8x8xf32>
    "tpu.trace_stop"() : () -> ()
    %146 = arith.addf %145, %131 : vector<4x8x8xf32>
    %cst_40 = arith.constant 2.500000e-01 : f32
    %147 = vector.broadcast %cst_40 : f32 to vector<4x8x8xf32>
    %148 = arith.mulf %146, %147 : vector<4x8x8xf32>
    %cst_41 = arith.constant -1.000000e+30 : f32
    %149 = vector.shape_cast %4 : vector<4x1x8xi1> to vector<4x1x8xi1>
    %150 = vector.broadcast %149 : vector<4x1x8xi1> to vector<4x8x8xi1>
    %151 = vector.broadcast %cst_41 : f32 to vector<4x8x8xf32>
    %152 = arith.select %150, %148, %151 : vector<4x8x8xi1>, vector<4x8x8xf32>
    %cst_42 = arith.constant dense<0xFF800000> : vector<4x8xf32>
    %153 = vector.multi_reduction <maximumf>, %152, %cst_42 [2] : vector<4x8x8xf32> to vector<4x8xf32>
    %154 = vector.shape_cast %153 : vector<4x8xf32> to vector<4x8x1xf32>
    %155 = vector.broadcast %154 : vector<4x8x1xf32> to vector<4x8x8xf32>
    %156 = arith.subf %152, %155 : vector<4x8x8xf32>
    %157 = math.exp %156 : vector<4x8x8xf32>
    %cst_43 = arith.constant dense<0.000000e+00> : vector<4x8xf32>
    %158 = vector.multi_reduction <add>, %157, %cst_43 [2] : vector<4x8x8xf32> to vector<4x8xf32>
    %159 = vector.shape_cast %158 : vector<4x8xf32> to vector<4x8x1xf32>
    %160 = vector.broadcast %159 : vector<4x8x1xf32> to vector<4x8x8xf32>
    %161 = arith.divf %157, %160 : vector<4x8x8xf32>
    %cst_44 = arith.constant 0.000000e+00 : f32
    %162 = vector.shape_cast %4 : vector<4x1x8xi1> to vector<4x1x8xi1>
    %163 = vector.broadcast %162 : vector<4x1x8xi1> to vector<4x8x8xi1>
    %164 = vector.broadcast %cst_44 : f32 to vector<4x8x8xf32>
    %165 = arith.select %163, %161, %164 : vector<4x8x8xi1>, vector<4x8x8xf32>
    "tpu.trace_start"() <{level = 10 : i32, message = "mts,msd->mtd"}> : () -> ()
    %cst_45 = arith.constant dense<0.000000e+00> : vector<4x8x16xf32>
    %166 = tpu.matmul %165, %144, %cst_45 {dimension_numbers = #tpu.dot_dimension_numbers<[2], [1], [1], [2], [0, 0, 0, 1, 1, 2], [0], [0]>} : vector<4x8x8xf32>, vector<4x8x16xf32>, vector<4x8x16xf32> -> vector<4x8x16xf32>
    "tpu.trace_stop"() : () -> ()
    %167 = vector.extract_strided_slice %166 {offsets = [0, 0, 0], sizes = [2, 8, 16], strides = [1, 1, 1]} : vector<4x8x16xf32> to vector<2x8x16xf32>
    %168 = vector.extract_strided_slice %166 {offsets = [2, 0, 0], sizes = [2, 8, 16], strides = [1, 1, 1]} : vector<4x8x16xf32> to vector<2x8x16xf32>
    %169 = tpu.concatenate %167, %168 in 2 : vector<2x8x16xf32>, vector<2x8x16xf32> -> vector<2x8x32xf32>
    %170 = vector.shape_cast %169 : vector<2x8x32xf32> to vector<16x32xf32>
    %c1136 = arith.constant 1136 : index
    %c0_46 = arith.constant 0 : index
    %171 = vector.load %arg3[%c1136, %c0_46] : memref<2856x128xf32, #tpu.memory_space<vmem>>, vector<32x32xf32>
    %cst_47 = arith.constant dense<0.000000e+00> : vector<16x32xf32>
    %172 = tpu.matmul %170, %171, %cst_47 {dimension_numbers = #tpu.dot_dimension_numbers<[1], [0], [0], [1], [0, 0, 1, 1], [], []>} : vector<16x32xf32>, vector<32x32xf32>, vector<16x32xf32> -> vector<16x32xf32>
    %173 = arith.addf %74, %172 : vector<16x32xf32>
    %c1168 = arith.constant 1168 : index
    %c0_48 = arith.constant 0 : index
    %174 = vector.load %arg3[%c1168, %c0_48] : memref<2856x128xf32, #tpu.memory_space<vmem>>, vector<1x32xf32>
    %175 = vector.broadcast %174 : vector<1x32xf32> to vector<16x32xf32>
    %176 = arith.addf %173, %175 : vector<16x32xf32>
    %177 = vector.extract_strided_slice %12 {offsets = [2, 0], sizes = [1, 32], strides = [1, 1]} : vector<5x32xf32> to vector<1x32xf32>
    %178 = vector.shape_cast %177 : vector<1x32xf32> to vector<32xf32>
    %179 = vector.extract_strided_slice %13 {offsets = [2, 0], sizes = [1, 32], strides = [1, 1]} : vector<5x32xf32> to vector<1x32xf32>
    %180 = vector.shape_cast %179 : vector<1x32xf32> to vector<32xf32>
    %cst_49 = arith.constant dense<0.000000e+00> : vector<16xf32>
    %181 = vector.multi_reduction <add>, %176, %cst_49 [1] : vector<16x32xf32> to vector<16xf32>
    %182 = vector.shape_cast %181 : vector<16xf32> to vector<16x1xf32>
    %cst_50 = arith.constant 3.200000e+01 : f32
    %183 = vector.broadcast %cst_50 : f32 to vector<16x1xf32>
    %184 = arith.divf %182, %183 : vector<16x1xf32>
    %185 = vector.broadcast %184 : vector<16x1xf32> to vector<16x32xf32>
    %186 = arith.subf %176, %185 : vector<16x32xf32>
    %187 = arith.mulf %186, %186 : vector<16x32xf32>
    %cst_51 = arith.constant dense<0.000000e+00> : vector<16xf32>
    %188 = vector.multi_reduction <add>, %187, %cst_51 [1] : vector<16x32xf32> to vector<16xf32>
    %189 = vector.shape_cast %188 : vector<16xf32> to vector<16x1xf32>
    %cst_52 = arith.constant 3.200000e+01 : f32
    %190 = vector.broadcast %cst_52 : f32 to vector<16x1xf32>
    %191 = arith.divf %189, %190 : vector<16x1xf32>
    %192 = vector.broadcast %184 : vector<16x1xf32> to vector<16x32xf32>
    %193 = arith.subf %176, %192 : vector<16x32xf32>
    %cst_53 = arith.constant 9.99999996E-13 : f32
    %194 = vector.broadcast %cst_53 : f32 to vector<16x1xf32>
    %195 = arith.addf %191, %194 : vector<16x1xf32>
    %196 = math.rsqrt %195 : vector<16x1xf32>
    %197 = vector.broadcast %196 : vector<16x1xf32> to vector<16x32xf32>
    %198 = arith.mulf %193, %197 : vector<16x32xf32>
    %199 = vector.shape_cast %178 : vector<32xf32> to vector<1x32xf32>
    %200 = vector.broadcast %199 : vector<1x32xf32> to vector<16x32xf32>
    %201 = arith.mulf %198, %200 : vector<16x32xf32>
    %202 = vector.shape_cast %180 : vector<32xf32> to vector<1x32xf32>
    %203 = vector.broadcast %202 : vector<1x32xf32> to vector<16x32xf32>
    %204 = arith.addf %201, %203 : vector<16x32xf32>
    %c1176 = arith.constant 1176 : index
    %c0_54 = arith.constant 0 : index
    %205 = vector.load %arg3[%c1176, %c0_54] : memref<2856x128xf32, #tpu.memory_space<vmem>>, vector<32x64xf32>
    %cst_55 = arith.constant dense<0.000000e+00> : vector<16x64xf32>
    %206 = tpu.matmul %204, %205, %cst_55 {dimension_numbers = #tpu.dot_dimension_numbers<[1], [0], [0], [1], [0, 0, 1, 1], [], []>} : vector<16x32xf32>, vector<32x64xf32>, vector<16x64xf32> -> vector<16x64xf32>
    %c1208 = arith.constant 1208 : index
    %c0_56 = arith.constant 0 : index
    %207 = vector.load %arg3[%c1208, %c0_56] : memref<2856x128xf32, #tpu.memory_space<vmem>>, vector<1x64xf32>
    %208 = vector.broadcast %207 : vector<1x64xf32> to vector<16x64xf32>
    %209 = arith.addf %206, %208 : vector<16x64xf32>
    %210 = vector.extract_strided_slice %209 {offsets = [0, 0], sizes = [16, 32], strides = [1, 1]} : vector<16x64xf32> to vector<16x32xf32>
    %211 = vector.extract_strided_slice %209 {offsets = [0, 32], sizes = [16, 32], strides = [1, 1]} : vector<16x64xf32> to vector<16x32xf32>
    %212 = arith.negf %211 : vector<16x32xf32>
    %213 = math.exp %212 : vector<16x32xf32>
    %cst_57 = arith.constant 1.000000e+00 : f32
    %214 = vector.broadcast %cst_57 : f32 to vector<16x32xf32>
    %215 = arith.addf %214, %213 : vector<16x32xf32>
    %216 = arith.divf %214, %215 : vector<16x32xf32>
    %217 = arith.mulf %210, %216 : vector<16x32xf32>
    %218 = vector.shape_cast %217 : vector<16x32xf32> to vector<2x8x32xf32>
    %c1216 = arith.constant 1216 : index
    %c0_58 = arith.constant 0 : index
    %219 = vector.load %arg3[%c1216, %c0_58] : memref<2856x128xf32, #tpu.memory_space<vmem>>, vector<64x32xf32>
    %c1280 = arith.constant 1280 : index
    %c0_59 = arith.constant 0 : index
    %220 = vector.load %arg3[%c1280, %c0_59] : memref<2856x128xf32, #tpu.memory_space<vmem>>, vector<1x32xf32>
    %221 = vector.shape_cast %220 : vector<1x32xf32> to vector<1x1x32xf32>
    %222 = vector.shape_cast %221 : vector<1x1x32xf32> to vector<1x1x32xf32>
    %223 = vector.broadcast %222 : vector<1x1x32xf32> to vector<2x8x32xf32>
    %224 = vector.extract_strided_slice %218 {offsets = [0, 0, 0], sizes = [2, 1, 32], strides = [1, 1, 1]} : vector<2x8x32xf32> to vector<2x1x32xf32>
    %225 = vector.extract_strided_slice %219 {offsets = [0, 0], sizes = [8, 32], strides = [1, 1]} : vector<64x32xf32> to vector<8x32xf32>
    %226 = vector.shape_cast %225 : vector<8x32xf32> to vector<1x8x32xf32>
    %227 = vector.broadcast %224 : vector<2x1x32xf32> to vector<2x8x32xf32>
    %228 = vector.broadcast %226 : vector<1x8x32xf32> to vector<2x8x32xf32>
    %229 = arith.mulf %227, %228 : vector<2x8x32xf32>
    %230 = arith.addf %223, %229 : vector<2x8x32xf32>
    %231 = vector.extract_strided_slice %218 {offsets = [0, 1, 0], sizes = [2, 1, 32], strides = [1, 1, 1]} : vector<2x8x32xf32> to vector<2x1x32xf32>
    %232 = vector.extract_strided_slice %219 {offsets = [8, 0], sizes = [8, 32], strides = [1, 1]} : vector<64x32xf32> to vector<8x32xf32>
    %233 = vector.shape_cast %232 : vector<8x32xf32> to vector<1x8x32xf32>
    %234 = vector.broadcast %231 : vector<2x1x32xf32> to vector<2x8x32xf32>
    %235 = vector.broadcast %233 : vector<1x8x32xf32> to vector<2x8x32xf32>
    %236 = arith.mulf %234, %235 : vector<2x8x32xf32>
    %237 = arith.addf %230, %236 : vector<2x8x32xf32>
    %238 = vector.extract_strided_slice %218 {offsets = [0, 2, 0], sizes = [2, 1, 32], strides = [1, 1, 1]} : vector<2x8x32xf32> to vector<2x1x32xf32>
    %239 = vector.extract_strided_slice %219 {offsets = [16, 0], sizes = [8, 32], strides = [1, 1]} : vector<64x32xf32> to vector<8x32xf32>
    %240 = vector.shape_cast %239 : vector<8x32xf32> to vector<1x8x32xf32>
    %241 = vector.broadcast %238 : vector<2x1x32xf32> to vector<2x8x32xf32>
    %242 = vector.broadcast %240 : vector<1x8x32xf32> to vector<2x8x32xf32>
    %243 = arith.mulf %241, %242 : vector<2x8x32xf32>
    %244 = arith.addf %237, %243 : vector<2x8x32xf32>
    %245 = vector.extract_strided_slice %218 {offsets = [0, 3, 0], sizes = [2, 1, 32], strides = [1, 1, 1]} : vector<2x8x32xf32> to vector<2x1x32xf32>
    %246 = vector.extract_strided_slice %219 {offsets = [24, 0], sizes = [8, 32], strides = [1, 1]} : vector<64x32xf32> to vector<8x32xf32>
    %247 = vector.shape_cast %246 : vector<8x32xf32> to vector<1x8x32xf32>
    %248 = vector.broadcast %245 : vector<2x1x32xf32> to vector<2x8x32xf32>
    %249 = vector.broadcast %247 : vector<1x8x32xf32> to vector<2x8x32xf32>
    %250 = arith.mulf %248, %249 : vector<2x8x32xf32>
    %251 = arith.addf %244, %250 : vector<2x8x32xf32>
    %252 = vector.extract_strided_slice %218 {offsets = [0, 4, 0], sizes = [2, 1, 32], strides = [1, 1, 1]} : vector<2x8x32xf32> to vector<2x1x32xf32>
    %253 = vector.extract_strided_slice %219 {offsets = [32, 0], sizes = [8, 32], strides = [1, 1]} : vector<64x32xf32> to vector<8x32xf32>
    %254 = vector.shape_cast %253 : vector<8x32xf32> to vector<1x8x32xf32>
    %255 = vector.broadcast %252 : vector<2x1x32xf32> to vector<2x8x32xf32>
    %256 = vector.broadcast %254 : vector<1x8x32xf32> to vector<2x8x32xf32>
    %257 = arith.mulf %255, %256 : vector<2x8x32xf32>
    %258 = arith.addf %251, %257 : vector<2x8x32xf32>
    %259 = vector.extract_strided_slice %218 {offsets = [0, 5, 0], sizes = [2, 1, 32], strides = [1, 1, 1]} : vector<2x8x32xf32> to vector<2x1x32xf32>
    %260 = vector.extract_strided_slice %219 {offsets = [40, 0], sizes = [8, 32], strides = [1, 1]} : vector<64x32xf32> to vector<8x32xf32>
    %261 = vector.shape_cast %260 : vector<8x32xf32> to vector<1x8x32xf32>
    %262 = vector.broadcast %259 : vector<2x1x32xf32> to vector<2x8x32xf32>
    %263 = vector.broadcast %261 : vector<1x8x32xf32> to vector<2x8x32xf32>
    %264 = arith.mulf %262, %263 : vector<2x8x32xf32>
    %265 = arith.addf %258, %264 : vector<2x8x32xf32>
    %266 = vector.extract_strided_slice %218 {offsets = [0, 6, 0], sizes = [2, 1, 32], strides = [1, 1, 1]} : vector<2x8x32xf32> to vector<2x1x32xf32>
    %267 = vector.extract_strided_slice %219 {offsets = [48, 0], sizes = [8, 32], strides = [1, 1]} : vector<64x32xf32> to vector<8x32xf32>
    %268 = vector.shape_cast %267 : vector<8x32xf32> to vector<1x8x32xf32>
    %269 = vector.broadcast %266 : vector<2x1x32xf32> to vector<2x8x32xf32>
    %270 = vector.broadcast %268 : vector<1x8x32xf32> to vector<2x8x32xf32>
    %271 = arith.mulf %269, %270 : vector<2x8x32xf32>
    %272 = arith.addf %265, %271 : vector<2x8x32xf32>
    %273 = vector.extract_strided_slice %218 {offsets = [0, 7, 0], sizes = [2, 1, 32], strides = [1, 1, 1]} : vector<2x8x32xf32> to vector<2x1x32xf32>
    %274 = vector.extract_strided_slice %219 {offsets = [56, 0], sizes = [8, 32], strides = [1, 1]} : vector<64x32xf32> to vector<8x32xf32>
    %275 = vector.shape_cast %274 : vector<8x32xf32> to vector<1x8x32xf32>
    %276 = vector.broadcast %273 : vector<2x1x32xf32> to vector<2x8x32xf32>
    %277 = vector.broadcast %275 : vector<1x8x32xf32> to vector<2x8x32xf32>
    %278 = arith.mulf %276, %277 : vector<2x8x32xf32>
    %279 = arith.addf %272, %278 : vector<2x8x32xf32>
    %280 = arith.negf %279 : vector<2x8x32xf32>
    %281 = math.exp %280 : vector<2x8x32xf32>
    %cst_60 = arith.constant 1.000000e+00 : f32
    %282 = vector.broadcast %cst_60 : f32 to vector<2x8x32xf32>
    %283 = arith.addf %282, %281 : vector<2x8x32xf32>
    %284 = arith.divf %282, %283 : vector<2x8x32xf32>
    %285 = arith.mulf %279, %284 : vector<2x8x32xf32>
    %286 = vector.shape_cast %285 : vector<2x8x32xf32> to vector<16x32xf32>
    %c1288 = arith.constant 1288 : index
    %c0_61 = arith.constant 0 : index
    %287 = vector.load %arg3[%c1288, %c0_61] : memref<2856x128xf32, #tpu.memory_space<vmem>>, vector<32x32xf32>
    %cst_62 = arith.constant dense<0.000000e+00> : vector<16x32xf32>
    %288 = tpu.matmul %286, %287, %cst_62 {dimension_numbers = #tpu.dot_dimension_numbers<[1], [0], [0], [1], [0, 0, 1, 1], [], []>} : vector<16x32xf32>, vector<32x32xf32>, vector<16x32xf32> -> vector<16x32xf32>
    %289 = arith.addf %176, %288 : vector<16x32xf32>
    %c1320 = arith.constant 1320 : index
    %c0_63 = arith.constant 0 : index
    %290 = vector.load %arg3[%c1320, %c0_63] : memref<2856x128xf32, #tpu.memory_space<vmem>>, vector<1x32xf32>
    %291 = vector.broadcast %290 : vector<1x32xf32> to vector<16x32xf32>
    %292 = arith.addf %289, %291 : vector<16x32xf32>
    %293 = vector.extract_strided_slice %12 {offsets = [3, 0], sizes = [1, 32], strides = [1, 1]} : vector<5x32xf32> to vector<1x32xf32>
    %294 = vector.shape_cast %293 : vector<1x32xf32> to vector<32xf32>
    %295 = vector.extract_strided_slice %13 {offsets = [3, 0], sizes = [1, 32], strides = [1, 1]} : vector<5x32xf32> to vector<1x32xf32>
    %296 = vector.shape_cast %295 : vector<1x32xf32> to vector<32xf32>
    %cst_64 = arith.constant dense<0.000000e+00> : vector<16xf32>
    %297 = vector.multi_reduction <add>, %292, %cst_64 [1] : vector<16x32xf32> to vector<16xf32>
    %298 = vector.shape_cast %297 : vector<16xf32> to vector<16x1xf32>
    %cst_65 = arith.constant 3.200000e+01 : f32
    %299 = vector.broadcast %cst_65 : f32 to vector<16x1xf32>
    %300 = arith.divf %298, %299 : vector<16x1xf32>
    %301 = vector.broadcast %300 : vector<16x1xf32> to vector<16x32xf32>
    %302 = arith.subf %292, %301 : vector<16x32xf32>
    %303 = arith.mulf %302, %302 : vector<16x32xf32>
    %cst_66 = arith.constant dense<0.000000e+00> : vector<16xf32>
    %304 = vector.multi_reduction <add>, %303, %cst_66 [1] : vector<16x32xf32> to vector<16xf32>
    %305 = vector.shape_cast %304 : vector<16xf32> to vector<16x1xf32>
    %cst_67 = arith.constant 3.200000e+01 : f32
    %306 = vector.broadcast %cst_67 : f32 to vector<16x1xf32>
    %307 = arith.divf %305, %306 : vector<16x1xf32>
    %308 = vector.broadcast %300 : vector<16x1xf32> to vector<16x32xf32>
    %309 = arith.subf %292, %308 : vector<16x32xf32>
    %cst_68 = arith.constant 9.99999996E-13 : f32
    %310 = vector.broadcast %cst_68 : f32 to vector<16x1xf32>
    %311 = arith.addf %307, %310 : vector<16x1xf32>
    %312 = math.rsqrt %311 : vector<16x1xf32>
    %313 = vector.broadcast %312 : vector<16x1xf32> to vector<16x32xf32>
    %314 = arith.mulf %309, %313 : vector<16x32xf32>
    %315 = vector.shape_cast %294 : vector<32xf32> to vector<1x32xf32>
    %316 = vector.broadcast %315 : vector<1x32xf32> to vector<16x32xf32>
    %317 = arith.mulf %314, %316 : vector<16x32xf32>
    %318 = vector.shape_cast %296 : vector<32xf32> to vector<1x32xf32>
    %319 = vector.broadcast %318 : vector<1x32xf32> to vector<16x32xf32>
    %320 = arith.addf %317, %319 : vector<16x32xf32>
    %321 = vector.shape_cast %320 : vector<16x32xf32> to vector<2x8x32xf32>
    %cst_69 = arith.constant 0.000000e+00 : f32
    %322 = vector.broadcast %cst_69 : f32 to vector<2x1x32xf32>
    %323 = vector.extract_strided_slice %321 {offsets = [0, 0, 0], sizes = [2, 7, 32], strides = [1, 1, 1]} : vector<2x8x32xf32> to vector<2x7x32xf32>
    %324 = tpu.concatenate %322, %323 in 1 : vector<2x1x32xf32>, vector<2x7x32xf32> -> vector<2x8x32xf32>
    %325 = vector.extract_strided_slice %321 {offsets = [0, 1, 0], sizes = [2, 7, 32], strides = [1, 1, 1]} : vector<2x8x32xf32> to vector<2x7x32xf32>
    %cst_70 = arith.constant 0.000000e+00 : f32
    %326 = vector.broadcast %cst_70 : f32 to vector<2x1x32xf32>
    %327 = tpu.concatenate %325, %326 in 1 : vector<2x7x32xf32>, vector<2x1x32xf32> -> vector<2x8x32xf32>
    %328 = tpu.concatenate %324, %321, %327 in 2 : vector<2x8x32xf32>, vector<2x8x32xf32>, vector<2x8x32xf32> -> vector<2x8x96xf32>
    %329 = vector.shape_cast %328 : vector<2x8x96xf32> to vector<16x96xf32>
    %c552 = arith.constant 552 : index
    %c0_71 = arith.constant 0 : index
    %330 = vector.load %arg3[%c552, %c0_71] : memref<2856x128xf32, #tpu.memory_space<vmem>>, vector<96x128xf32>
    %cst_72 = arith.constant dense<0.000000e+00> : vector<16x128xf32>
    %331 = tpu.matmul %329, %330, %cst_72 {dimension_numbers = #tpu.dot_dimension_numbers<[1], [0], [0], [1], [0, 0, 1, 1], [], []>} : vector<16x96xf32>, vector<96x128xf32>, vector<16x128xf32> -> vector<16x128xf32>
    %c648 = arith.constant 648 : index
    %c0_73 = arith.constant 0 : index
    %332 = vector.load %arg3[%c648, %c0_73] : memref<2856x128xf32, #tpu.memory_space<vmem>>, vector<1x128xf32>
    %333 = vector.broadcast %332 : vector<1x128xf32> to vector<16x128xf32>
    %334 = arith.addf %331, %333 : vector<16x128xf32>
    %cst_74 = arith.constant 0.000000e+00 : f32
    %335 = vector.broadcast %cst_74 : f32 to vector<16x128xf32>
    %336 = arith.maximumf %334, %335 : vector<16x128xf32>
    %337 = vector.shape_cast %336 : vector<16x128xf32> to vector<2x8x128xf32>
    %cst_75 = arith.constant 0.000000e+00 : f32
    %338 = vector.broadcast %cst_75 : f32 to vector<2x1x128xf32>
    %339 = vector.extract_strided_slice %337 {offsets = [0, 0, 0], sizes = [2, 7, 128], strides = [1, 1, 1]} : vector<2x8x128xf32> to vector<2x7x128xf32>
    %340 = tpu.concatenate %338, %339 in 1 : vector<2x1x128xf32>, vector<2x7x128xf32> -> vector<2x8x128xf32>
    %341 = vector.extract_strided_slice %337 {offsets = [0, 1, 0], sizes = [2, 7, 128], strides = [1, 1, 1]} : vector<2x8x128xf32> to vector<2x7x128xf32>
    %cst_76 = arith.constant 0.000000e+00 : f32
    %342 = vector.broadcast %cst_76 : f32 to vector<2x1x128xf32>
    %343 = tpu.concatenate %341, %342 in 1 : vector<2x7x128xf32>, vector<2x1x128xf32> -> vector<2x8x128xf32>
    %344 = tpu.concatenate %340, %337, %343 in 2 : vector<2x8x128xf32>, vector<2x8x128xf32>, vector<2x8x128xf32> -> vector<2x8x384xf32>
    %345 = vector.shape_cast %344 : vector<2x8x384xf32> to vector<16x384xf32>
    %c656 = arith.constant 656 : index
    %c0_77 = arith.constant 0 : index
    %346 = vector.load %arg3[%c656, %c0_77] : memref<2856x128xf32, #tpu.memory_space<vmem>>, vector<384x32xf32>
    %cst_78 = arith.constant dense<0.000000e+00> : vector<16x32xf32>
    %347 = tpu.matmul %345, %346, %cst_78 {dimension_numbers = #tpu.dot_dimension_numbers<[1], [0], [0], [1], [0, 0, 1, 1], [], []>} : vector<16x384xf32>, vector<384x32xf32>, vector<16x32xf32> -> vector<16x32xf32>
    %c1040 = arith.constant 1040 : index
    %c0_79 = arith.constant 0 : index
    %348 = vector.load %arg3[%c1040, %c0_79] : memref<2856x128xf32, #tpu.memory_space<vmem>>, vector<1x32xf32>
    %349 = vector.broadcast %348 : vector<1x32xf32> to vector<16x32xf32>
    %350 = arith.addf %347, %349 : vector<16x32xf32>
    %cst_80 = arith.constant 5.000000e-01 : f32
    %351 = vector.broadcast %cst_80 : f32 to vector<16x32xf32>
    %352 = arith.mulf %351, %350 : vector<16x32xf32>
    %353 = arith.addf %292, %352 : vector<16x32xf32>
    %354 = vector.extract_strided_slice %12 {offsets = [4, 0], sizes = [1, 32], strides = [1, 1]} : vector<5x32xf32> to vector<1x32xf32>
    %355 = vector.shape_cast %354 : vector<1x32xf32> to vector<32xf32>
    %356 = vector.extract_strided_slice %13 {offsets = [4, 0], sizes = [1, 32], strides = [1, 1]} : vector<5x32xf32> to vector<1x32xf32>
    %357 = vector.shape_cast %356 : vector<1x32xf32> to vector<32xf32>
    %cst_81 = arith.constant dense<0.000000e+00> : vector<16xf32>
    %358 = vector.multi_reduction <add>, %353, %cst_81 [1] : vector<16x32xf32> to vector<16xf32>
    %359 = vector.shape_cast %358 : vector<16xf32> to vector<16x1xf32>
    %cst_82 = arith.constant 3.200000e+01 : f32
    %360 = vector.broadcast %cst_82 : f32 to vector<16x1xf32>
    %361 = arith.divf %359, %360 : vector<16x1xf32>
    %362 = vector.broadcast %361 : vector<16x1xf32> to vector<16x32xf32>
    %363 = arith.subf %353, %362 : vector<16x32xf32>
    %364 = arith.mulf %363, %363 : vector<16x32xf32>
    %cst_83 = arith.constant dense<0.000000e+00> : vector<16xf32>
    %365 = vector.multi_reduction <add>, %364, %cst_83 [1] : vector<16x32xf32> to vector<16xf32>
    %366 = vector.shape_cast %365 : vector<16xf32> to vector<16x1xf32>
    %cst_84 = arith.constant 3.200000e+01 : f32
    %367 = vector.broadcast %cst_84 : f32 to vector<16x1xf32>
    %368 = arith.divf %366, %367 : vector<16x1xf32>
    %369 = vector.broadcast %361 : vector<16x1xf32> to vector<16x32xf32>
    %370 = arith.subf %353, %369 : vector<16x32xf32>
    %cst_85 = arith.constant 9.99999996E-13 : f32
    %371 = vector.broadcast %cst_85 : f32 to vector<16x1xf32>
    %372 = arith.addf %368, %371 : vector<16x1xf32>
    %373 = math.rsqrt %372 : vector<16x1xf32>
    %374 = vector.broadcast %373 : vector<16x1xf32> to vector<16x32xf32>
    %375 = arith.mulf %370, %374 : vector<16x32xf32>
    %376 = vector.shape_cast %355 : vector<32xf32> to vector<1x32xf32>
    %377 = vector.broadcast %376 : vector<1x32xf32> to vector<16x32xf32>
    %378 = arith.mulf %375, %377 : vector<16x32xf32>
    %379 = vector.shape_cast %357 : vector<32xf32> to vector<1x32xf32>
    %380 = vector.broadcast %379 : vector<1x32xf32> to vector<16x32xf32>
    %381 = arith.addf %378, %380 : vector<16x32xf32>
    %c1328 = arith.constant 1328 : index
    %c0_86 = arith.constant 0 : index
    %382 = vector.load %arg3[%c1328, %c0_86] : memref<2856x128xf32, #tpu.memory_space<vmem>>, vector<5x32xf32>
    %c1336 = arith.constant 1336 : index
    %c0_87 = arith.constant 0 : index
    %383 = vector.load %arg3[%c1336, %c0_87] : memref<2856x128xf32, #tpu.memory_space<vmem>>, vector<5x32xf32>
    %384 = vector.extract_strided_slice %382 {offsets = [0, 0], sizes = [1, 32], strides = [1, 1]} : vector<5x32xf32> to vector<1x32xf32>
    %385 = vector.shape_cast %384 : vector<1x32xf32> to vector<32xf32>
    %386 = vector.extract_strided_slice %383 {offsets = [0, 0], sizes = [1, 32], strides = [1, 1]} : vector<5x32xf32> to vector<1x32xf32>
    %387 = vector.shape_cast %386 : vector<1x32xf32> to vector<32xf32>
    %cst_88 = arith.constant dense<0.000000e+00> : vector<16xf32>
    %388 = vector.multi_reduction <add>, %381, %cst_88 [1] : vector<16x32xf32> to vector<16xf32>
    %389 = vector.shape_cast %388 : vector<16xf32> to vector<16x1xf32>
    %cst_89 = arith.constant 3.200000e+01 : f32
    %390 = vector.broadcast %cst_89 : f32 to vector<16x1xf32>
    %391 = arith.divf %389, %390 : vector<16x1xf32>
    %392 = vector.broadcast %391 : vector<16x1xf32> to vector<16x32xf32>
    %393 = arith.subf %381, %392 : vector<16x32xf32>
    %394 = arith.mulf %393, %393 : vector<16x32xf32>
    %cst_90 = arith.constant dense<0.000000e+00> : vector<16xf32>
    %395 = vector.multi_reduction <add>, %394, %cst_90 [1] : vector<16x32xf32> to vector<16xf32>
    %396 = vector.shape_cast %395 : vector<16xf32> to vector<16x1xf32>
    %cst_91 = arith.constant 3.200000e+01 : f32
    %397 = vector.broadcast %cst_91 : f32 to vector<16x1xf32>
    %398 = arith.divf %396, %397 : vector<16x1xf32>
    %399 = vector.broadcast %391 : vector<16x1xf32> to vector<16x32xf32>
    %400 = arith.subf %381, %399 : vector<16x32xf32>
    %cst_92 = arith.constant 9.99999996E-13 : f32
    %401 = vector.broadcast %cst_92 : f32 to vector<16x1xf32>
    %402 = arith.addf %398, %401 : vector<16x1xf32>
    %403 = math.rsqrt %402 : vector<16x1xf32>
    %404 = vector.broadcast %403 : vector<16x1xf32> to vector<16x32xf32>
    %405 = arith.mulf %400, %404 : vector<16x32xf32>
    %406 = vector.shape_cast %385 : vector<32xf32> to vector<1x32xf32>
    %407 = vector.broadcast %406 : vector<1x32xf32> to vector<16x32xf32>
    %408 = arith.mulf %405, %407 : vector<16x32xf32>
    %409 = vector.shape_cast %387 : vector<32xf32> to vector<1x32xf32>
    %410 = vector.broadcast %409 : vector<1x32xf32> to vector<16x32xf32>
    %411 = arith.addf %408, %410 : vector<16x32xf32>
    %412 = vector.shape_cast %411 : vector<16x32xf32> to vector<2x8x32xf32>
    %cst_93 = arith.constant 0.000000e+00 : f32
    %413 = vector.broadcast %cst_93 : f32 to vector<2x1x32xf32>
    %414 = vector.extract_strided_slice %412 {offsets = [0, 0, 0], sizes = [2, 7, 32], strides = [1, 1, 1]} : vector<2x8x32xf32> to vector<2x7x32xf32>
    %415 = tpu.concatenate %413, %414 in 1 : vector<2x1x32xf32>, vector<2x7x32xf32> -> vector<2x8x32xf32>
    %416 = vector.extract_strided_slice %412 {offsets = [0, 1, 0], sizes = [2, 7, 32], strides = [1, 1, 1]} : vector<2x8x32xf32> to vector<2x7x32xf32>
    %cst_94 = arith.constant 0.000000e+00 : f32
    %417 = vector.broadcast %cst_94 : f32 to vector<2x1x32xf32>
    %418 = tpu.concatenate %416, %417 in 1 : vector<2x7x32xf32>, vector<2x1x32xf32> -> vector<2x8x32xf32>
    %419 = tpu.concatenate %415, %412, %418 in 2 : vector<2x8x32xf32>, vector<2x8x32xf32>, vector<2x8x32xf32> -> vector<2x8x96xf32>
    %420 = vector.shape_cast %419 : vector<2x8x96xf32> to vector<16x96xf32>
    %c1344 = arith.constant 1344 : index
    %c0_95 = arith.constant 0 : index
    %421 = vector.load %arg3[%c1344, %c0_95] : memref<2856x128xf32, #tpu.memory_space<vmem>>, vector<96x128xf32>
    %cst_96 = arith.constant dense<0.000000e+00> : vector<16x128xf32>
    %422 = tpu.matmul %420, %421, %cst_96 {dimension_numbers = #tpu.dot_dimension_numbers<[1], [0], [0], [1], [0, 0, 1, 1], [], []>} : vector<16x96xf32>, vector<96x128xf32>, vector<16x128xf32> -> vector<16x128xf32>
    %c1440 = arith.constant 1440 : index
    %c0_97 = arith.constant 0 : index
    %423 = vector.load %arg3[%c1440, %c0_97] : memref<2856x128xf32, #tpu.memory_space<vmem>>, vector<1x128xf32>
    %424 = vector.broadcast %423 : vector<1x128xf32> to vector<16x128xf32>
    %425 = arith.addf %422, %424 : vector<16x128xf32>
    %cst_98 = arith.constant 0.000000e+00 : f32
    %426 = vector.broadcast %cst_98 : f32 to vector<16x128xf32>
    %427 = arith.maximumf %425, %426 : vector<16x128xf32>
    %428 = vector.shape_cast %427 : vector<16x128xf32> to vector<2x8x128xf32>
    %cst_99 = arith.constant 0.000000e+00 : f32
    %429 = vector.broadcast %cst_99 : f32 to vector<2x1x128xf32>
    %430 = vector.extract_strided_slice %428 {offsets = [0, 0, 0], sizes = [2, 7, 128], strides = [1, 1, 1]} : vector<2x8x128xf32> to vector<2x7x128xf32>
    %431 = tpu.concatenate %429, %430 in 1 : vector<2x1x128xf32>, vector<2x7x128xf32> -> vector<2x8x128xf32>
    %432 = vector.extract_strided_slice %428 {offsets = [0, 1, 0], sizes = [2, 7, 128], strides = [1, 1, 1]} : vector<2x8x128xf32> to vector<2x7x128xf32>
    %cst_100 = arith.constant 0.000000e+00 : f32
    %433 = vector.broadcast %cst_100 : f32 to vector<2x1x128xf32>
    %434 = tpu.concatenate %432, %433 in 1 : vector<2x7x128xf32>, vector<2x1x128xf32> -> vector<2x8x128xf32>
    %435 = tpu.concatenate %431, %428, %434 in 2 : vector<2x8x128xf32>, vector<2x8x128xf32>, vector<2x8x128xf32> -> vector<2x8x384xf32>
    %436 = vector.shape_cast %435 : vector<2x8x384xf32> to vector<16x384xf32>
    %c1448 = arith.constant 1448 : index
    %c0_101 = arith.constant 0 : index
    %437 = vector.load %arg3[%c1448, %c0_101] : memref<2856x128xf32, #tpu.memory_space<vmem>>, vector<384x32xf32>
    %cst_102 = arith.constant dense<0.000000e+00> : vector<16x32xf32>
    %438 = tpu.matmul %436, %437, %cst_102 {dimension_numbers = #tpu.dot_dimension_numbers<[1], [0], [0], [1], [0, 0, 1, 1], [], []>} : vector<16x384xf32>, vector<384x32xf32>, vector<16x32xf32> -> vector<16x32xf32>
    %c1832 = arith.constant 1832 : index
    %c0_103 = arith.constant 0 : index
    %439 = vector.load %arg3[%c1832, %c0_103] : memref<2856x128xf32, #tpu.memory_space<vmem>>, vector<1x32xf32>
    %440 = vector.broadcast %439 : vector<1x32xf32> to vector<16x32xf32>
    %441 = arith.addf %438, %440 : vector<16x32xf32>
    %cst_104 = arith.constant 5.000000e-01 : f32
    %442 = vector.broadcast %cst_104 : f32 to vector<16x32xf32>
    %443 = arith.mulf %442, %441 : vector<16x32xf32>
    %444 = arith.addf %381, %443 : vector<16x32xf32>
    %445 = vector.extract_strided_slice %382 {offsets = [1, 0], sizes = [1, 32], strides = [1, 1]} : vector<5x32xf32> to vector<1x32xf32>
    %446 = vector.shape_cast %445 : vector<1x32xf32> to vector<32xf32>
    %447 = vector.extract_strided_slice %383 {offsets = [1, 0], sizes = [1, 32], strides = [1, 1]} : vector<5x32xf32> to vector<1x32xf32>
    %448 = vector.shape_cast %447 : vector<1x32xf32> to vector<32xf32>
    %cst_105 = arith.constant dense<0.000000e+00> : vector<16xf32>
    %449 = vector.multi_reduction <add>, %444, %cst_105 [1] : vector<16x32xf32> to vector<16xf32>
    %450 = vector.shape_cast %449 : vector<16xf32> to vector<16x1xf32>
    %cst_106 = arith.constant 3.200000e+01 : f32
    %451 = vector.broadcast %cst_106 : f32 to vector<16x1xf32>
    %452 = arith.divf %450, %451 : vector<16x1xf32>
    %453 = vector.broadcast %452 : vector<16x1xf32> to vector<16x32xf32>
    %454 = arith.subf %444, %453 : vector<16x32xf32>
    %455 = arith.mulf %454, %454 : vector<16x32xf32>
    %cst_107 = arith.constant dense<0.000000e+00> : vector<16xf32>
    %456 = vector.multi_reduction <add>, %455, %cst_107 [1] : vector<16x32xf32> to vector<16xf32>
    %457 = vector.shape_cast %456 : vector<16xf32> to vector<16x1xf32>
    %cst_108 = arith.constant 3.200000e+01 : f32
    %458 = vector.broadcast %cst_108 : f32 to vector<16x1xf32>
    %459 = arith.divf %457, %458 : vector<16x1xf32>
    %460 = vector.broadcast %452 : vector<16x1xf32> to vector<16x32xf32>
    %461 = arith.subf %444, %460 : vector<16x32xf32>
    %cst_109 = arith.constant 9.99999996E-13 : f32
    %462 = vector.broadcast %cst_109 : f32 to vector<16x1xf32>
    %463 = arith.addf %459, %462 : vector<16x1xf32>
    %464 = math.rsqrt %463 : vector<16x1xf32>
    %465 = vector.broadcast %464 : vector<16x1xf32> to vector<16x32xf32>
    %466 = arith.mulf %461, %465 : vector<16x32xf32>
    %467 = vector.shape_cast %446 : vector<32xf32> to vector<1x32xf32>
    %468 = vector.broadcast %467 : vector<1x32xf32> to vector<16x32xf32>
    %469 = arith.mulf %466, %468 : vector<16x32xf32>
    %470 = vector.shape_cast %448 : vector<32xf32> to vector<1x32xf32>
    %471 = vector.broadcast %470 : vector<1x32xf32> to vector<16x32xf32>
    %472 = arith.addf %469, %471 : vector<16x32xf32>
    %c2336 = arith.constant 2336 : index
    %c0_110 = arith.constant 0 : index
    %473 = vector.load %arg3[%c2336, %c0_110] : memref<2856x128xf32, #tpu.memory_space<vmem>>, vector<32x96xf32>
    %cst_111 = arith.constant dense<0.000000e+00> : vector<16x96xf32>
    %474 = tpu.matmul %472, %473, %cst_111 {dimension_numbers = #tpu.dot_dimension_numbers<[1], [0], [0], [1], [0, 0, 1, 1], [], []>} : vector<16x32xf32>, vector<32x96xf32>, vector<16x96xf32> -> vector<16x96xf32>
    %c2368 = arith.constant 2368 : index
    %c0_112 = arith.constant 0 : index
    %475 = vector.load %arg3[%c2368, %c0_112] : memref<2856x128xf32, #tpu.memory_space<vmem>>, vector<1x96xf32>
    %476 = vector.broadcast %475 : vector<1x96xf32> to vector<16x96xf32>
    %477 = arith.addf %474, %476 : vector<16x96xf32>
    %478 = vector.extract_strided_slice %477 {offsets = [0, 0], sizes = [16, 32], strides = [1, 1]} : vector<16x96xf32> to vector<16x32xf32>
    %479 = vector.extract_strided_slice %477 {offsets = [0, 32], sizes = [16, 32], strides = [1, 1]} : vector<16x96xf32> to vector<16x32xf32>
    %480 = vector.shape_cast %479 : vector<16x32xf32> to vector<2x8x32xf32>
    %481 = vector.extract_strided_slice %477 {offsets = [0, 64], sizes = [16, 32], strides = [1, 1]} : vector<16x96xf32> to vector<16x32xf32>
    %482 = vector.shape_cast %481 : vector<16x32xf32> to vector<2x8x32xf32>
    %c2416 = arith.constant 2416 : index
    %c0_113 = arith.constant 0 : index
    %483 = vector.load %arg3[%c2416, %c0_113] : memref<2856x128xf32, #tpu.memory_space<vmem>>, vector<1x32xf32>
    %484 = vector.broadcast %483 : vector<1x32xf32> to vector<16x32xf32>
    %485 = arith.addf %478, %484 : vector<16x32xf32>
    %c2376 = arith.constant 2376 : index
    %c0_114 = arith.constant 0 : index
    %486 = vector.load %arg3[%c2376, %c0_114] : memref<2856x128xf32, #tpu.memory_space<vmem>>, vector<32x30xf32>
    %cst_115 = arith.constant dense<0.000000e+00> : vector<16x30xf32>
    %487 = tpu.matmul %485, %486, %cst_115 {dimension_numbers = #tpu.dot_dimension_numbers<[1], [0], [0], [1], [0, 0, 1, 1], [], []>} : vector<16x32xf32>, vector<32x30xf32>, vector<16x30xf32> -> vector<16x30xf32>
    %488 = vector.extract_strided_slice %487 {offsets = [0, 0], sizes = [16, 15], strides = [1, 1]} : vector<16x30xf32> to vector<16x15xf32>
    %489 = vector.shape_cast %488 : vector<16x15xf32> to vector<2x8x15xf32>
    %490 = vector.extract_strided_slice %487 {offsets = [0, 15], sizes = [16, 15], strides = [1, 1]} : vector<16x30xf32> to vector<16x15xf32>
    %491 = vector.shape_cast %490 : vector<16x15xf32> to vector<2x8x15xf32>
    %492 = tpu.concatenate %489, %491 in 0 : vector<2x8x15xf32>, vector<2x8x15xf32> -> vector<4x8x15xf32>
    %493 = vector.extract_strided_slice %492 {offsets = [0, 0, 7], sizes = [4, 1, 8], strides = [1, 1, 1]} : vector<4x8x15xf32> to vector<4x1x8xf32>
    %494 = vector.extract_strided_slice %492 {offsets = [0, 1, 6], sizes = [4, 1, 8], strides = [1, 1, 1]} : vector<4x8x15xf32> to vector<4x1x8xf32>
    %495 = vector.extract_strided_slice %492 {offsets = [0, 2, 5], sizes = [4, 1, 8], strides = [1, 1, 1]} : vector<4x8x15xf32> to vector<4x1x8xf32>
    %496 = vector.extract_strided_slice %492 {offsets = [0, 3, 4], sizes = [4, 1, 8], strides = [1, 1, 1]} : vector<4x8x15xf32> to vector<4x1x8xf32>
    %497 = vector.extract_strided_slice %492 {offsets = [0, 4, 3], sizes = [4, 1, 8], strides = [1, 1, 1]} : vector<4x8x15xf32> to vector<4x1x8xf32>
    %498 = vector.extract_strided_slice %492 {offsets = [0, 5, 2], sizes = [4, 1, 8], strides = [1, 1, 1]} : vector<4x8x15xf32> to vector<4x1x8xf32>
    %499 = vector.extract_strided_slice %492 {offsets = [0, 6, 1], sizes = [4, 1, 8], strides = [1, 1, 1]} : vector<4x8x15xf32> to vector<4x1x8xf32>
    %500 = vector.extract_strided_slice %492 {offsets = [0, 7, 0], sizes = [4, 1, 8], strides = [1, 1, 1]} : vector<4x8x15xf32> to vector<4x1x8xf32>
    %501 = tpu.concatenate %493, %494, %495, %496, %497, %498, %499, %500 in 1 : vector<4x1x8xf32>, vector<4x1x8xf32>, vector<4x1x8xf32>, vector<4x1x8xf32>, vector<4x1x8xf32>, vector<4x1x8xf32>, vector<4x1x8xf32>, vector<4x1x8xf32> -> vector<4x8x8xf32>
    %c2408 = arith.constant 2408 : index
    %c0_116 = arith.constant 0 : index
    %502 = vector.load %arg3[%c2408, %c0_116] : memref<2856x128xf32, #tpu.memory_space<vmem>>, vector<1x32xf32>
    %503 = vector.broadcast %502 : vector<1x32xf32> to vector<16x32xf32>
    %504 = arith.addf %478, %503 : vector<16x32xf32>
    %505 = vector.shape_cast %504 : vector<16x32xf32> to vector<2x8x32xf32>
    %506 = vector.extract_strided_slice %505 {offsets = [0, 0, 0], sizes = [2, 8, 16], strides = [1, 1, 1]} : vector<2x8x32xf32> to vector<2x8x16xf32>
    %507 = vector.extract_strided_slice %505 {offsets = [0, 0, 16], sizes = [2, 8, 16], strides = [1, 1, 1]} : vector<2x8x32xf32> to vector<2x8x16xf32>
    %508 = tpu.concatenate %506, %507 in 0 : vector<2x8x16xf32>, vector<2x8x16xf32> -> vector<4x8x16xf32>
    %509 = vector.extract_strided_slice %480 {offsets = [0, 0, 0], sizes = [2, 8, 16], strides = [1, 1, 1]} : vector<2x8x32xf32> to vector<2x8x16xf32>
    %510 = vector.extract_strided_slice %480 {offsets = [0, 0, 16], sizes = [2, 8, 16], strides = [1, 1, 1]} : vector<2x8x32xf32> to vector<2x8x16xf32>
    %511 = tpu.concatenate %509, %510 in 0 : vector<2x8x16xf32>, vector<2x8x16xf32> -> vector<4x8x16xf32>
    %512 = vector.extract_strided_slice %482 {offsets = [0, 0, 0], sizes = [2, 8, 16], strides = [1, 1, 1]} : vector<2x8x32xf32> to vector<2x8x16xf32>
    %513 = vector.extract_strided_slice %482 {offsets = [0, 0, 16], sizes = [2, 8, 16], strides = [1, 1, 1]} : vector<2x8x32xf32> to vector<2x8x16xf32>
    %514 = tpu.concatenate %512, %513 in 0 : vector<2x8x16xf32>, vector<2x8x16xf32> -> vector<4x8x16xf32>
    "tpu.trace_start"() <{level = 10 : i32, message = "mtd,msd->mts"}> : () -> ()
    %cst_117 = arith.constant dense<0.000000e+00> : vector<4x8x8xf32>
    %515 = tpu.matmul %508, %511, %cst_117 {dimension_numbers = #tpu.dot_dimension_numbers<[2], [2], [1], [1], [0, 0, 0, 1, 1, 1], [0], [0]>} : vector<4x8x16xf32>, vector<4x8x16xf32>, vector<4x8x8xf32> -> vector<4x8x8xf32>
    "tpu.trace_stop"() : () -> ()
    %516 = arith.addf %515, %501 : vector<4x8x8xf32>
    %cst_118 = arith.constant 2.500000e-01 : f32
    %517 = vector.broadcast %cst_118 : f32 to vector<4x8x8xf32>
    %518 = arith.mulf %516, %517 : vector<4x8x8xf32>
    %cst_119 = arith.constant -1.000000e+30 : f32
    %519 = vector.shape_cast %4 : vector<4x1x8xi1> to vector<4x1x8xi1>
    %520 = vector.broadcast %519 : vector<4x1x8xi1> to vector<4x8x8xi1>
    %521 = vector.broadcast %cst_119 : f32 to vector<4x8x8xf32>
    %522 = arith.select %520, %518, %521 : vector<4x8x8xi1>, vector<4x8x8xf32>
    %cst_120 = arith.constant dense<0xFF800000> : vector<4x8xf32>
    %523 = vector.multi_reduction <maximumf>, %522, %cst_120 [2] : vector<4x8x8xf32> to vector<4x8xf32>
    %524 = vector.shape_cast %523 : vector<4x8xf32> to vector<4x8x1xf32>
    %525 = vector.broadcast %524 : vector<4x8x1xf32> to vector<4x8x8xf32>
    %526 = arith.subf %522, %525 : vector<4x8x8xf32>
    %527 = math.exp %526 : vector<4x8x8xf32>
    %cst_121 = arith.constant dense<0.000000e+00> : vector<4x8xf32>
    %528 = vector.multi_reduction <add>, %527, %cst_121 [2] : vector<4x8x8xf32> to vector<4x8xf32>
    %529 = vector.shape_cast %528 : vector<4x8xf32> to vector<4x8x1xf32>
    %530 = vector.broadcast %529 : vector<4x8x1xf32> to vector<4x8x8xf32>
    %531 = arith.divf %527, %530 : vector<4x8x8xf32>
    %cst_122 = arith.constant 0.000000e+00 : f32
    %532 = vector.shape_cast %4 : vector<4x1x8xi1> to vector<4x1x8xi1>
    %533 = vector.broadcast %532 : vector<4x1x8xi1> to vector<4x8x8xi1>
    %534 = vector.broadcast %cst_122 : f32 to vector<4x8x8xf32>
    %535 = arith.select %533, %531, %534 : vector<4x8x8xi1>, vector<4x8x8xf32>
    "tpu.trace_start"() <{level = 10 : i32, message = "mts,msd->mtd"}> : () -> ()
    %cst_123 = arith.constant dense<0.000000e+00> : vector<4x8x16xf32>
    %536 = tpu.matmul %535, %514, %cst_123 {dimension_numbers = #tpu.dot_dimension_numbers<[2], [1], [1], [2], [0, 0, 0, 1, 1, 2], [0], [0]>} : vector<4x8x8xf32>, vector<4x8x16xf32>, vector<4x8x16xf32> -> vector<4x8x16xf32>
    "tpu.trace_stop"() : () -> ()
    %537 = vector.extract_strided_slice %536 {offsets = [0, 0, 0], sizes = [2, 8, 16], strides = [1, 1, 1]} : vector<4x8x16xf32> to vector<2x8x16xf32>
    %538 = vector.extract_strided_slice %536 {offsets = [2, 0, 0], sizes = [2, 8, 16], strides = [1, 1, 1]} : vector<4x8x16xf32> to vector<2x8x16xf32>
    %539 = tpu.concatenate %537, %538 in 2 : vector<2x8x16xf32>, vector<2x8x16xf32> -> vector<2x8x32xf32>
    %540 = vector.shape_cast %539 : vector<2x8x32xf32> to vector<16x32xf32>
    %c2424 = arith.constant 2424 : index
    %c0_124 = arith.constant 0 : index
    %541 = vector.load %arg3[%c2424, %c0_124] : memref<2856x128xf32, #tpu.memory_space<vmem>>, vector<32x32xf32>
    %cst_125 = arith.constant dense<0.000000e+00> : vector<16x32xf32>
    %542 = tpu.matmul %540, %541, %cst_125 {dimension_numbers = #tpu.dot_dimension_numbers<[1], [0], [0], [1], [0, 0, 1, 1], [], []>} : vector<16x32xf32>, vector<32x32xf32>, vector<16x32xf32> -> vector<16x32xf32>
    %543 = arith.addf %444, %542 : vector<16x32xf32>
    %c2456 = arith.constant 2456 : index
    %c0_126 = arith.constant 0 : index
    %544 = vector.load %arg3[%c2456, %c0_126] : memref<2856x128xf32, #tpu.memory_space<vmem>>, vector<1x32xf32>
    %545 = vector.broadcast %544 : vector<1x32xf32> to vector<16x32xf32>
    %546 = arith.addf %543, %545 : vector<16x32xf32>
    %547 = vector.extract_strided_slice %382 {offsets = [2, 0], sizes = [1, 32], strides = [1, 1]} : vector<5x32xf32> to vector<1x32xf32>
    %548 = vector.shape_cast %547 : vector<1x32xf32> to vector<32xf32>
    %549 = vector.extract_strided_slice %383 {offsets = [2, 0], sizes = [1, 32], strides = [1, 1]} : vector<5x32xf32> to vector<1x32xf32>
    %550 = vector.shape_cast %549 : vector<1x32xf32> to vector<32xf32>
    %cst_127 = arith.constant dense<0.000000e+00> : vector<16xf32>
    %551 = vector.multi_reduction <add>, %546, %cst_127 [1] : vector<16x32xf32> to vector<16xf32>
    %552 = vector.shape_cast %551 : vector<16xf32> to vector<16x1xf32>
    %cst_128 = arith.constant 3.200000e+01 : f32
    %553 = vector.broadcast %cst_128 : f32 to vector<16x1xf32>
    %554 = arith.divf %552, %553 : vector<16x1xf32>
    %555 = vector.broadcast %554 : vector<16x1xf32> to vector<16x32xf32>
    %556 = arith.subf %546, %555 : vector<16x32xf32>
    %557 = arith.mulf %556, %556 : vector<16x32xf32>
    %cst_129 = arith.constant dense<0.000000e+00> : vector<16xf32>
    %558 = vector.multi_reduction <add>, %557, %cst_129 [1] : vector<16x32xf32> to vector<16xf32>
    %559 = vector.shape_cast %558 : vector<16xf32> to vector<16x1xf32>
    %cst_130 = arith.constant 3.200000e+01 : f32
    %560 = vector.broadcast %cst_130 : f32 to vector<16x1xf32>
    %561 = arith.divf %559, %560 : vector<16x1xf32>
    %562 = vector.broadcast %554 : vector<16x1xf32> to vector<16x32xf32>
    %563 = arith.subf %546, %562 : vector<16x32xf32>
    %cst_131 = arith.constant 9.99999996E-13 : f32
    %564 = vector.broadcast %cst_131 : f32 to vector<16x1xf32>
    %565 = arith.addf %561, %564 : vector<16x1xf32>
    %566 = math.rsqrt %565 : vector<16x1xf32>
    %567 = vector.broadcast %566 : vector<16x1xf32> to vector<16x32xf32>
    %568 = arith.mulf %563, %567 : vector<16x32xf32>
    %569 = vector.shape_cast %548 : vector<32xf32> to vector<1x32xf32>
    %570 = vector.broadcast %569 : vector<1x32xf32> to vector<16x32xf32>
    %571 = arith.mulf %568, %570 : vector<16x32xf32>
    %572 = vector.shape_cast %550 : vector<32xf32> to vector<1x32xf32>
    %573 = vector.broadcast %572 : vector<1x32xf32> to vector<16x32xf32>
    %574 = arith.addf %571, %573 : vector<16x32xf32>
    %c2464 = arith.constant 2464 : index
    %c0_132 = arith.constant 0 : index
    %575 = vector.load %arg3[%c2464, %c0_132] : memref<2856x128xf32, #tpu.memory_space<vmem>>, vector<32x64xf32>
    %cst_133 = arith.constant dense<0.000000e+00> : vector<16x64xf32>
    %576 = tpu.matmul %574, %575, %cst_133 {dimension_numbers = #tpu.dot_dimension_numbers<[1], [0], [0], [1], [0, 0, 1, 1], [], []>} : vector<16x32xf32>, vector<32x64xf32>, vector<16x64xf32> -> vector<16x64xf32>
    %c2496 = arith.constant 2496 : index
    %c0_134 = arith.constant 0 : index
    %577 = vector.load %arg3[%c2496, %c0_134] : memref<2856x128xf32, #tpu.memory_space<vmem>>, vector<1x64xf32>
    %578 = vector.broadcast %577 : vector<1x64xf32> to vector<16x64xf32>
    %579 = arith.addf %576, %578 : vector<16x64xf32>
    %580 = vector.extract_strided_slice %579 {offsets = [0, 0], sizes = [16, 32], strides = [1, 1]} : vector<16x64xf32> to vector<16x32xf32>
    %581 = vector.extract_strided_slice %579 {offsets = [0, 32], sizes = [16, 32], strides = [1, 1]} : vector<16x64xf32> to vector<16x32xf32>
    %582 = arith.negf %581 : vector<16x32xf32>
    %583 = math.exp %582 : vector<16x32xf32>
    %cst_135 = arith.constant 1.000000e+00 : f32
    %584 = vector.broadcast %cst_135 : f32 to vector<16x32xf32>
    %585 = arith.addf %584, %583 : vector<16x32xf32>
    %586 = arith.divf %584, %585 : vector<16x32xf32>
    %587 = arith.mulf %580, %586 : vector<16x32xf32>
    %588 = vector.shape_cast %587 : vector<16x32xf32> to vector<2x8x32xf32>
    %c2504 = arith.constant 2504 : index
    %c0_136 = arith.constant 0 : index
    %589 = vector.load %arg3[%c2504, %c0_136] : memref<2856x128xf32, #tpu.memory_space<vmem>>, vector<64x32xf32>
    %c2568 = arith.constant 2568 : index
    %c0_137 = arith.constant 0 : index
    %590 = vector.load %arg3[%c2568, %c0_137] : memref<2856x128xf32, #tpu.memory_space<vmem>>, vector<1x32xf32>
    %591 = vector.shape_cast %590 : vector<1x32xf32> to vector<1x1x32xf32>
    %592 = vector.shape_cast %591 : vector<1x1x32xf32> to vector<1x1x32xf32>
    %593 = vector.broadcast %592 : vector<1x1x32xf32> to vector<2x8x32xf32>
    %594 = vector.extract_strided_slice %588 {offsets = [0, 0, 0], sizes = [2, 1, 32], strides = [1, 1, 1]} : vector<2x8x32xf32> to vector<2x1x32xf32>
    %595 = vector.extract_strided_slice %589 {offsets = [0, 0], sizes = [8, 32], strides = [1, 1]} : vector<64x32xf32> to vector<8x32xf32>
    %596 = vector.shape_cast %595 : vector<8x32xf32> to vector<1x8x32xf32>
    %597 = vector.broadcast %594 : vector<2x1x32xf32> to vector<2x8x32xf32>
    %598 = vector.broadcast %596 : vector<1x8x32xf32> to vector<2x8x32xf32>
    %599 = arith.mulf %597, %598 : vector<2x8x32xf32>
    %600 = arith.addf %593, %599 : vector<2x8x32xf32>
    %601 = vector.extract_strided_slice %588 {offsets = [0, 1, 0], sizes = [2, 1, 32], strides = [1, 1, 1]} : vector<2x8x32xf32> to vector<2x1x32xf32>
    %602 = vector.extract_strided_slice %589 {offsets = [8, 0], sizes = [8, 32], strides = [1, 1]} : vector<64x32xf32> to vector<8x32xf32>
    %603 = vector.shape_cast %602 : vector<8x32xf32> to vector<1x8x32xf32>
    %604 = vector.broadcast %601 : vector<2x1x32xf32> to vector<2x8x32xf32>
    %605 = vector.broadcast %603 : vector<1x8x32xf32> to vector<2x8x32xf32>
    %606 = arith.mulf %604, %605 : vector<2x8x32xf32>
    %607 = arith.addf %600, %606 : vector<2x8x32xf32>
    %608 = vector.extract_strided_slice %588 {offsets = [0, 2, 0], sizes = [2, 1, 32], strides = [1, 1, 1]} : vector<2x8x32xf32> to vector<2x1x32xf32>
    %609 = vector.extract_strided_slice %589 {offsets = [16, 0], sizes = [8, 32], strides = [1, 1]} : vector<64x32xf32> to vector<8x32xf32>
    %610 = vector.shape_cast %609 : vector<8x32xf32> to vector<1x8x32xf32>
    %611 = vector.broadcast %608 : vector<2x1x32xf32> to vector<2x8x32xf32>
    %612 = vector.broadcast %610 : vector<1x8x32xf32> to vector<2x8x32xf32>
    %613 = arith.mulf %611, %612 : vector<2x8x32xf32>
    %614 = arith.addf %607, %613 : vector<2x8x32xf32>
    %615 = vector.extract_strided_slice %588 {offsets = [0, 3, 0], sizes = [2, 1, 32], strides = [1, 1, 1]} : vector<2x8x32xf32> to vector<2x1x32xf32>
    %616 = vector.extract_strided_slice %589 {offsets = [24, 0], sizes = [8, 32], strides = [1, 1]} : vector<64x32xf32> to vector<8x32xf32>
    %617 = vector.shape_cast %616 : vector<8x32xf32> to vector<1x8x32xf32>
    %618 = vector.broadcast %615 : vector<2x1x32xf32> to vector<2x8x32xf32>
    %619 = vector.broadcast %617 : vector<1x8x32xf32> to vector<2x8x32xf32>
    %620 = arith.mulf %618, %619 : vector<2x8x32xf32>
    %621 = arith.addf %614, %620 : vector<2x8x32xf32>
    %622 = vector.extract_strided_slice %588 {offsets = [0, 4, 0], sizes = [2, 1, 32], strides = [1, 1, 1]} : vector<2x8x32xf32> to vector<2x1x32xf32>
    %623 = vector.extract_strided_slice %589 {offsets = [32, 0], sizes = [8, 32], strides = [1, 1]} : vector<64x32xf32> to vector<8x32xf32>
    %624 = vector.shape_cast %623 : vector<8x32xf32> to vector<1x8x32xf32>
    %625 = vector.broadcast %622 : vector<2x1x32xf32> to vector<2x8x32xf32>
    %626 = vector.broadcast %624 : vector<1x8x32xf32> to vector<2x8x32xf32>
    %627 = arith.mulf %625, %626 : vector<2x8x32xf32>
    %628 = arith.addf %621, %627 : vector<2x8x32xf32>
    %629 = vector.extract_strided_slice %588 {offsets = [0, 5, 0], sizes = [2, 1, 32], strides = [1, 1, 1]} : vector<2x8x32xf32> to vector<2x1x32xf32>
    %630 = vector.extract_strided_slice %589 {offsets = [40, 0], sizes = [8, 32], strides = [1, 1]} : vector<64x32xf32> to vector<8x32xf32>
    %631 = vector.shape_cast %630 : vector<8x32xf32> to vector<1x8x32xf32>
    %632 = vector.broadcast %629 : vector<2x1x32xf32> to vector<2x8x32xf32>
    %633 = vector.broadcast %631 : vector<1x8x32xf32> to vector<2x8x32xf32>
    %634 = arith.mulf %632, %633 : vector<2x8x32xf32>
    %635 = arith.addf %628, %634 : vector<2x8x32xf32>
    %636 = vector.extract_strided_slice %588 {offsets = [0, 6, 0], sizes = [2, 1, 32], strides = [1, 1, 1]} : vector<2x8x32xf32> to vector<2x1x32xf32>
    %637 = vector.extract_strided_slice %589 {offsets = [48, 0], sizes = [8, 32], strides = [1, 1]} : vector<64x32xf32> to vector<8x32xf32>
    %638 = vector.shape_cast %637 : vector<8x32xf32> to vector<1x8x32xf32>
    %639 = vector.broadcast %636 : vector<2x1x32xf32> to vector<2x8x32xf32>
    %640 = vector.broadcast %638 : vector<1x8x32xf32> to vector<2x8x32xf32>
    %641 = arith.mulf %639, %640 : vector<2x8x32xf32>
    %642 = arith.addf %635, %641 : vector<2x8x32xf32>
    %643 = vector.extract_strided_slice %588 {offsets = [0, 7, 0], sizes = [2, 1, 32], strides = [1, 1, 1]} : vector<2x8x32xf32> to vector<2x1x32xf32>
    %644 = vector.extract_strided_slice %589 {offsets = [56, 0], sizes = [8, 32], strides = [1, 1]} : vector<64x32xf32> to vector<8x32xf32>
    %645 = vector.shape_cast %644 : vector<8x32xf32> to vector<1x8x32xf32>
    %646 = vector.broadcast %643 : vector<2x1x32xf32> to vector<2x8x32xf32>
    %647 = vector.broadcast %645 : vector<1x8x32xf32> to vector<2x8x32xf32>
    %648 = arith.mulf %646, %647 : vector<2x8x32xf32>
    %649 = arith.addf %642, %648 : vector<2x8x32xf32>
    %650 = arith.negf %649 : vector<2x8x32xf32>
    %651 = math.exp %650 : vector<2x8x32xf32>
    %cst_138 = arith.constant 1.000000e+00 : f32
    %652 = vector.broadcast %cst_138 : f32 to vector<2x8x32xf32>
    %653 = arith.addf %652, %651 : vector<2x8x32xf32>
    %654 = arith.divf %652, %653 : vector<2x8x32xf32>
    %655 = arith.mulf %649, %654 : vector<2x8x32xf32>
    %656 = vector.shape_cast %655 : vector<2x8x32xf32> to vector<16x32xf32>
    %c2576 = arith.constant 2576 : index
    %c0_139 = arith.constant 0 : index
    %657 = vector.load %arg3[%c2576, %c0_139] : memref<2856x128xf32, #tpu.memory_space<vmem>>, vector<32x32xf32>
    %cst_140 = arith.constant dense<0.000000e+00> : vector<16x32xf32>
    %658 = tpu.matmul %656, %657, %cst_140 {dimension_numbers = #tpu.dot_dimension_numbers<[1], [0], [0], [1], [0, 0, 1, 1], [], []>} : vector<16x32xf32>, vector<32x32xf32>, vector<16x32xf32> -> vector<16x32xf32>
    %659 = arith.addf %546, %658 : vector<16x32xf32>
    %c2608 = arith.constant 2608 : index
    %c0_141 = arith.constant 0 : index
    %660 = vector.load %arg3[%c2608, %c0_141] : memref<2856x128xf32, #tpu.memory_space<vmem>>, vector<1x32xf32>
    %661 = vector.broadcast %660 : vector<1x32xf32> to vector<16x32xf32>
    %662 = arith.addf %659, %661 : vector<16x32xf32>
    %663 = vector.extract_strided_slice %382 {offsets = [3, 0], sizes = [1, 32], strides = [1, 1]} : vector<5x32xf32> to vector<1x32xf32>
    %664 = vector.shape_cast %663 : vector<1x32xf32> to vector<32xf32>
    %665 = vector.extract_strided_slice %383 {offsets = [3, 0], sizes = [1, 32], strides = [1, 1]} : vector<5x32xf32> to vector<1x32xf32>
    %666 = vector.shape_cast %665 : vector<1x32xf32> to vector<32xf32>
    %cst_142 = arith.constant dense<0.000000e+00> : vector<16xf32>
    %667 = vector.multi_reduction <add>, %662, %cst_142 [1] : vector<16x32xf32> to vector<16xf32>
    %668 = vector.shape_cast %667 : vector<16xf32> to vector<16x1xf32>
    %cst_143 = arith.constant 3.200000e+01 : f32
    %669 = vector.broadcast %cst_143 : f32 to vector<16x1xf32>
    %670 = arith.divf %668, %669 : vector<16x1xf32>
    %671 = vector.broadcast %670 : vector<16x1xf32> to vector<16x32xf32>
    %672 = arith.subf %662, %671 : vector<16x32xf32>
    %673 = arith.mulf %672, %672 : vector<16x32xf32>
    %cst_144 = arith.constant dense<0.000000e+00> : vector<16xf32>
    %674 = vector.multi_reduction <add>, %673, %cst_144 [1] : vector<16x32xf32> to vector<16xf32>
    %675 = vector.shape_cast %674 : vector<16xf32> to vector<16x1xf32>
    %cst_145 = arith.constant 3.200000e+01 : f32
    %676 = vector.broadcast %cst_145 : f32 to vector<16x1xf32>
    %677 = arith.divf %675, %676 : vector<16x1xf32>
    %678 = vector.broadcast %670 : vector<16x1xf32> to vector<16x32xf32>
    %679 = arith.subf %662, %678 : vector<16x32xf32>
    %cst_146 = arith.constant 9.99999996E-13 : f32
    %680 = vector.broadcast %cst_146 : f32 to vector<16x1xf32>
    %681 = arith.addf %677, %680 : vector<16x1xf32>
    %682 = math.rsqrt %681 : vector<16x1xf32>
    %683 = vector.broadcast %682 : vector<16x1xf32> to vector<16x32xf32>
    %684 = arith.mulf %679, %683 : vector<16x32xf32>
    %685 = vector.shape_cast %664 : vector<32xf32> to vector<1x32xf32>
    %686 = vector.broadcast %685 : vector<1x32xf32> to vector<16x32xf32>
    %687 = arith.mulf %684, %686 : vector<16x32xf32>
    %688 = vector.shape_cast %666 : vector<32xf32> to vector<1x32xf32>
    %689 = vector.broadcast %688 : vector<1x32xf32> to vector<16x32xf32>
    %690 = arith.addf %687, %689 : vector<16x32xf32>
    %691 = vector.shape_cast %690 : vector<16x32xf32> to vector<2x8x32xf32>
    %cst_147 = arith.constant 0.000000e+00 : f32
    %692 = vector.broadcast %cst_147 : f32 to vector<2x1x32xf32>
    %693 = vector.extract_strided_slice %691 {offsets = [0, 0, 0], sizes = [2, 7, 32], strides = [1, 1, 1]} : vector<2x8x32xf32> to vector<2x7x32xf32>
    %694 = tpu.concatenate %692, %693 in 1 : vector<2x1x32xf32>, vector<2x7x32xf32> -> vector<2x8x32xf32>
    %695 = vector.extract_strided_slice %691 {offsets = [0, 1, 0], sizes = [2, 7, 32], strides = [1, 1, 1]} : vector<2x8x32xf32> to vector<2x7x32xf32>
    %cst_148 = arith.constant 0.000000e+00 : f32
    %696 = vector.broadcast %cst_148 : f32 to vector<2x1x32xf32>
    %697 = tpu.concatenate %695, %696 in 1 : vector<2x7x32xf32>, vector<2x1x32xf32> -> vector<2x8x32xf32>
    %698 = tpu.concatenate %694, %691, %697 in 2 : vector<2x8x32xf32>, vector<2x8x32xf32>, vector<2x8x32xf32> -> vector<2x8x96xf32>
    %699 = vector.shape_cast %698 : vector<2x8x96xf32> to vector<16x96xf32>
    %c1840 = arith.constant 1840 : index
    %c0_149 = arith.constant 0 : index
    %700 = vector.load %arg3[%c1840, %c0_149] : memref<2856x128xf32, #tpu.memory_space<vmem>>, vector<96x128xf32>
    %cst_150 = arith.constant dense<0.000000e+00> : vector<16x128xf32>
    %701 = tpu.matmul %699, %700, %cst_150 {dimension_numbers = #tpu.dot_dimension_numbers<[1], [0], [0], [1], [0, 0, 1, 1], [], []>} : vector<16x96xf32>, vector<96x128xf32>, vector<16x128xf32> -> vector<16x128xf32>
    %c1936 = arith.constant 1936 : index
    %c0_151 = arith.constant 0 : index
    %702 = vector.load %arg3[%c1936, %c0_151] : memref<2856x128xf32, #tpu.memory_space<vmem>>, vector<1x128xf32>
    %703 = vector.broadcast %702 : vector<1x128xf32> to vector<16x128xf32>
    %704 = arith.addf %701, %703 : vector<16x128xf32>
    %cst_152 = arith.constant 0.000000e+00 : f32
    %705 = vector.broadcast %cst_152 : f32 to vector<16x128xf32>
    %706 = arith.maximumf %704, %705 : vector<16x128xf32>
    %707 = vector.shape_cast %706 : vector<16x128xf32> to vector<2x8x128xf32>
    %cst_153 = arith.constant 0.000000e+00 : f32
    %708 = vector.broadcast %cst_153 : f32 to vector<2x1x128xf32>
    %709 = vector.extract_strided_slice %707 {offsets = [0, 0, 0], sizes = [2, 7, 128], strides = [1, 1, 1]} : vector<2x8x128xf32> to vector<2x7x128xf32>
    %710 = tpu.concatenate %708, %709 in 1 : vector<2x1x128xf32>, vector<2x7x128xf32> -> vector<2x8x128xf32>
    %711 = vector.extract_strided_slice %707 {offsets = [0, 1, 0], sizes = [2, 7, 128], strides = [1, 1, 1]} : vector<2x8x128xf32> to vector<2x7x128xf32>
    %cst_154 = arith.constant 0.000000e+00 : f32
    %712 = vector.broadcast %cst_154 : f32 to vector<2x1x128xf32>
    %713 = tpu.concatenate %711, %712 in 1 : vector<2x7x128xf32>, vector<2x1x128xf32> -> vector<2x8x128xf32>
    %714 = tpu.concatenate %710, %707, %713 in 2 : vector<2x8x128xf32>, vector<2x8x128xf32>, vector<2x8x128xf32> -> vector<2x8x384xf32>
    %715 = vector.shape_cast %714 : vector<2x8x384xf32> to vector<16x384xf32>
    %c1944 = arith.constant 1944 : index
    %c0_155 = arith.constant 0 : index
    %716 = vector.load %arg3[%c1944, %c0_155] : memref<2856x128xf32, #tpu.memory_space<vmem>>, vector<384x32xf32>
    %cst_156 = arith.constant dense<0.000000e+00> : vector<16x32xf32>
    %717 = tpu.matmul %715, %716, %cst_156 {dimension_numbers = #tpu.dot_dimension_numbers<[1], [0], [0], [1], [0, 0, 1, 1], [], []>} : vector<16x384xf32>, vector<384x32xf32>, vector<16x32xf32> -> vector<16x32xf32>
    %c2328 = arith.constant 2328 : index
    %c0_157 = arith.constant 0 : index
    %718 = vector.load %arg3[%c2328, %c0_157] : memref<2856x128xf32, #tpu.memory_space<vmem>>, vector<1x32xf32>
    %719 = vector.broadcast %718 : vector<1x32xf32> to vector<16x32xf32>
    %720 = arith.addf %717, %719 : vector<16x32xf32>
    %cst_158 = arith.constant 5.000000e-01 : f32
    %721 = vector.broadcast %cst_158 : f32 to vector<16x32xf32>
    %722 = arith.mulf %721, %720 : vector<16x32xf32>
    %723 = arith.addf %662, %722 : vector<16x32xf32>
    %724 = vector.extract_strided_slice %382 {offsets = [4, 0], sizes = [1, 32], strides = [1, 1]} : vector<5x32xf32> to vector<1x32xf32>
    %725 = vector.shape_cast %724 : vector<1x32xf32> to vector<32xf32>
    %726 = vector.extract_strided_slice %383 {offsets = [4, 0], sizes = [1, 32], strides = [1, 1]} : vector<5x32xf32> to vector<1x32xf32>
    %727 = vector.shape_cast %726 : vector<1x32xf32> to vector<32xf32>
    %cst_159 = arith.constant dense<0.000000e+00> : vector<16xf32>
    %728 = vector.multi_reduction <add>, %723, %cst_159 [1] : vector<16x32xf32> to vector<16xf32>
    %729 = vector.shape_cast %728 : vector<16xf32> to vector<16x1xf32>
    %cst_160 = arith.constant 3.200000e+01 : f32
    %730 = vector.broadcast %cst_160 : f32 to vector<16x1xf32>
    %731 = arith.divf %729, %730 : vector<16x1xf32>
    %732 = vector.broadcast %731 : vector<16x1xf32> to vector<16x32xf32>
    %733 = arith.subf %723, %732 : vector<16x32xf32>
    %734 = arith.mulf %733, %733 : vector<16x32xf32>
    %cst_161 = arith.constant dense<0.000000e+00> : vector<16xf32>
    %735 = vector.multi_reduction <add>, %734, %cst_161 [1] : vector<16x32xf32> to vector<16xf32>
    %736 = vector.shape_cast %735 : vector<16xf32> to vector<16x1xf32>
    %cst_162 = arith.constant 3.200000e+01 : f32
    %737 = vector.broadcast %cst_162 : f32 to vector<16x1xf32>
    %738 = arith.divf %736, %737 : vector<16x1xf32>
    %739 = vector.broadcast %731 : vector<16x1xf32> to vector<16x32xf32>
    %740 = arith.subf %723, %739 : vector<16x32xf32>
    %cst_163 = arith.constant 9.99999996E-13 : f32
    %741 = vector.broadcast %cst_163 : f32 to vector<16x1xf32>
    %742 = arith.addf %738, %741 : vector<16x1xf32>
    %743 = math.rsqrt %742 : vector<16x1xf32>
    %744 = vector.broadcast %743 : vector<16x1xf32> to vector<16x32xf32>
    %745 = arith.mulf %740, %744 : vector<16x32xf32>
    %746 = vector.shape_cast %725 : vector<32xf32> to vector<1x32xf32>
    %747 = vector.broadcast %746 : vector<1x32xf32> to vector<16x32xf32>
    %748 = arith.mulf %745, %747 : vector<16x32xf32>
    %749 = vector.shape_cast %727 : vector<32xf32> to vector<1x32xf32>
    %750 = vector.broadcast %749 : vector<1x32xf32> to vector<16x32xf32>
    %751 = arith.addf %748, %750 : vector<16x32xf32>
    %c2616 = arith.constant 2616 : index
    %c0_164 = arith.constant 0 : index
    %752 = vector.load %arg3[%c2616, %c0_164] : memref<2856x128xf32, #tpu.memory_space<vmem>>, vector<1x32xf32>
    %c2624 = arith.constant 2624 : index
    %c0_165 = arith.constant 0 : index
    %753 = vector.load %arg3[%c2624, %c0_165] : memref<2856x128xf32, #tpu.memory_space<vmem>>, vector<1x32xf32>
    %cst_166 = arith.constant dense<0.000000e+00> : vector<16xf32>
    %754 = vector.multi_reduction <add>, %751, %cst_166 [1] : vector<16x32xf32> to vector<16xf32>
    %755 = vector.shape_cast %754 : vector<16xf32> to vector<16x1xf32>
    %cst_167 = arith.constant 3.200000e+01 : f32
    %756 = vector.broadcast %cst_167 : f32 to vector<16x1xf32>
    %757 = arith.divf %755, %756 : vector<16x1xf32>
    %758 = vector.broadcast %757 : vector<16x1xf32> to vector<16x32xf32>
    %759 = arith.subf %751, %758 : vector<16x32xf32>
    %760 = arith.mulf %759, %759 : vector<16x32xf32>
    %cst_168 = arith.constant dense<0.000000e+00> : vector<16xf32>
    %761 = vector.multi_reduction <add>, %760, %cst_168 [1] : vector<16x32xf32> to vector<16xf32>
    %762 = vector.shape_cast %761 : vector<16xf32> to vector<16x1xf32>
    %cst_169 = arith.constant 3.200000e+01 : f32
    %763 = vector.broadcast %cst_169 : f32 to vector<16x1xf32>
    %764 = arith.divf %762, %763 : vector<16x1xf32>
    %765 = vector.broadcast %757 : vector<16x1xf32> to vector<16x32xf32>
    %766 = arith.subf %751, %765 : vector<16x32xf32>
    %cst_170 = arith.constant 9.99999996E-13 : f32
    %767 = vector.broadcast %cst_170 : f32 to vector<16x1xf32>
    %768 = arith.addf %764, %767 : vector<16x1xf32>
    %769 = math.rsqrt %768 : vector<16x1xf32>
    %770 = vector.broadcast %769 : vector<16x1xf32> to vector<16x32xf32>
    %771 = arith.mulf %766, %770 : vector<16x32xf32>
    %772 = vector.broadcast %752 : vector<1x32xf32> to vector<16x32xf32>
    %773 = arith.mulf %771, %772 : vector<16x32xf32>
    %774 = vector.broadcast %753 : vector<1x32xf32> to vector<16x32xf32>
    %775 = arith.addf %773, %774 : vector<16x32xf32>
    %c2632 = arith.constant 2632 : index
    %c0_171 = arith.constant 0 : index
    %776 = vector.load %arg3[%c2632, %c0_171] : memref<2856x128xf32, #tpu.memory_space<vmem>>, vector<32x1xf32>
    %cst_172 = arith.constant dense<0.000000e+00> : vector<16x1xf32>
    %777 = tpu.matmul %775, %776, %cst_172 {dimension_numbers = #tpu.dot_dimension_numbers<[1], [0], [0], [1], [0, 0, 1, 1], [], []>} : vector<16x32xf32>, vector<32x1xf32>, vector<16x1xf32> -> vector<16x1xf32>
    %c2664 = arith.constant 2664 : index
    %c0_173 = arith.constant 0 : index
    %778 = vector.load %arg3[%c2664, %c0_173] : memref<2856x128xf32, #tpu.memory_space<vmem>>, vector<1x1xf32>
    %779 = vector.broadcast %778 : vector<1x1xf32> to vector<16x1xf32>
    %780 = arith.addf %777, %779 : vector<16x1xf32>
    %781 = vector.shape_cast %780 : vector<16x1xf32> to vector<2x8x1xf32>
    %cst_174 = arith.constant 0.000000e+00 : f32
    %782 = vector.broadcast %cst_174 : f32 to vector<2x2x1xf32>
    %783 = vector.extract_strided_slice %781 {offsets = [0, 0, 0], sizes = [2, 6, 1], strides = [1, 1, 1]} : vector<2x8x1xf32> to vector<2x6x1xf32>
    %784 = tpu.concatenate %782, %783 in 1 : vector<2x2x1xf32>, vector<2x6x1xf32> -> vector<2x8x1xf32>
    %cst_175 = arith.constant 0.000000e+00 : f32
    %785 = vector.broadcast %cst_175 : f32 to vector<2x1x1xf32>
    %786 = vector.extract_strided_slice %781 {offsets = [0, 0, 0], sizes = [2, 7, 1], strides = [1, 1, 1]} : vector<2x8x1xf32> to vector<2x7x1xf32>
    %787 = tpu.concatenate %785, %786 in 1 : vector<2x1x1xf32>, vector<2x7x1xf32> -> vector<2x8x1xf32>
    %788 = vector.extract_strided_slice %781 {offsets = [0, 1, 0], sizes = [2, 7, 1], strides = [1, 1, 1]} : vector<2x8x1xf32> to vector<2x7x1xf32>
    %cst_176 = arith.constant 0.000000e+00 : f32
    %789 = vector.broadcast %cst_176 : f32 to vector<2x1x1xf32>
    %790 = tpu.concatenate %788, %789 in 1 : vector<2x7x1xf32>, vector<2x1x1xf32> -> vector<2x8x1xf32>
    %791 = vector.extract_strided_slice %781 {offsets = [0, 2, 0], sizes = [2, 6, 1], strides = [1, 1, 1]} : vector<2x8x1xf32> to vector<2x6x1xf32>
    %cst_177 = arith.constant 0.000000e+00 : f32
    %792 = vector.broadcast %cst_177 : f32 to vector<2x2x1xf32>
    %793 = tpu.concatenate %791, %792 in 1 : vector<2x6x1xf32>, vector<2x2x1xf32> -> vector<2x8x1xf32>
    %794 = tpu.concatenate %784, %787, %781, %790, %793 in 2 : vector<2x8x1xf32>, vector<2x8x1xf32>, vector<2x8x1xf32>, vector<2x8x1xf32>, vector<2x8x1xf32> -> vector<2x8x5xf32>
    %795 = vector.shape_cast %794 : vector<2x8x5xf32> to vector<16x5xf32>
    %c2672 = arith.constant 2672 : index
    %c0_178 = arith.constant 0 : index
    %796 = vector.load %arg3[%c2672, %c0_178] : memref<2856x128xf32, #tpu.memory_space<vmem>>, vector<5x32xf32>
    %cst_179 = arith.constant dense<0.000000e+00> : vector<16x32xf32>
    %797 = tpu.matmul %795, %796, %cst_179 {dimension_numbers = #tpu.dot_dimension_numbers<[1], [0], [0], [1], [0, 0, 1, 1], [], []>} : vector<16x5xf32>, vector<5x32xf32>, vector<16x32xf32> -> vector<16x32xf32>
    %c2680 = arith.constant 2680 : index
    %c0_180 = arith.constant 0 : index
    %798 = vector.load %arg3[%c2680, %c0_180] : memref<2856x128xf32, #tpu.memory_space<vmem>>, vector<1x32xf32>
    %799 = vector.broadcast %798 : vector<1x32xf32> to vector<16x32xf32>
    %800 = arith.addf %797, %799 : vector<16x32xf32>
    %801 = math.tanh %800 : vector<16x32xf32>
    %802 = vector.shape_cast %801 : vector<16x32xf32> to vector<2x8x32xf32>
    %cst_181 = arith.constant 0.000000e+00 : f32
    %803 = vector.broadcast %cst_181 : f32 to vector<2x2x32xf32>
    %804 = vector.extract_strided_slice %802 {offsets = [0, 0, 0], sizes = [2, 6, 32], strides = [1, 1, 1]} : vector<2x8x32xf32> to vector<2x6x32xf32>
    %805 = tpu.concatenate %803, %804 in 1 : vector<2x2x32xf32>, vector<2x6x32xf32> -> vector<2x8x32xf32>
    %cst_182 = arith.constant 0.000000e+00 : f32
    %806 = vector.broadcast %cst_182 : f32 to vector<2x1x32xf32>
    %807 = vector.extract_strided_slice %802 {offsets = [0, 0, 0], sizes = [2, 7, 32], strides = [1, 1, 1]} : vector<2x8x32xf32> to vector<2x7x32xf32>
    %808 = tpu.concatenate %806, %807 in 1 : vector<2x1x32xf32>, vector<2x7x32xf32> -> vector<2x8x32xf32>
    %809 = vector.extract_strided_slice %802 {offsets = [0, 1, 0], sizes = [2, 7, 32], strides = [1, 1, 1]} : vector<2x8x32xf32> to vector<2x7x32xf32>
    %cst_183 = arith.constant 0.000000e+00 : f32
    %810 = vector.broadcast %cst_183 : f32 to vector<2x1x32xf32>
    %811 = tpu.concatenate %809, %810 in 1 : vector<2x7x32xf32>, vector<2x1x32xf32> -> vector<2x8x32xf32>
    %812 = vector.extract_strided_slice %802 {offsets = [0, 2, 0], sizes = [2, 6, 32], strides = [1, 1, 1]} : vector<2x8x32xf32> to vector<2x6x32xf32>
    %cst_184 = arith.constant 0.000000e+00 : f32
    %813 = vector.broadcast %cst_184 : f32 to vector<2x2x32xf32>
    %814 = tpu.concatenate %812, %813 in 1 : vector<2x6x32xf32>, vector<2x2x32xf32> -> vector<2x8x32xf32>
    %815 = tpu.concatenate %805, %808, %802, %811, %814 in 2 : vector<2x8x32xf32>, vector<2x8x32xf32>, vector<2x8x32xf32>, vector<2x8x32xf32>, vector<2x8x32xf32> -> vector<2x8x160xf32>
    %816 = vector.shape_cast %815 : vector<2x8x160xf32> to vector<16x160xf32>
    %c2688 = arith.constant 2688 : index
    %c0_185 = arith.constant 0 : index
    %817 = vector.load %arg3[%c2688, %c0_185] : memref<2856x128xf32, #tpu.memory_space<vmem>>, vector<160x1xf32>
    %cst_186 = arith.constant dense<0.000000e+00> : vector<16x1xf32>
    %818 = tpu.matmul %816, %817, %cst_186 {dimension_numbers = #tpu.dot_dimension_numbers<[1], [0], [0], [1], [0, 0, 1, 1], [], []>} : vector<16x160xf32>, vector<160x1xf32>, vector<16x1xf32> -> vector<16x1xf32>
    %c2848 = arith.constant 2848 : index
    %c0_187 = arith.constant 0 : index
    %819 = vector.load %arg3[%c2848, %c0_187] : memref<2856x128xf32, #tpu.memory_space<vmem>>, vector<1x1xf32>
    %820 = vector.broadcast %819 : vector<1x1xf32> to vector<16x1xf32>
    %821 = arith.addf %818, %820 : vector<16x1xf32>
    %822 = arith.addf %780, %821 : vector<16x1xf32>
    %823 = tpu.concatenate %780, %822 in 1 : vector<16x1xf32>, vector<16x1xf32> -> vector<16x2xf32>
    %824 = vector.shape_cast %823 : vector<16x2xf32> to vector<2x8x2xf32>
    %c0_188 = arith.constant 0 : index
    %c0_189 = arith.constant 0 : index
    %c0_190 = arith.constant 0 : index
    %825 = vector.load %arg4[%c0_188, %c0_189, %c0_190] : memref<2x8x2xf32, #tpu.memory_space<vmem>>, vector<2x8x2xf32>
    tpu.vector_store %arg4[%c0_188, %c0_189, %c0_190], %824 {strides = array<i32>} : memref<2x8x2xf32, #tpu.memory_space<vmem>>, vector<2x8x2xf32>,
    return
  }
  func.func @transform_0(%arg0: i32) -> (i32, i32, i32) {
    %c0_i32 = arith.constant 0 : i32
    %c0_i32_0 = arith.constant 0 : i32
    %c0_i32_1 = arith.constant 0 : i32
    %c0_i32_2 = arith.constant 0 : i32
    return %c0_i32, %c0_i32_0, %c0_i32_1 : i32, i32, i32
  }
  func.func @transform_1(%arg0: i32) -> (i32, i32) {
    %c0_i32 = arith.constant 0 : i32
    %c0_i32_0 = arith.constant 0 : i32
    %c0_i32_1 = arith.constant 0 : i32
    return %c0_i32, %c0_i32_0 : i32, i32
  }
  func.func @transform_2(%arg0: i32) -> (i32, i32) {
    %c0_i32 = arith.constant 0 : i32
    %c0_i32_0 = arith.constant 0 : i32
    %c0_i32_1 = arith.constant 0 : i32
    return %c0_i32, %c0_i32_0 : i32, i32
  }
  func.func @transform_3(%arg0: i32) -> (i32, i32, i32) {
    %c0_i32 = arith.constant 0 : i32
    %c0_i32_0 = arith.constant 0 : i32
    %c0_i32_1 = arith.constant 0 : i32
    %c0_i32_2 = arith.constant 0 : i32
    return %c0_i32, %c0_i32_0, %c0_i32_1 : i32, i32, i32
  }
}

</mosaic_0001>

<bundles_post_ra>
// kernel: predictor_forward.1
= control target key start
LH: loop header
LB: loop body
LE: loop exit
PB: predicated region body
PF: predicated region fallthrough
CT: control target
= control target key end

     0   :  { %8 = vsyncpa [#allocation3], 0  ;;  %s6929_s12 = smov [#allocation2]   ;;  %s7870_s0 = inlined_call_operand.vmem [shape: f32[2,8,28], index: 0, kind: input, shape index: {}]   ;;  %s7871_s1 = inlined_call_operand.vmem [shape: f32[2,8], index: 1, kind: input, shape index: {}]   ;;  %s7872_s2 = inlined_call_operand.hbm [shape: f32[2856,128], index: 2, kind: input, shape index: {}]   ;;  %s7873_s3 = inlined_call_operand.vmem [shape: f32[2,8,2], index: 3, kind: output, shape index: {}]  }
   0x1   :  { %s18_s13 = sshll.u32 %s6929_s12, 4  ;;  %s6905_s16 = scalar_lea.hbm %s7872_s2, 45696  ;;  %s19_s13 = int_to_ptr.vmem [resolvable:$true] %s18_s13 }
   0x2   :  { %p6906_p0 = scmp.ne.s32.totalorder %s7872_s2, %s6905_s16  ;;  %p6909_p1 = scmp.lt.u32.totalorder %s6905_s16, %s7872_s2 }
   0x4   :  { %p6911_p2 = pnand %p6909_p1, %p6906_p0 }
   0x6   :  { %6914 = shalt.err (!%p6911_p2)
}
   0x7   :  { %s6915_s21 = scalar_lea.vmem %s19_s13, 45696  ;;  %p6920_p4 = scmp.lt.s32.totalorder %s19_s13, %s19_s13 }
   0x8   :  { %p6916_p3 = scmp.ne.s32.totalorder %s19_s13, %s6915_s21  ;;  %p6921_p5 = scmp.lt.s32.totalorder %s6915_s21, %s6915_s21 }
   0xa   :  { %p6922_p6 = por %p6921_p5, %p6920_p4 }
   0xc   :  { %p6923_p7 = pnand %p6922_p6, %p6916_p3 }
   0xe   :  { %6926 = shalt.err (!%p6923_p7)
}
   0xf   :  { %s6930_s22 = smov 128   ;;  %s6931_s23 = smov 8  }
  0x10   :  { %24 = dma.hbm_to_vmem [thread:$0]  %s7872_s2, 45696, %s19_s13, [#allocation3], %s6930_s22, %s6930_s22, %s6931_s23  }
  0x11   :  { %6927 = dma.done.wait [#allocation3], 45696  }
  0x12   :  { %6928 = vsyncadd [#allocation3], 4294921600  ;;  %vm74_vm0 = vcmask 1043456   ;;  %vm67_vm1 = vcmask 228352   ;;  %v58_v0 = vld [vmem:[#allocation2] sm:$0xff]  ;;  %v59_v1 = vld [vmem:[#allocation2 + $0x8] sm:$0xff]  ;;  %v41_v36 = vlaneseq }
  0x13   :  { %v60_v2 = vld [vmem:[#allocation2 + $0x10] sm:$0xff]  ;;  %v6286_v3 = vpack.c.bf16 %v59_v1, %v58_v0  ;;  %v61_v4 = vld [vmem:[#allocation2 + $0x18] sm:$0xf]  ;;  %v56_v5 = vld [vmem:[%s7870_s0] sm:$0xff]  ;;  %vm6932_vm2 = vmmov 1   ;;  %vm155_vm4 = vcmask 261120  }
  0x14   :  { %v6290_v6 = vpack.c.bf16 %v61_v4, %v60_v2  ;;  %vm6291_vm3 = vmpackc.low %vm74_vm0, %vm6932_vm2  ;;  %5829 = vmatprep.mubr.msk.f32.mxu0 %vm67_vm1, %v56_v5  ;;  %v57_v7 = vld [vmem:[%s7870_s0 + $0x8] sm:$0xff]  ;;  %v5312_v8 = vld [vmem:[#allocation2 + $0x20] ss:$0 sm:$0xff]  ;;  %v7005_v40 = vshrl.u32 %v41_v36, 7  ;;  %s6933_s0 = smov 32   ;;  %vm208_vm5 = vcmask 1046528  }
  0x15   :  { %6287 = vmatprep.subr.bf16.mxu0 %v6286_v3  ;;  %v230_v25 = vld [vmem:[#allocation2 + $0x38] sm:$0xff]  ;;  %v231_v26 = vld [vmem:[#allocation2 + $0x40] sm:$0xff]  ;;  %v232_v27 = vld [vmem:[#allocation2 + $0x48] sm:$0xff]  ;;  %s6934_s29 = smov 64   ;;  %vm201_vm6 = vcmask 1040384   ;;  %vm227_vm7 = vcmask 523264  }
  0x16   :  { %6289 = vmatpush3.bf16.msra.mxu0 %v6286_v3  ;;  %v6296_v28 = vpack.c.bf16 %v231_v26, %v230_v25  ;;  %v233_v29 = vld [vmem:[#allocation2 + $0x50] sm:$0xff]  ;;  %v234_v31 = vld [vmem:[#allocation2 + $0x58] sm:$0xff]  ;;  %v235_v32 = vld [vmem:[#allocation2 + $0x60] sm:$0xff]  ;;  %v7008_v45 = vsub.s32 0, %v7005_v40  ;;  %vm7875_vm8 = vcmask 785408   ;;  %vm6936_vm10 = vmmov 0  }
  0x17   :  { %6292 = vmatprep.subr.msk.bf16.mxu0 %vm6291_vm3, %v6290_v6  ;;  %v6300_v30 = vpack.c.bf16 %v233_v29, %v232_v27  ;;  %v6304_v33 = vpack.c.bf16 %v235_v32, %v234_v31  ;;  %v236_v42 = vld [vmem:[#allocation2 + $0x68] sm:$0xff]  ;;  %v237_v43 = vld [vmem:[#allocation2 + $0x70] sm:$0xff]  ;;  %v238_v47 = vld [vmem:[#allocation2 + $0x78] sm:$0xff]  ;;  %s6937_s30 = smov 112   ;;  %s6938_s4 = smov 96   ;;  %vm921_vm11 = vcmask 130048  }
  0x18   :  { %6297 = vmatprep.subr.bf16.mxu1 %v6296_v28  ;;  %v6308_v44 = vpack.c.bf16 %v237_v43, %v236_v42  ;;  %v7010_v46 = vld [vmem:[#allocation2 + $0x28] sm:$0x1f]  ;;  %v239_v48 = vld [vmem:[#allocation2 + $0x80] sm:$0xff]  ;;  %v7012_v50 = vld [vmem:[#allocation2 + $0x30] sm:$0x1f]  ;;  %s6939_s5 = smov 113  }
  0x19   :  { %6299 = vmatpush3.bf16.msra.mxu1 %v6296_v28  ;;  %v6312_v49 = vpack.c.bf16 %v239_v48, %v238_v47  ;;  %v186_v51 = vrot.slane %v7010_v46, %v7008_v45  ;;  %v240_v53 = vld [vmem:[#allocation2 + $0x88] sm:$0xff]  ;;  %v241_v54 = vld [vmem:[#allocation2 + $0x90] sm:$0xff]  ;;  %v192_v56 = vrot.slane %v7012_v50, %v7008_v45  ;;  %v361_v63 = vld [vmem:[#allocation2 + $0x120] sm:$0xff]  ;;  %s6940_s6 = smov 1   ;;  %s6941_s7 = smov 4   ;;  %vm868_vm12 = vcmask 1041408  }
  0x1a   :  { %6295 = vmatpush3.bf16.msk.msra.mxu0 %vm6291_vm3, %v6290_v6  ;;  %6301 = vmatprep.subr.bf16.mxu1 %v6300_v30  ;;  %v6316_v57 = vpack.c.bf16 %v241_v54, %v240_v53  ;;  %v362_v0 = vld [vmem:[#allocation2 + $0x128] sm:$0xff]  ;;  %v345_v1 = vld [vmem:[#allocation2 + $0xa0] sm:$0xff]  ;;  %v367_v26 = vld [vmem:[#allocation2 + $0x150] sm:$0xff]  ;;  %s6942_s8 = smov 2   ;;  %s6943_s9 = smov 5   ;;  %vm873_vm13 = vcmask 1042432  }
  0x1b   :  { %v6320_v2 = vpack.c.bf16 %v362_v0, %v361_v63  ;;  %v346_v3 = vld [vmem:[#allocation2 + $0xa8] sm:$0xff]  ;;  %v377_v4 = vld [vmem:[#allocation2 + $0x1a0] sm:$0xff]  ;;  %v368_v27 = vld [vmem:[#allocation2 + $0x158] sm:$0xff]  ;;  %s6944_s10 = smov 3   ;;  %s6945_s11 = smov 6   ;;  %vm882_vm14 = vcmask 1044480  }
  0x1c   :  { %v378_v5 = vld [vmem:[#allocation2 + $0x1a8] sm:$0xff]  ;;  %v351_v28 = vld [vmem:[#allocation2 + $0xd0] sm:$0xff]  ;;  %v6332_v29 = vpack.c.bf16 %v368_v27, %v367_v26  ;;  %v381_v0 = vld [vmem:[#allocation2 + $0x1c0] sm:$0xff]  ;;  %s6946_s12 = smov 7   ;;  %vm7874_vm15 = vcmask 1045504   ;;  %s6947_s13 = smov 121  }
  0x1d   :  { %5830 = vmatmul.mubr.msk.f32.vlgmr.msra.gmra.mrb[0].mxu0 %vm67_vm1, %v57_v7  ;;  %6303 = vmatpush3.bf16.msra.mxu1 %v6300_v30  ;;  %v6322_v7 = vpack.c.bf16 %v346_v3, %v345_v1  ;;  %v352_v30 = vld [vmem:[#allocation2 + $0xd8] sm:$0xff]  ;;  %v355_v42 = vld [vmem:[#allocation2 + $0xf0] sm:$0xff]  ;;  %v382_v1 = vld [vmem:[#allocation2 + $0x1c8] sm:$0xff] }
  0x1e   :  { %6305 = vmatprep.subr.bf16.mxu1 %v6304_v33  ;;  %6321 = vmatprep.subr.bf16.mxu0 %v6320_v2  ;;  %v6334_v32 = vpack.c.bf16 %v352_v30, %v351_v28  ;;  %v6360_v2 = vpack.c.bf16 %v382_v1, %v381_v0  ;;  %v383_v3 = vld [vmem:[#allocation2 + $0x1d0] sm:$0xff]  ;;  %v360_v27 = vld [vmem:[#allocation2 + $0x118] sm:$0xff]  ;;  %vm7047_vm9 = vmneg %vm201_vm6 }
  0x1f   :  { %6323 = vmatpush3.bf16.msra.mxu0 %v6322_v7  ;;  %v386_v7 = vld [vmem:[#allocation2 + $0x1e8] sm:$0xff]  ;;  %v359_v26 = vld [vmem:[#allocation2 + $0x110] sm:$0xff]  ;;  %v392_v30 = vld [vmem:[#allocation2 + $0x218] sm:$0xff] }
  0x20   :  { %v391_v28 = vld [vmem:[#allocation2 + $0x210] sm:$0xff] }
  0x21   :  { %6307 = vmatpush3.bf16.msra.mxu1 %v6304_v33  ;;  %v369_v33 = vld [vmem:[#allocation2 + $0x160] sm:$0xff] }
  0x22   :  { %6309 = vmatprep.subr.bf16.mxu1 %v6308_v44 }
  0x25   :  { %6311 = vmatpush3.bf16.msra.mxu1 %v6308_v44  ;;  %v356_v44 = vld [vmem:[#allocation2 + $0xf8] sm:$0xff] }
  0x26   :  { %6313 = vmatprep.subr.bf16.mxu1 %v6312_v49  ;;  %v6342_v47 = vpack.c.bf16 %v356_v44, %v355_v42 }
  0x29   :  { %6315 = vmatpush3.bf16.msra.mxu1 %v6312_v49 }
  0x2a   :  { %6317 = vmatprep.subr.bf16.mxu1 %v6316_v57 }
  0x2d   :  { %6319 = vmatpush3.bf16.msra.mxu1 %v6316_v57  ;;  %v379_v57 = vld [vmem:[#allocation2 + $0x1b0] sm:$0xff] }
  0xf0   :  { %v5831_v9 = vpop.f32.mrb[0].mxu0 }
  0xf1   :  { %v144_v10 = vpop.f32.mrb[1].mxu0  ;;  %v6995_v12 = vadd.f32 %v5831_v9, %v5312_v8  ;;  %v364_v9 = vld [vmem:[#allocation2 + $0x138] sm:$0xff] }
  0xf2   :  { %v6993_v11 = vadd.f32 %v5312_v8, %v144_v10  ;;  %v363_v8 = vld [vmem:[#allocation2 + $0x130] sm:$0xff] }
  0xf3   :  { %v159_v14 = vsel %vm155_vm4, %v6995_v12, 0.0  ;;  %v347_v10 = vld [vmem:[#allocation2 + $0xb0] sm:$0xff] }
  0xf4   :  { %v156_v13 = vsel %vm155_vm4, %v6993_v11, 0.0 }
  0xf5   :  { %157 = vadd.xlane.f32.xlu0 %v156_v13 }
  0xf9   :  { %160 = vadd.xlane.f32.xlu0 %v159_v14  ;;  %v7025_v14 = vpack.c.bf16 %v378_v5, %v377_v4  ;;  %v384_v4 = vld [vmem:[#allocation2 + $0x1d8] sm:$0xff] }
  0xfa   :  { %v6364_v5 = vpack.c.bf16 %v384_v4, %v383_v3 }
  0xfb   :  { %6353 = vmatprep.subr.bf16.mxu1 %v7025_v14 }
 0x182   :  { %v158_v15 = vpop.xlane.xlu0 %157 }
 0x183   :  { %v163_v16 = vmul.f32 0.03125, %v158_v15  ;;  %v6324_v15 = vpack.c.bf16 %v364_v9, %v363_v8  ;;  %v387_v9 = vld [vmem:[#allocation2 + $0x1f0] sm:$0xff] }
 0x185   :  { %v165_v17 = vsub.f32 %v6993_v11, %v163_v16  ;;  %v348_v16 = vld [vmem:[#allocation2 + $0xb8] sm:$0xff]  ;;  %6325 = vmatprep.subr.bf16.mxu0 %v6324_v15  ;;  %v374_v15 = vld [vmem:[#allocation2 + $0x188] sm:$0xff] }
 0x186   :  { %v161_v18 = vpop.xlane.xlu0 %160 }
 0x187   :  { %v164_v19 = vmul.f32 0.03125, %v161_v18  ;;  %v167_v20 = vmul.f32 %v165_v17, %v165_v17  ;;  %v365_v18 = vld [vmem:[#allocation2 + $0x140] sm:$0xff] }
 0x189   :  { %v166_v21 = vsub.f32 %v6995_v12, %v164_v19  ;;  %v169_v22 = vsel %vm155_vm4, %v167_v20, 0.0  ;;  %v366_v19 = vld [vmem:[#allocation2 + $0x148] sm:$0xff]  ;;  %v349_v20 = vld [vmem:[#allocation2 + $0xc0] sm:$0xff] }
 0x18a   :  { %170 = vadd.xlane.f32.xlu1 %v169_v22  ;;  %v350_v22 = vld [vmem:[#allocation2 + $0xc8] sm:$0xff] }
 0x18b   :  { %v168_v23 = vmul.f32 %v166_v21, %v166_v21  ;;  %v6330_v25 = vpack.c.bf16 %v350_v22, %v349_v20 }
 0x18d   :  { %v172_v24 = vsel %vm155_vm4, %v168_v23, 0.0 }
 0x18e   :  { %173 = vadd.xlane.f32.xlu1 %v172_v24 }
 0x217   :  { %v171_v34 = vpop.xlane.xlu1 %170 }
 0x218   :  { %v175_v35 = vmul.f32 0.03125, %v171_v34  ;;  %v370_v34 = vld [vmem:[#allocation2 + $0x168] sm:$0xff] }
 0x219   :  { %v6336_v36 = vpack.c.bf16 %v370_v34, %v369_v33 }
 0x21a   :  { %v177_v37 = vadd.f32 1e-12, %v175_v35  ;;  %v353_v35 = vld [vmem:[#allocation2 + $0xe0] sm:$0xff] }
 0x21b   :  { %v174_v38 = vpop.xlane.xlu1 %173 }
 0x21c   :  { %6789 = vrsqrt.f32 %v177_v37  ;;  %v176_v39 = vmul.f32 0.03125, %v174_v38  ;;  %v354_v37 = vld [vmem:[#allocation2 + $0xe8] sm:$0xff] }
 0x21d   :  { %v6338_v38 = vpack.c.bf16 %v354_v37, %v353_v35 }
 0x21e   :  { %v178_v41 = vadd.f32 1e-12, %v176_v39  ;;  %v371_v39 = vld [vmem:[#allocation2 + $0x170] sm:$0xff] }
 0x220   :  { %6791 = vrsqrt.f32 %v178_v41  ;;  %v372_v41 = vld [vmem:[#allocation2 + $0x178] sm:$0xff] }
 0x221   :  { %v6340_v43 = vpack.c.bf16 %v372_v41, %v371_v39 }
 0x226   :  { %v6790_v52 = vpop.eup %6789 }
 0x227   :  { %v181_v55 = vmul.f32 %v6790_v52, %v165_v17  ;;  %v6326_v17 = vpack.c.bf16 %v348_v16, %v347_v10  ;;  %v388_v10 = vld [vmem:[#allocation2 + $0x1f8] sm:$0xff] }
 0x229   :  { %v187_v58 = vmul.f32 %v186_v51, %v181_v55  ;;  %6327 = vmatpush3.bf16.msra.mxu0 %v6326_v17  ;;  %v357_v17 = vld [vmem:[#allocation2 + $0x100] sm:$0xff] }
 0x22a   :  { %v6792_v59 = vpop.eup %6791 }
 0x22b   :  { %v7018_v60 = vadd.f32 %v192_v56, %v187_v58  ;;  %v182_v61 = vmul.f32 %v6792_v59, %v166_v21  ;;  %v6328_v21 = vpack.c.bf16 %v366_v19, %v365_v18  ;;  %v380_v58 = vld [vmem:[#allocation2 + $0x1b8] sm:$0xff]  ;;  %v358_v18 = vld [vmem:[#allocation2 + $0x108] sm:$0xff]  ;;  %v389_v19 = vld [vmem:[#allocation2 + $0x200] sm:$0xff] }
 0x22c   :  { %v6346_v20 = vpack.c.bf16 %v358_v18, %v357_v17  ;;  %v593_v17 = vld [vmem:[#allocation2 + $0x430] sm:$0xff] }
 0x22d   :  { %211 = vrot.lane.b32.xlu0 %v7018_v60, %s6933_s0  ;;  %v188_v62 = vmul.f32 %v186_v51, %v182_v61  ;;  %v204_v13 = vrot.slane %v7018_v60, 1  ;;  %6329 = vmatprep.subr.bf16.mxu0 %v6328_v21  ;;  %v197_v48 = vrot.slane %v7018_v60, 7  ;;  %v390_v21 = vld [vmem:[#allocation2 + $0x208] sm:$0xff] }
 0x22e   :  { %6331 = vmatpush3.bf16.msra.mxu0 %v6330_v25  ;;  %v6376_v22 = vpack.c.bf16 %v390_v21, %v389_v19  ;;  %v687_v19 = vld [vmem:[#allocation2 + $0x440] sm:$0xff] }
 0x22f   :  { %v7022_v6 = vadd.f32 %v192_v56, %v188_v62  ;;  %v209_v23 = vsel %vm208_vm5, %v204_v13, 0.0  ;;  %6333 = vmatprep.subr.bf16.mxu0 %v6332_v29  ;;  %v202_v52 = vsel %vm201_vm6, 0.0, %v197_v48  ;;  %v6356_v62 = vpack.c.bf16 %v380_v58, %v379_v57 }
 0x230   :  { %v6372_v13 = vpack.c.bf16 %v388_v10, %v387_v9  ;;  %v6350_v29 = vpack.c.bf16 %v360_v27, %v359_v26 }
 0x231   :  { %213 = vrot.lane.b32.xlu1 %v7022_v6, %s6933_s0  ;;  %v205_v24 = vrot.slane %v7022_v6, 1  ;;  %v198_v53 = vrot.slane %v7022_v6, 7  ;;  %v385_v6 = vld [vmem:[#allocation2 + $0x1e0] sm:$0xff] }
 0x232   :  { %6335 = vmatpush3.bf16.msra.mxu0 %v6334_v32  ;;  %v6368_v8 = vpack.c.bf16 %v386_v7, %v385_v6  ;;  %v5316_v32 = vld [vmem:[#allocation2 + $0x98] ss:$0 sm:$0xff] }
 0x233   :  { %v210_v31 = vsel %vm208_vm5, %v205_v24, 0.0  ;;  %6337 = vmatprep.subr.bf16.mxu0 %v6336_v36  ;;  %v203_v59 = vsel %vm201_vm6, 0.0, %v198_v53  ;;  %v376_v24 = vld [vmem:[#allocation2 + $0x198] sm:$0xff] }
 0x235   :  { %219 = vrot.lane.b32.xlu1 %v209_v23, %s6934_s29  ;;  %v375_v23 = vld [vmem:[#allocation2 + $0x190] sm:$0xff] }
 0x236   :  { %6339 = vmatpush3.bf16.msra.mxu0 %v6338_v38  ;;  %v6348_v25 = vpack.c.bf16 %v376_v24, %v375_v23 }
 0x237   :  { %6341 = vmatprep.subr.bf16.mxu0 %v6340_v43 }
 0x239   :  { %221 = vrot.lane.b32.xlu1 %v210_v31, %s6934_s29  ;;  %v6380_v31 = vpack.c.bf16 %v392_v30, %v391_v28  ;;  %v7072_v28 = vsub.s32 1, %v7005_v40 }
 0x23a   :  { %6343 = vmatpush3.bf16.msra.mxu0 %v6342_v47 }
 0x29f   :  { %v212_v51 = vpop.permute.xlu0 %211 }
 0x2a0   :  { %v225_v54 = vsel %vm155_vm4, %v202_v52, %v212_v51  ;;  %v5319_v51 = vld [vmem:[#allocation2 + $0x220] ss:$0 sm:$0xff] }
 0x2a3   :  { %v214_v49 = vpop.permute.xlu1 %213 }
 0x2a4   :  { %v226_v60 = vsel %vm155_vm4, %v203_v59, %v214_v49 }
 0x2a7   :  { %v220_v55 = vpop.permute.xlu1 %219 }
 0x2a8   :  { %v228_v56 = vsel %vm227_vm7, %v225_v54, %v220_v55 }
 0x2a9   :  { %5856 = vmatprep.mubr.msk.f32.mxu1 %vm7875_vm8, %v228_v56 }
 0x2ab   :  { %v222_v61 = vpop.permute.xlu1 %221 }
 0x2ac   :  { %v229_v63 = vsel %vm227_vm7, %v226_v60, %v222_v61 }
 0x2ad   :  { %5857 = vmatmul.mubr.msk.f32.vlgmr.msra.gmra.mrb[0].mxu1 %vm7875_vm8, %v229_v63 }
 0x2ae   :  { %6355 = vmatpush3.bf16.msra.mxu1 %v7025_v14  ;;  %v373_v14 = vld [vmem:[#allocation2 + $0x180] sm:$0xff] }
 0x2af   :  { %6357 = vmatprep.subr.bf16.mxu1 %v6356_v62  ;;  %v6344_v16 = vpack.c.bf16 %v374_v15, %v373_v14  ;;  %v591_v14 = vld [vmem:[#allocation2 + $0x420] sm:$0xff] }
 0x2b1   :  { %6345 = vmatprep.subr.bf16.mxu0 %v6344_v16  ;;  %v592_v16 = vld [vmem:[#allocation2 + $0x428] sm:$0xff] }
 0x2b2   :  { %6359 = vmatpush3.bf16.msra.mxu1 %v6356_v62  ;;  %6347 = vmatpush3.bf16.msra.mxu0 %v6346_v20  ;;  %v6388_v18 = vpack.c.bf16 %v593_v17, %v592_v16  ;;  %v688_v20 = vld [vmem:[#allocation2 + $0x448] sm:$0xff] }
 0x2b3   :  { %6361 = vmatprep.subr.bf16.mxu1 %v6360_v2  ;;  %6349 = vmatprep.subr.bf16.mxu0 %v6348_v25  ;;  %v6392_v21 = vpack.c.bf16 %v688_v20, %v687_v19 }
 0x2b6   :  { %6363 = vmatpush3.bf16.msra.mxu1 %v6360_v2  ;;  %6351 = vmatpush3.bf16.msra.mxu0 %v6350_v29  ;;  %v581_v29 = vrot.slane %v7010_v46, %v7072_v28  ;;  %v6935_v46 = vmov 0.0  }
 0x2b7   :  { %6365 = vmatprep.subr.bf16.mxu1 %v6364_v5 }
 0x2ba   :  { %6367 = vmatpush3.bf16.msra.mxu1 %v6364_v5 }
 0x2bb   :  { %6369 = vmatprep.subr.bf16.mxu1 %v6368_v8 }
 0x2be   :  { %6371 = vmatpush3.bf16.msra.mxu1 %v6368_v8 }
 0x2bf   :  { %6373 = vmatprep.subr.bf16.mxu1 %v6372_v13 }
 0x2c2   :  { %6375 = vmatpush3.bf16.msra.mxu1 %v6372_v13  ;;  %v590_v13 = vld [vmem:[#allocation2 + $0x418] sm:$0xff] }
 0x2c3   :  { %6377 = vmatprep.subr.bf16.mxu1 %v6376_v22  ;;  %v6384_v15 = vpack.c.bf16 %v591_v14, %v590_v13 }
 0x2c5   :  { %6385 = vmatprep.subr.bf16.mxu0 %v6384_v15 }
 0x2c6   :  { %6379 = vmatpush3.bf16.msra.mxu1 %v6376_v22 }
 0x2c7   :  { %6381 = vmatprep.subr.bf16.mxu1 %v6380_v31 }
 0x2ca   :  { %6383 = vmatpush3.bf16.msra.mxu1 %v6380_v31 }
 0x2cb   :  { %5931 = vmatprep.subr.mxu1 %v6935_v46 }
 0x380   :  { %v5858_v33 = vpop.f32.mrb[0].mxu1 }
 0x381   :  { %v326_v34 = vadd.f32 %v5858_v33, %v5316_v32  ;;  %v320_v35 = vpop.f32.mrb[1].mxu1 }
 0x382   :  { %v321_v36 = vadd.f32 %v5316_v32, %v320_v35  ;;  %v587_v32 = vrot.slane %v7012_v50, %v7072_v28  ;;  %v5326_v50 = vld [vmem:[#allocation2 + $0x438] ss:$0 sm:$0xff] }
 0x383   :  { %v330_v37 = vmax.f32 %v326_v34, 0.0 }
 0x384   :  { %v329_v38 = vmax.f32 %v321_v36, 0.0 }
 0x385   :  { %v340_v43 = vrot.slane %v330_v37, 1  ;;  %v334_v44 = vrot.slane %v330_v37, 7 }
 0x386   :  { %v333_v41 = vrot.slane %v329_v38, 7  ;;  %v339_v42 = vrot.slane %v329_v38, 1  ;;  %462 = vmatprep.mubr.f32.mxu0 %v329_v38 }
 0x388   :  { %5321 = vmatmul.mubr.msk.f32.vlgmr.msra.gmra.mrb[2].mxu0 %vm7047_vm9, %v333_v41  ;;  %5891 = vmatprep.mubr.msk.f32.mxu1 %vm208_vm5, %v339_v42  ;;  %v689_v41 = vld [vmem:[#allocation2 + $0x450] sm:$0xff]  ;;  %v690_v42 = vld [vmem:[#allocation2 + $0x458] sm:$0xff] }
 0x389   :  { %467 = vmatprep.mubr.f32.mxu0 %v330_v37  ;;  %5892 = vmatmul.mubr.msk.f32.vlgmr.msra.gmra.mrb[2].mxu1 %vm208_vm5, %v340_v43  ;;  %v6396_v43 = vpack.c.bf16 %v690_v42, %v689_v41 }
 0x38a   :  { %6387 = vmatpush3.bf16.msra.mxu0 %v6384_v15  ;;  %5933 = vmatprep.mubr.msk.f32.mxu1 %vm6936_vm10, %v6935_v46 }
 0x38b   :  { %6389 = vmatprep.subr.bf16.mxu0 %v6388_v18 }
 0x38c   :  { %5323 = vmatmul.mubr.msk.f32.gmra.mrb[4].mxu0 %vm7047_vm9, %v334_v44 }
 0x38e   :  { %6391 = vmatpush3.bf16.msra.mxu0 %v6388_v18 }
 0x38f   :  { %6393 = vmatprep.subr.bf16.mxu0 %v6392_v21 }
 0x45b   :  { %v5486_v47 = vpop.f32.mrb[2].mxu0 }
 0x45c   :  { %v5487_v48 = vpop.f32.mrb[3].mxu0  ;;  %v5893_v49 = vpop.f32.mrb[2].mxu1 }
 0x45d   :  { %v5488_v52 = vadd.f32 %v5487_v48, %v5486_v47  ;;  %v539_v53 = vpop.f32.mrb[3].mxu1 }
 0x45f   :  { %v465_v54 = vadd.f32 %v5488_v52, %v5319_v51  ;;  %v5489_v55 = vpop.f32.mrb[4].mxu0 }
 0x460   :  { %v5490_v56 = vpop.f32.mrb[5].mxu0 }
 0x461   :  { %v540_v57 = vadd.f32 %v539_v53, %v465_v54  ;;  %v5491_v58 = vadd.f32 %v5490_v56, %v5489_v55  ;;  %v5332_v55 = vld [vmem:[#allocation2 + $0x460] ss:$0 sm:$0xff] }
 0x463   :  { %v548_v59 = vmul.f32 0.5, %v540_v57  ;;  %v470_v60 = vadd.f32 %v5491_v58, %v5319_v51 }
 0x465   :  { %v7058_v61 = vadd.f32 %v548_v59, %v6993_v11  ;;  %v545_v62 = vadd.f32 %v5893_v49, %v470_v60  ;;  %v5329_v49 = vld [vmem:[#allocation2 + $0x468] ss:$0 sm:$0xff] }
 0x467   :  { %v549_v63 = vmul.f32 0.5, %v545_v62  ;;  %v552_v0 = vsel %vm155_vm4, %v7058_v61, 0.0 }
 0x468   :  { %553 = vadd.xlane.f32.xlu0 %v552_v0 }
 0x469   :  { %v7063_v1 = vadd.f32 %v549_v63, %v6995_v12 }
 0x46b   :  { %v555_v2 = vsel %vm155_vm4, %v7063_v1, 0.0 }
 0x46c   :  { %556 = vadd.xlane.f32.xlu1 %v555_v2 }
 0x4f5   :  { %v554_v3 = vpop.xlane.xlu0 %553 }
 0x4f6   :  { %v558_v4 = vmul.f32 0.03125, %v554_v3 }
 0x4f8   :  { %v560_v5 = vsub.f32 %v7058_v61, %v558_v4 }
 0x4f9   :  { %v557_v6 = vpop.xlane.xlu1 %556 }
 0x4fa   :  { %v559_v11 = vmul.f32 0.03125, %v557_v6  ;;  %v562_v7 = vmul.f32 %v560_v5, %v560_v5 }
 0x4fc   :  { %v561_v8 = vsub.f32 %v7063_v1, %v559_v11  ;;  %v564_v9 = vsel %vm155_vm4, %v562_v7, 0.0 }
 0x4fd   :  { %565 = vadd.xlane.f32.xlu0 %v564_v9 }
 0x4fe   :  { %v563_v10 = vmul.f32 %v561_v8, %v561_v8 }
 0x500   :  { %v567_v12 = vsel %vm155_vm4, %v563_v10, 0.0 }
 0x501   :  { %568 = vadd.xlane.f32.xlu0 %v567_v12 }
 0x58a   :  { %v566_v22 = vpop.xlane.xlu0 %565 }
 0x58b   :  { %v570_v23 = vmul.f32 0.03125, %v566_v22 }
 0x58d   :  { %v572_v24 = vadd.f32 1e-12, %v570_v23 }
 0x58e   :  { %v569_v25 = vpop.xlane.xlu0 %568 }
 0x58f   :  { %6793 = vrsqrt.f32 %v572_v24  ;;  %v571_v26 = vmul.f32 0.03125, %v569_v25 }
 0x591   :  { %v573_v27 = vadd.f32 1e-12, %v571_v26 }
 0x593   :  { %6795 = vrsqrt.f32 %v573_v27 }
 0x599   :  { %v6794_v30 = vpop.eup %6793 }
 0x59a   :  { %v576_v31 = vmul.f32 %v6794_v30, %v560_v5 }
 0x59c   :  { %v582_v33 = vmul.f32 %v581_v29, %v576_v31 }
 0x59d   :  { %v6796_v34 = vpop.eup %6795 }
 0x59e   :  { %v577_v35 = vmul.f32 %v6796_v34, %v561_v8  ;;  %v588_v36 = vadd.f32 %v587_v32, %v582_v33 }
 0x5a0   :  { %v583_v37 = vmul.f32 %v581_v29, %v577_v35  ;;  %5902 = vmatprep.mubr.msk.f32.mxu0 %vm155_vm4, %v588_v36 }
 0x5a2   :  { %v589_v38 = vadd.f32 %v587_v32, %v583_v37 }
 0x5a4   :  { %5903 = vmatmul.mubr.msk.f32.vlgmr.msra.gmra.mrb[6].mxu0 %vm155_vm4, %v589_v38 }
 0x5a5   :  { %6395 = vmatpush3.bf16.msra.mxu0 %v6392_v21 }
 0x5a6   :  { %6397 = vmatprep.subr.bf16.mxu0 %v6396_v43 }
 0x5a9   :  { %6399 = vmatpush3.bf16.msra.mxu0 %v6396_v43 }
 0x5aa   :  { %5916 = vmatprep.subr.mxu0 %v6935_v46 }
 0x677   :  { %v5904_v44 = vpop.f32.mrb[6].mxu0 }
 0x678   :  { %v7084_v47 = vadd.f32 %v5904_v44, %v5326_v50  ;;  %v671_v48 = vpop.f32.mrb[7].mxu0 }
 0x679   :  { %v7086_v51 = vadd.f32 %v5326_v50, %v671_v48 }
 0x67a   :  { %913 = vrot.lane.b32.xlu1 %v7084_v47, %s6937_s30  ;;  %v686_v53 = vadd.f32 %v5329_v49, %v7084_v47  ;;  %v902_v57 = vadd.f32 %v5332_v55, %v7084_v47 }
 0x67b   :  { %911 = vrot.lane.b32.xlu0 %v7086_v51, %s6937_s30  ;;  %v685_v52 = vadd.f32 %v5329_v49, %v7086_v51  ;;  %v901_v59 = vadd.f32 %v5332_v55, %v7086_v51 }
 0x67d   :  { %5913 = vmatprep.mubr.msk.f32.mxu0 %vm155_vm4, %v685_v52 }
 0x67e   :  { %915 = vrot.lane.b32.xlu1 %v7086_v51, %s6938_s4  ;;  %5914 = vmatmul.mubr.msk.f32.vlgmr.msra.gmra.mrb[8].mxu0 %vm155_vm4, %v686_v53 }
 0x67f   :  { %5918 = vmatprep.mubr.msk.f32.mxu0 %vm6936_vm10, %v6935_v46 }
 0x682   :  { %996 = vrot.lane.b32.xlu1 %v7084_v47, %s6938_s4 }
 0x6ec   :  { %v7102_v54 = vpop.permute.xlu1 %913 }
 0x6ed   :  { %1156 = vrot.lane.b32.xlu1 %v7102_v54, %s6938_s4  ;;  %v7106_v56 = vpop.permute.xlu0 %911 }
 0x6ee   :  { %1076 = vrot.lane.b32.xlu0 %v7106_v56, %s6938_s4 }
 0x6f0   :  { %v916_v58 = vpop.permute.xlu1 %915 }
 0x6f1   :  { %907 = vrot.lane.b32.xlu1 %v902_v57, %s6937_s30  ;;  %5917 = vmatpush3.xpose.msk.msra.mxu0 %vm921_vm11, %v916_v58 }
 0x6f2   :  { %905 = vrot.lane.b32.xlu0 %v901_v59, %s6937_s30  ;;  %5921 = vmatprep.subr.mxu0 %v6935_v46 }
 0x6f4   :  { %v997_v60 = vpop.permute.xlu1 %996  ;;  %5919 = vmatmul.mubr.msk.f32.vlgmr.msra.gmra.mrb[10].mxu0 %vm921_vm11, %v901_v59 }
 0x6f5   :  { %5922 = vmatpush3.xpose.msk.msra.mxu0 %vm921_vm11, %v997_v60  ;;  %5923 = vmatprep.mubr.msk.f32.mxu0 %vm6936_vm10, %v6935_v46 }
 0x6f6   :  { %5926 = vmatprep.subr.mxu0 %v6935_v46 }
 0x6f8   :  { %5924 = vmatmul.mubr.msk.f32.vlgmr.msra.gmra.mrb[12].mxu0 %vm921_vm11, %v902_v57 }
 0x6f9   :  { %5928 = vmatprep.mubr.msk.f32.mxu0 %vm6936_vm10, %v6935_v46 }
 0x751   :  { %v7124_v62 = vpop.f32.mrb[8].mxu0 }
 0x752   :  { %776 = vrot.lane.b32.xlu1 %v7124_v62, %s6939_s5  ;;  %v7128_v63 = vpop.f32.mrb[9].mxu0 }
 0x753   :  { %774 = vrot.lane.b32.xlu0 %v7128_v63, %s6939_s5 }
 0x756   :  { %782 = vrot.lane.b32.xlu1 %v7124_v62, %s6940_s6 }
 0x757   :  { %818 = vrot.lane.b32.xlu0 %v7124_v62, %s6941_s7 }
 0x75a   :  { %794 = vrot.lane.b32.xlu1 %v7124_v62, %s6942_s8 }
 0x75b   :  { %830 = vrot.lane.b32.xlu0 %v7124_v62, %s6943_s9 }
 0x75e   :  { %806 = vrot.lane.b32.xlu1 %v7124_v62, %s6944_s10 }
 0x75f   :  { %v1157_v0 = vpop.permute.xlu1 %1156  ;;  %842 = vrot.lane.b32.xlu0 %v7124_v62, %s6945_s11 }
 0x760   :  { %5932 = vmatpush3.xpose.msk.msra.mxu1 %vm921_vm11, %v1157_v0  ;;  %v1077_v2 = vpop.permute.xlu0 %1076 }
 0x761   :  { %5927 = vmatpush3.xpose.msk.msra.mxu0 %vm921_vm11, %v1077_v2  ;;  %5941 = vmatprep.subr.mxu1 %v6935_v46 }
 0x762   :  { %828 = vrot.lane.b32.xlu1 %v7128_v63, %s6943_s9  ;;  %5936 = vmatprep.subr.mxu0 %v6935_v46 }
 0x763   :  { %v908_v3 = vpop.permute.xlu1 %907  ;;  %854 = vrot.lane.b32.xlu0 %v7124_v62, %s6946_s12 }
 0x764   :  { %5934 = vmatmul.mubr.msk.f32.vlgmr.msra.gmra.mrb[4].mxu1 %vm921_vm11, %v908_v3  ;;  %v906_v4 = vpop.permute.xlu0 %905 }
 0x765   :  { %5929 = vmatmul.mubr.msk.f32.vlgmr.msra.gmra.mrb[14].mxu0 %vm921_vm11, %v906_v4  ;;  %5943 = vmatprep.mubr.msk.f32.mxu1 %vm6936_vm10, %v6935_v46 }
 0x766   :  { %840 = vrot.lane.b32.xlu1 %v7128_v63, %s6945_s11  ;;  %5938 = vmatprep.mubr.msk.f32.mxu0 %vm6936_vm10, %v6935_v46 }
 0x767   :  { %780 = vrot.lane.b32.xlu0 %v7128_v63, %s6940_s6 }
 0x76a   :  { %852 = vrot.lane.b32.xlu1 %v7128_v63, %s6946_s12 }
 0x76b   :  { %792 = vrot.lane.b32.xlu0 %v7128_v63, %s6942_s8 }
 0x76f   :  { %804 = vrot.lane.b32.xlu0 %v7128_v63, %s6944_s10 }
 0x773   :  { %816 = vrot.lane.b32.xlu0 %v7128_v63, %s6941_s7 }
 0x7c4   :  { %v7170_v5 = vpop.permute.xlu1 %776 }
 0x7c5   :  { %822 = vrot.lane.b32.xlu1 %v7170_v5, %s6941_s7  ;;  %786 = vrot.lane.b32.xlu0 %v7170_v5, %s6940_s6  ;;  %v7176_v6 = vpop.permute.xlu0 %774 }
 0x7c7   :  { %v7178_v11 = vpop.f32.mrb[10].mxu0 }
 0x7c8   :  { %v5920_v7 = vpop.f32.mrb[11].mxu0  ;;  %v783_v8 = vpop.permute.xlu1 %782 }
 0x7c9   :  { %834 = vrot.lane.b32.xlu1 %v7170_v5, %s6943_s9  ;;  %798 = vrot.lane.b32.xlu0 %v7170_v5, %s6942_s8  ;;  %v819_v9 = vpop.permute.xlu0 %818  ;;  %v865_v18 = vsel %vm201_vm6, %v7124_v62, %v783_v8 }
 0x7cb   :  { %v7184_v10 = vpop.f32.mrb[12].mxu0 }
 0x7cc   :  { %v5925_v12 = vpop.f32.mrb[13].mxu0  ;;  %v795_v14 = vpop.permute.xlu1 %794 }
 0x7cd   :  { %846 = vrot.lane.b32.xlu1 %v7170_v5, %s6945_s11  ;;  %810 = vrot.lane.b32.xlu0 %v7170_v5, %s6944_s10  ;;  %v831_v13 = vpop.permute.xlu0 %830  ;;  %v870_v19 = vsel %vm868_vm12, %v865_v18, %v795_v14 }
 0x7d0   :  { %v807_v16 = vpop.permute.xlu1 %806 }
 0x7d1   :  { %832 = vrot.lane.b32.xlu0 %v7176_v6, %s6943_s9  ;;  %784 = vrot.lane.b32.xlu1 %v7176_v6, %s6940_s6  ;;  %v843_v15 = vpop.permute.xlu0 %842  ;;  %v875_v20 = vsel %vm873_vm13, %v870_v19, %v807_v16 }
 0x7d2   :  { %v879_v22 = vsel %vm74_vm0, %v875_v20, %v819_v9  ;;  %v6948_v20 = vmov 1966171168  }
 0x7d3   :  { %v884_v25 = vsel %vm882_vm14, %v879_v22, %v831_v13 }
 0x7d4   :  { %v829_v23 = vpop.permute.xlu1 %828  ;;  %v889_v26 = vsel %vm7874_vm15, %v884_v25, %v843_v15 }
 0x7d5   :  { %844 = vrot.lane.b32.xlu0 %v7176_v6, %s6945_s11  ;;  %796 = vrot.lane.b32.xlu1 %v7176_v6, %s6942_s8  ;;  %v855_v17 = vpop.permute.xlu0 %854 }
 0x7d6   :  { %v893_v32 = vsel %vm208_vm5, %v889_v26, %v855_v17 }
 0x7d8   :  { %v841_v29 = vpop.permute.xlu1 %840 }
 0x7d9   :  { %856 = vrot.lane.b32.xlu0 %v7176_v6, %s6946_s12  ;;  %808 = vrot.lane.b32.xlu1 %v7176_v6, %s6944_s10  ;;  %v781_v21 = vpop.permute.xlu0 %780 }
 0x7da   :  { %v864_v30 = vsel %vm201_vm6, %v7128_v63, %v781_v21  ;;  %v39_v21 = vunpack.c.l.s4 %v6948_v20 }
 0x7dc   :  { %v853_v37 = vpop.permute.xlu1 %852  ;;  %v40_v22 = vunpack.c.0.s8 %v39_v21 }
 0x7dd   :  { %820 = vrot.lane.b32.xlu1 %v7176_v6, %s6941_s7  ;;  %v793_v24 = vpop.permute.xlu0 %792 }
 0x7de   :  { %v869_v31 = vsel %vm868_vm12, %v864_v30, %v793_v24  ;;  %v5311_v24 = vld.sshfl [vmem:[%s7871_s1] sm:$0x11 pattern:$0x75316420]  ;;  %v6949_v30 = vmov 0   ;;  %s6950_s1 = smov 16  }
 0x7df   :  { %v37_v26 = vcombine.high %v5311_v24, %v5311_v24 }
 0x7e1   :  { %858 = vrot.lane.b32.xlu1 %v7170_v5, %s6946_s12  ;;  %v805_v27 = vpop.permute.xlu0 %804 }
 0x7e2   :  { %v874_v33 = vsel %vm873_vm13, %v869_v31, %v805_v27 }
 0x7e5   :  { %999 = vrot.lane.b32.xlu1 %v893_v32, %s6947_s13  ;;  %v817_v34 = vpop.permute.xlu0 %816 }
 0x7e6   :  { %v878_v35 = vsel %vm74_vm0, %v874_v33, %v817_v34 }
 0x7e7   :  { %v883_v36 = vsel %vm882_vm14, %v878_v35, %v829_v23  ;;  %v43_v23 = vsub.s32 %v40_v22, %v7005_v40 }
 0x7e8   :  { %v888_v38 = vsel %vm7874_vm15, %v883_v36, %v841_v29 }
 0x7e9   :  { %v892_v41 = vsel %vm208_vm5, %v888_v38, %v853_v37  ;;  %v44_v25 = vrot.slane %v5311_v24, %v43_v23  ;;  %v51_v29 = vrot.slane %v37_v26, %v43_v23 }
 0x7ea   :  { %918 = vrot.lane.b32.xlu0 %v892_v41, %s6947_s13 }
 0x7eb   :  { %vm54_vm1 = vcmp.gt.f32.partialorder %v44_v25, 0.0  ;;  %vm55_vm2 = vcmp.gt.f32.partialorder %v51_v29, 0.0 }
 0x7ec   :  { %v1240_v31 = vsel %vm54_vm1, 1, %v6949_v30  ;;  %v1241_v36 = vsel %vm55_vm2, 1, %v6949_v30  ;;  %vm1256_vm1 = vcmask 64512   ;;  %vm7882_vm2 = vcmask 1045504  }
 0x7ed   :  { %v1245_v33 = vrot.slane %v1240_v31, %v7008_v45  ;;  %v1249_v41 = vrot.slane %v1241_v36, %v7008_v45 }
 0x7ef   :  { %vm7250_vm3 = vcmp.eq.s32.totalorder %v1245_v33, 1 }
 0x837   :  { %v7224_v42 = vpop.f32.mrb[4].mxu1  ;;  %v823_v43 = vpop.permute.xlu1 %822 }
 0x838   :  { %v787_v50 = vpop.permute.xlu0 %786  ;;  %v1152_v44 = vpop.f32.mrb[14].mxu0 }
 0x839   :  { %v5935_v48 = vpop.f32.mrb[5].mxu1  ;;  %v5930_v49 = vpop.f32.mrb[15].mxu0  ;;  %v867_v62 = vsel %vm201_vm6, %v7170_v5, %v787_v50 }
 0x83b   :  { %v835_v52 = vpop.permute.xlu1 %834 }
 0x83c   :  { %v799_v53 = vpop.permute.xlu0 %798 }
 0x83d   :  { %v872_v63 = vsel %vm868_vm12, %v867_v62, %v799_v53 }
 0x83f   :  { %v847_v55 = vpop.permute.xlu1 %846 }
 0x840   :  { %v811_v57 = vpop.permute.xlu0 %810 }
 0x841   :  { %v877_v0 = vsel %vm873_vm13, %v872_v63, %v811_v57 }
 0x842   :  { %v881_v4 = vsel %vm74_vm0, %v877_v0, %v823_v43 }
 0x843   :  { %v785_v58 = vpop.permute.xlu1 %784  ;;  %v886_v5 = vsel %vm882_vm14, %v881_v4, %v835_v52 }
 0x844   :  { %v833_v59 = vpop.permute.xlu0 %832  ;;  %v866_v7 = vsel %vm201_vm6, %v7176_v6, %v785_v58  ;;  %v891_v19 = vsel %vm7874_vm15, %v886_v5, %v847_v55 }
 0x847   :  { %v797_v60 = vpop.permute.xlu1 %796 }
 0x848   :  { %v845_v3 = vpop.permute.xlu0 %844  ;;  %v871_v8 = vsel %vm868_vm12, %v866_v7, %v797_v60 }
 0x84b   :  { %v809_v2 = vpop.permute.xlu1 %808 }
 0x84c   :  { %v876_v9 = vsel %vm873_vm13, %v871_v8, %v809_v2  ;;  %v857_v15 = vpop.permute.xlu0 %856 }
 0x84f   :  { %v821_v12 = vpop.permute.xlu1 %820 }
 0x850   :  { %v880_v13 = vsel %vm74_vm0, %v876_v9, %v821_v12 }
 0x851   :  { %v885_v14 = vsel %vm882_vm14, %v880_v13, %v833_v59 }
 0x852   :  { %v890_v16 = vsel %vm7874_vm15, %v885_v14, %v845_v3  ;;  %vm7259_vm15 = vcmp.eq.s32.totalorder %v1249_v41, 1 }
 0x853   :  { %v859_v17 = vpop.permute.xlu1 %858  ;;  %v894_v18 = vsel %vm208_vm5, %v890_v16, %v857_v15 }
 0x854   :  { %1079 = vrot.lane.b32.xlu0 %v894_v18, %s6947_s13  ;;  %v895_v6 = vsel %vm208_vm5, %v891_v19, %v859_v17 }
 0x855   :  { %1159 = vrot.lane.b32.xlu1 %v895_v6, %s6947_s13 }
 0x857   :  { %v1000_v34 = vpop.permute.xlu1 %999 }
 0x858   :  { %v1073_v38 = vadd.f32 %v7184_v10, %v1000_v34 }
 0x85a   :  { %v1237_v50 = vmul.f32 0.25, %v1073_v38 }
 0x85c   :  { %v919_v27 = vpop.permute.xlu0 %918  ;;  %v1253_v49 = vsel %vm7259_vm15, %v1237_v50, -1e+30  ;;  %v1620_v50 = vld [vmem:[#allocation2 + $0x478] sm:$0xff] }
 0x85d   :  { %v993_v32 = vadd.f32 %v7178_v11, %v919_v27  ;;  %v1260_v52 = vsel %vm1256_vm1, %v1253_v49, -inf }
 0x85f   :  { %v1236_v35 = vmul.f32 0.25, %v993_v32 }
 0x861   :  { %v1252_v43 = vsel %vm7250_vm3, %v1236_v35, -1e+30 }
 0x862   :  { %v1257_v11 = vsel %vm1256_vm1, %v1252_v43, -inf }
 0x873   :  { %1258 = vmax.xlane.f32.xlu0 %v1257_v11 }
 0x879   :  { %1261 = vmax.xlane.f32.xlu1 %v1260_v52  ;;  %v1622_v52 = vld [vmem:[#allocation2 + $0x488] sm:$0xff] }
 0x8c6   :  { %v1080_v10 = vpop.permute.xlu0 %1079 }
 0x8c7   :  { %v1153_v53 = vadd.f32 %v1152_v44, %v1080_v10  ;;  %v1160_v55 = vpop.permute.xlu1 %1159 }
 0x8c8   :  { %v1233_v57 = vadd.f32 %v7224_v42, %v1160_v55 }
 0x8c9   :  { %v1238_v58 = vmul.f32 0.25, %v1153_v53 }
 0x8ca   :  { %v1239_v59 = vmul.f32 0.25, %v1233_v57 }
 0x8cb   :  { %v1254_v60 = vsel %vm7250_vm3, %v1238_v58, -1e+30 }
 0x8cc   :  { %v1263_v62 = vsel %vm1256_vm1, %v1254_v60, -inf  ;;  %v1255_v63 = vsel %vm7259_vm15, %v1239_v59, -1e+30 }
 0x8cd   :  { %1264 = vmax.xlane.f32.xlu0 %v1263_v62  ;;  %v1266_v0 = vsel %vm1256_vm1, %v1255_v63, -inf }
 0x8d1   :  { %1267 = vmax.xlane.f32.xlu0 %v1266_v0 }
 0x900   :  { %v1259_v2 = vpop.xlane.xlu0 %1258 }
 0x901   :  { %v1269_v3 = vsub.f32 %v1252_v43, %v1259_v2  ;;  %v1619_v43 = vld [vmem:[#allocation2 + $0x470] sm:$0xff] }
 0x902   :  { %v6400_v11 = vpack.c.bf16 %v1620_v50, %v1619_v43 }
 0x903   :  { %v1273_v44 = vmul.f32 1.442695, %v1269_v3 }
 0x905   :  { %6797 = vpow2.f32 %v1273_v44 }
 0x906   :  { %v1262_v4 = vpop.xlane.xlu1 %1261 }
 0x907   :  { %v1270_v42 = vsub.f32 %v1253_v49, %v1262_v4  ;;  %v1621_v49 = vld [vmem:[#allocation2 + $0x480] sm:$0xff] }
 0x908   :  { %v6404_v10 = vpack.c.bf16 %v1622_v52, %v1621_v49 }
 0x909   :  { %v1275_v7 = vmul.f32 1.442695, %v1270_v42  ;;  %v5347_v42 = vld [vmem:[#allocation2 + $0x490] ss:$0 sm:$0xff] }
 0x90b   :  { %6799 = vpow2.f32 %v1275_v7 }
 0x90f   :  { %v6798_v8 = vpop.eup %6797 }
 0x910   :  { %v1281_v9 = vsel %vm1256_vm1, %v6798_v8, 0.0 }
 0x911   :  { %1282 = vadd.xlane.f32.xlu0 %v1281_v9 }
 0x915   :  { %v6800_v12 = vpop.eup %6799 }
 0x916   :  { %v1284_v13 = vsel %vm1256_vm1, %v6800_v12, 0.0 }
 0x917   :  { %1285 = vadd.xlane.f32.xlu1 %v1284_v13 }
 0x95a   :  { %v1265_v5 = vpop.xlane.xlu0 %1264 }
 0x95b   :  { %v1271_v14 = vsub.f32 %v1254_v60, %v1265_v5 }
 0x95d   :  { %v1277_v15 = vmul.f32 1.442695, %v1271_v14 }
 0x95e   :  { %v1268_v16 = vpop.xlane.xlu0 %1267 }
 0x95f   :  { %6801 = vpow2.f32 %v1277_v15  ;;  %v1272_v17 = vsub.f32 %v1255_v63, %v1268_v16 }
 0x961   :  { %v1279_v18 = vmul.f32 1.442695, %v1272_v17 }
 0x963   :  { %6803 = vpow2.f32 %v1279_v18 }
 0x969   :  { %v6802_v19 = vpop.eup %6801 }
 0x96a   :  { %v1287_v6 = vsel %vm1256_vm1, %v6802_v19, 0.0 }
 0x96b   :  { %1288 = vadd.xlane.f32.xlu0 %v1287_v6 }
 0x96d   :  { %v6804_v20 = vpop.eup %6803 }
 0x96e   :  { %v1290_v21 = vsel %vm1256_vm1, %v6804_v20, 0.0 }
 0x96f   :  { %1291 = vadd.xlane.f32.xlu1 %v1290_v21 }
 0x980   :  { %1381 = vrot.lane.b32.xlu1 %v7084_v47, %s6934_s29 }
 0x981   :  { %1305 = vrot.lane.b32.xlu0 %v7086_v51, %s6934_s29 }
 0x984   :  { %1457 = vrot.lane.b32.xlu1 %v7106_v56, %s6934_s29 }
 0x988   :  { %1533 = vrot.lane.b32.xlu1 %v7102_v54, %s6934_s29 }
 0x99e   :  { %v1283_v22 = vpop.xlane.xlu0 %1282 }
 0x99f   :  { %6805 = vrcp.f32 %v1283_v22  ;;  %v1751_v22 = vld [vmem:[#allocation2 + $0x498] sm:$0xff] }
 0x9a4   :  { %v1286_v23 = vpop.xlane.xlu1 %1285 }
 0x9a5   :  { %6807 = vrcp.f32 %v1286_v23  ;;  %v1752_v23 = vld [vmem:[#allocation2 + $0x4a0] sm:$0xff] }
 0x9a9   :  { %v6806_v24 = vpop.eup %6805 }
 0x9aa   :  { %v1294_v26 = vmul.f32 %v6806_v24, %v6798_v8  ;;  %v6408_v24 = vpack.c.bf16 %v1752_v23, %v1751_v22 }
 0x9ac   :  { %v1301_v51 = vsel %vm7250_vm3, %v1294_v26, 0.0  ;;  %v1754_v26 = vld [vmem:[#allocation2 + $0x4b0] sm:$0xff] }
 0x9af   :  { %v6808_v27 = vpop.eup %6807 }
 0x9b0   :  { %v1296_v56 = vmul.f32 %v6808_v27, %v6800_v12 }
 0x9b2   :  { %v1302_v30 = vsel %vm7259_vm15, %v1296_v56, 0.0 }
 0x9f8   :  { %v1289_v25 = vpop.xlane.xlu0 %1288 }
 0x9f9   :  { %6809 = vrcp.f32 %v1289_v25  ;;  %v1753_v25 = vld [vmem:[#allocation2 + $0x4a8] sm:$0xff] }
 0x9fa   :  { %v6412_v27 = vpack.c.bf16 %v1754_v26, %v1753_v25  ;;  %v7347_v26 = vsub.s32 4, %v7005_v40 }
 0x9fc   :  { %v1306_v29 = vpop.permute.xlu0 %1305  ;;  %v1292_v47 = vpop.xlane.xlu1 %1291 }
 0x9fd   :  { %6811 = vrcp.f32 %v1292_v47  ;;  %5937 = vmatpush3.msra.mxu0 %v1306_v29 }
 0x9fe   :  { %5939 = vmatmul.mubr.msk.f32.vlgmr.msra.gmra.mrb[16].mxu0 %vm1256_vm1, %v1301_v51  ;;  %5946 = vmatprep.subr.mxu0 %v6935_v46 }
 0x9ff   :  { %5948 = vmatprep.mubr.msk.f32.mxu0 %vm6936_vm10, %v6935_v46 }
 0xa00   :  { %v1382_v54 = vpop.permute.xlu1 %1381 }
 0xa01   :  { %5942 = vmatpush3.msra.mxu1 %v1382_v54 }
 0xa02   :  { %5944 = vmatmul.mubr.msk.f32.vlgmr.msra.gmra.mrb[6].mxu1 %vm1256_vm1, %v1302_v30  ;;  %5951 = vmatprep.subr.mxu1 %v6935_v46 }
 0xa03   :  { %v6810_v31 = vpop.eup %6809  ;;  %5953 = vmatprep.mubr.msk.f32.mxu1 %vm6936_vm10, %v6935_v46 }
 0xa04   :  { %v1458_v32 = vpop.permute.xlu1 %1457  ;;  %v1298_v33 = vmul.f32 %v6810_v31, %v6802_v19  ;;  %v7324_v31 = vsub.s32 2, %v7005_v40 }
 0xa05   :  { %5947 = vmatpush3.msra.mxu0 %v1458_v32  ;;  %v7326_v32 = vld [vmem:[#allocation2 + $0x28] sm:$0x1f] }
 0xa06   :  { %v1303_v34 = vsel %vm7250_vm3, %v1298_v33, 0.0  ;;  %6401 = vmatprep.subr.bf16.mxu0 %v6400_v11  ;;  %v1742_v33 = vrot.slane %v7326_v32, %v7324_v31 }
 0xa07   :  { %v6812_v35 = vpop.eup %6811  ;;  %5949 = vmatmul.mubr.msk.f32.vlgmr.msra.gmra.mrb[18].mxu0 %vm1256_vm1, %v1303_v34 }
 0xa08   :  { %v1534_v36 = vpop.permute.xlu1 %1533  ;;  %v1300_v38 = vmul.f32 %v6812_v35, %v6804_v20  ;;  %6403 = vmatpush3.bf16.msra.mxu0 %v6400_v11 }
 0xa09   :  { %5952 = vmatpush3.msra.mxu1 %v1534_v36  ;;  %6405 = vmatprep.subr.bf16.mxu0 %v6404_v10  ;;  %v7330_v36 = vld [vmem:[#allocation2 + $0x30] sm:$0x1f] }
 0xa0a   :  { %v1304_v41 = vsel %vm7259_vm15, %v1300_v38, 0.0  ;;  %6409 = vmatprep.subr.bf16.mxu1 %v6408_v24  ;;  %v1748_v38 = vrot.slane %v7330_v36, %v7324_v31 }
 0xa0b   :  { %5954 = vmatmul.mubr.msk.f32.vlgmr.msra.gmra.mrb[8].mxu1 %vm1256_vm1, %v1304_v41 }
 0xa0c   :  { %6407 = vmatpush3.bf16.msra.mxu0 %v6404_v10  ;;  %6411 = vmatpush3.bf16.msra.mxu1 %v6408_v24  ;;  %v5348_v10 = vld [vmem:[#allocation2 + $0x4b8] ss:$0 sm:$0xff] }
 0xa0d   :  { %6413 = vmatprep.subr.bf16.mxu1 %v6412_v27 }
 0xa10   :  { %6415 = vmatpush3.bf16.msra.mxu1 %v6412_v27  ;;  %v1865_v27 = vld [vmem:[#allocation2 + $0x4d0] sm:$0xff] }
 0xad1   :  { %v1377_v53 = vpop.f32.mrb[16].mxu0 }
 0xad2   :  { %v5940_v55 = vpop.f32.mrb[17].mxu0 }
 0xad5   :  { %v1453_v57 = vpop.f32.mrb[6].mxu1 }
 0xad6   :  { %v5945_v58 = vpop.f32.mrb[7].mxu1 }
 0xada   :  { %v1529_v59 = vpop.f32.mrb[18].mxu0 }
 0xadb   :  { %1611 = vrot.lane.b32.xlu0 %v1529_v59, %s6950_s1  ;;  %v5950_v60 = vpop.f32.mrb[19].mxu0 }
 0xade   :  { %v1605_v62 = vpop.f32.mrb[8].mxu1 }
 0xadf   :  { %1613 = vrot.lane.b32.xlu1 %v1605_v62, %s6950_s1  ;;  %v5955_v63 = vpop.f32.mrb[9].mxu1 }
 0xb4d   :  { %v1612_v0 = vpop.permute.xlu0 %1611 }
 0xb4e   :  { %v1617_v2 = vsel %vm921_vm11, %v1377_v53, %v1612_v0 }
 0xb4f   :  { %5964 = vmatprep.mubr.msk.f32.mxu0 %vm155_vm4, %v1617_v2 }
 0xb51   :  { %v1614_v3 = vpop.permute.xlu1 %1613 }
 0xb52   :  { %v1618_v44 = vsel %vm921_vm11, %v1453_v57, %v1614_v3  ;;  %v1986_v3 = vld [vmem:[#allocation2 + $0x508] sm:$0xff] }
 0xb53   :  { %5965 = vmatmul.mubr.msk.f32.vlgmr.msra.gmra.mrb[20].mxu0 %vm155_vm4, %v1618_v44  ;;  %v1987_v44 = vld [vmem:[#allocation2 + $0x510] sm:$0xff] }
 0xc26   :  { %v5966_v4 = vpop.f32.mrb[20].mxu0 }
 0xc27   :  { %v1705_v7 = vadd.f32 %v5966_v4, %v7063_v1  ;;  %v1695_v8 = vpop.f32.mrb[21].mxu0  ;;  %v1988_v4 = vld [vmem:[#allocation2 + $0x518] sm:$0xff] }
 0xc28   :  { %v1704_v9 = vadd.f32 %v1695_v8, %v7058_v61 }
 0xc29   :  { %v7311_v12 = vadd.f32 %v5347_v42, %v1705_v7  ;;  %v1989_v7 = vld [vmem:[#allocation2 + $0x520] sm:$0xff] }
 0xc2a   :  { %v7313_v13 = vadd.f32 %v5347_v42, %v1704_v9  ;;  %v6416_v42 = vpack.c.bf16 %v1987_v44, %v1986_v3  ;;  %v6420_v8 = vpack.c.bf16 %v1989_v7, %v1988_v4  ;;  %v1869_v44 = vld [vmem:[#allocation2 + $0x4f0] sm:$0xff] }
 0xc2b   :  { %v1716_v5 = vsel %vm155_vm4, %v7311_v12, 0.0 }
 0xc2c   :  { %1717 = vadd.xlane.f32.xlu1 %v1716_v5  ;;  %v1713_v14 = vsel %vm155_vm4, %v7313_v13, 0.0  ;;  %6417 = vmatprep.subr.bf16.mxu0 %v6416_v42 }
 0xc2d   :  { %1714 = vadd.xlane.f32.xlu0 %v1713_v14  ;;  %6419 = vmatpush3.bf16.msra.mxu0 %v6416_v42 }
 0xc2e   :  { %6421 = vmatprep.subr.bf16.mxu0 %v6420_v8 }
 0xc31   :  { %6423 = vmatpush3.bf16.msra.mxu0 %v6420_v8 }
 0xcb9   :  { %v1718_v15 = vpop.xlane.xlu1 %1717 }
 0xcba   :  { %v1720_v16 = vmul.f32 0.03125, %v1718_v15  ;;  %v1715_v17 = vpop.xlane.xlu0 %1714 }
 0xcbb   :  { %v1719_v18 = vmul.f32 0.03125, %v1715_v17 }
 0xcbc   :  { %v1722_v1 = vsub.f32 %v7311_v12, %v1720_v16 }
 0xcbd   :  { %v1721_v61 = vsub.f32 %v7313_v13, %v1719_v18  ;;  %v1863_v18 = vld [vmem:[#allocation2 + $0x4c0] sm:$0xff] }
 0xcbe   :  { %v1724_v20 = vmul.f32 %v1722_v1, %v1722_v1 }
 0xcbf   :  { %v1723_v19 = vmul.f32 %v1721_v61, %v1721_v61 }
 0xcc0   :  { %v1728_v21 = vsel %vm155_vm4, %v1724_v20, 0.0  ;;  %v7342_v20 = vsub.s32 3, %v7005_v40 }
 0xcc1   :  { %v1725_v6 = vsel %vm155_vm4, %v1723_v19, 0.0 }
 0xcc2   :  { %1726 = vadd.xlane.f32.xlu0 %v1725_v6 }
 0xcc6   :  { %1729 = vadd.xlane.f32.xlu0 %v1728_v21  ;;  %v1864_v21 = vld [vmem:[#allocation2 + $0x4c8] sm:$0xff] }
 0xd4f   :  { %v1727_v29 = vpop.xlane.xlu0 %1726 }
 0xd50   :  { %v1731_v47 = vmul.f32 0.03125, %v1727_v29 }
 0xd52   :  { %v1733_v51 = vadd.f32 1e-12, %v1731_v47 }
 0xd53   :  { %v1730_v56 = vpop.xlane.xlu0 %1729 }
 0xd54   :  { %6813 = vrsqrt.f32 %v1733_v51  ;;  %v1732_v54 = vmul.f32 0.03125, %v1730_v56 }
 0xd56   :  { %v1734_v30 = vadd.f32 1e-12, %v1732_v54 }
 0xd58   :  { %6815 = vrsqrt.f32 %v1734_v30  ;;  %v7352_v30 = vsub.s32 5, %v7005_v40 }
 0xd5e   :  { %v6814_v34 = vpop.eup %6813 }
 0xd5f   :  { %v1737_v35 = vmul.f32 %v6814_v34, %v1721_v61  ;;  %v5353_v61 = vld [vmem:[#allocation2 + $0x500] ss:$0 sm:$0xff] }
 0xd61   :  { %v1743_v41 = vmul.f32 %v1742_v33, %v1737_v35 }
 0xd62   :  { %v6816_v43 = vpop.eup %6815 }
 0xd63   :  { %v1738_v50 = vmul.f32 %v6816_v43, %v1722_v1  ;;  %v1749_v11 = vadd.f32 %v1748_v38, %v1743_v41 }
 0xd65   :  { %v1744_v49 = vmul.f32 %v1742_v33, %v1738_v50  ;;  %5975 = vmatprep.mubr.msk.f32.mxu1 %vm155_vm4, %v1749_v11  ;;  %v1866_v33 = vld [vmem:[#allocation2 + $0x4d8] sm:$0xff]  ;;  %v7357_v50 = vsub.s32 6, %v7005_v40  ;;  %v1867_v11 = vld [vmem:[#allocation2 + $0x4e0] sm:$0xff] }
 0xd67   :  { %v1750_v52 = vadd.f32 %v1748_v38, %v1744_v49 }
 0xd69   :  { %5976 = vmatmul.mubr.msk.f32.vlgmr.msra.gmra.mrb[10].mxu1 %vm155_vm4, %v1750_v52 }
 0xe3c   :  { %v5977_v53 = vpop.f32.mrb[10].mxu1 }
 0xe3d   :  { %v1838_v55 = vadd.f32 %v5977_v53, %v5348_v10  ;;  %v1832_v57 = vpop.f32.mrb[11].mxu1 }
 0xe3e   :  { %v1833_v58 = vadd.f32 %v5348_v10, %v1832_v57 }
 0xe3f   :  { %v5352_v59 = vmul.f32 -1.442695, %v1838_v55 }
 0xe40   :  { %v5351_v60 = vmul.f32 -1.442695, %v1833_v58 }
 0xe41   :  { %6817 = vpow2.f32 %v5352_v59  ;;  %v1868_v59 = vld [vmem:[#allocation2 + $0x4e8] sm:$0xff] }
 0xe42   :  { %6819 = vpow2.f32 %v5351_v60 }
 0xe4b   :  { %v6818_v62 = vpop.eup %6817 }
 0xe4c   :  { %v6820_v63 = vpop.eup %6819  ;;  %v1848_v0 = vadd.f32 1.0, %v6818_v62 }
 0xe4d   :  { %v1847_v2 = vadd.f32 1.0, %v6820_v63 }
 0xe4e   :  { %6821 = vrcp.f32 %v1848_v0 }
 0xe4f   :  { %6823 = vrcp.f32 %v1847_v2 }
 0xe58   :  { %v6822_v9 = vpop.eup %6821 }
 0xe59   :  { %v6824_v5 = vpop.eup %6823  ;;  %1857 = vrot.lane.b32.xlu1 %v6822_v9, %s6938_s4 }
 0xe5a   :  { %1855 = vrot.lane.b32.xlu0 %v6824_v5, %s6938_s4 }
 0xecb   :  { %v1858_v14 = vpop.permute.xlu1 %1857 }
 0xecc   :  { %v1862_v15 = vmul.f32 %v1858_v14, %v1838_v55  ;;  %v1856_v16 = vpop.permute.xlu0 %1855 }
 0xecd   :  { %v1861_v17 = vmul.f32 %v1856_v16, %v1833_v58  ;;  %v7362_v58 = vsub.s32 7, %v7005_v40  ;;  %v1870_v40 = vld [vmem:[#allocation2 + $0x4f8] sm:$0xff] }
 0xece   :  { %v1883_v1 = vrot.slane %v1862_v15, %v7008_v45  ;;  %v1895_v23 = vrot.slane %v1862_v15, %v7072_v28  ;;  %v1907_v47 = vrot.slane %v1862_v15, %v7324_v31  ;;  %v1919_v35 = vrot.slane %v1862_v15, %v7342_v20 }
 0xecf   :  { %v1879_v19 = vrot.slane %v1861_v17, %v7008_v45  ;;  %v1891_v6 = vrot.slane %v1861_v17, %v7072_v28  ;;  %v1903_v25 = vrot.slane %v1861_v17, %v7324_v31  ;;  %v1915_v54 = vrot.slane %v1861_v17, %v7342_v20 }
 0xed0   :  { %v1885_v22 = vmul.f32 %v1883_v1, %v1863_v18  ;;  %v1897_v34 = vmul.f32 %v1895_v23, %v1864_v21  ;;  %v1927_v43 = vrot.slane %v1861_v17, %v7347_v26  ;;  %v1909_v49 = vmul.f32 %v1907_v47, %v1865_v27 }
 0xed1   :  { %v1884_v24 = vmul.f32 %v1879_v19, %v1863_v18  ;;  %v1896_v56 = vmul.f32 %v1891_v6, %v1864_v21  ;;  %v1908_v41 = vmul.f32 %v1903_v25, %v1865_v27  ;;  %v1931_v52 = vrot.slane %v1862_v15, %v7347_v26 }
 0xed2   :  { %v1887_v29 = vadd.f32 %v5353_v61, %v1885_v22  ;;  %v1920_v55 = vmul.f32 %v1915_v54, %v1866_v33  ;;  %v1939_v57 = vrot.slane %v1861_v17, %v7352_v30  ;;  %v1921_v60 = vmul.f32 %v1919_v35, %v1866_v33 }
 0xed3   :  { %v1886_v51 = vadd.f32 %v5353_v61, %v1884_v24  ;;  %v1943_v62 = vrot.slane %v1862_v15, %v7352_v30  ;;  %v1932_v2 = vmul.f32 %v1927_v43, %v1867_v11  ;;  %v1951_v3 = vrot.slane %v1861_v17, %v7357_v50 }
 0xed4   :  { %v1899_v10 = vadd.f32 %v1897_v34, %v1887_v29  ;;  %v1933_v4 = vmul.f32 %v1931_v52, %v1867_v11  ;;  %v1955_v42 = vrot.slane %v1862_v15, %v7357_v50  ;;  %v1944_v9 = vmul.f32 %v1939_v57, %v1868_v59 }
 0xed5   :  { %v1898_v38 = vadd.f32 %v1896_v56, %v1886_v51  ;;  %v1963_v5 = vrot.slane %v1861_v17, %v7362_v58  ;;  %v1945_v14 = vmul.f32 %v1943_v62, %v1868_v59  ;;  %v1967_v16 = vrot.slane %v1862_v15, %v7362_v58 }
 0xed6   :  { %v1911_v63 = vadd.f32 %v1909_v49, %v1899_v10  ;;  %v1956_v61 = vmul.f32 %v1951_v3, %v1869_v44  ;;  %v1957_v19 = vmul.f32 %v1955_v42, %v1869_v44  ;;  %v2150_v44 = vld [vmem:[#allocation2 + $0x228] sm:$0xff]  ;;  %v2152_v42 = vld [vmem:[#allocation2 + $0x238] sm:$0xff] }
 0xed7   :  { %v1910_v53 = vadd.f32 %v1908_v41, %v1898_v38  ;;  %v1968_v22 = vmul.f32 %v1963_v5, %v1870_v40  ;;  %v1969_v23 = vmul.f32 %v1967_v16, %v1870_v40  ;;  %v5358_v41 = vld [vmem:[#allocation2 + $0x528] ss:$0 sm:$0xff]  ;;  %v2155_v40 = vld [vmem:[#allocation2 + $0x250] sm:$0xff]  ;;  %v2156_v16 = vld [vmem:[#allocation2 + $0x258] sm:$0xff] }
 0xed8   :  { %v1923_v7 = vadd.f32 %v1921_v60, %v1911_v63  ;;  %v2154_v5 = vld [vmem:[#allocation2 + $0x248] sm:$0xff] }
 0xed9   :  { %v1922_v0 = vadd.f32 %v1920_v55, %v1910_v53 }
 0xeda   :  { %v1935_v18 = vadd.f32 %v1933_v4, %v1923_v7  ;;  %v2151_v4 = vld [vmem:[#allocation2 + $0x230] sm:$0xff] }
 0xedb   :  { %v1934_v8 = vadd.f32 %v1932_v2, %v1922_v0  ;;  %v6424_v7 = vpack.c.bf16 %v2151_v4, %v2150_v44 }
 0xedc   :  { %v1947_v6 = vadd.f32 %v1945_v14, %v1935_v18  ;;  %v6432_v14 = vpack.c.bf16 %v2155_v40, %v2154_v5  ;;  %v2157_v18 = vld [vmem:[#allocation2 + $0x260] sm:$0xff]  ;;  %v2269_v5 = vld [vmem:[#allocation2 + $0x2b8] sm:$0xff] }
 0xedd   :  { %v1946_v1 = vadd.f32 %v1944_v9, %v1934_v8  ;;  %v2153_v8 = vld [vmem:[#allocation2 + $0x240] sm:$0xff]  ;;  %6425 = vmatprep.subr.bf16.mxu1 %v6424_v7 }
 0xede   :  { %v1959_v24 = vadd.f32 %v1957_v19, %v1947_v6  ;;  %v6428_v9 = vpack.c.bf16 %v2153_v8, %v2152_v42  ;;  %6427 = vmatpush3.bf16.msra.mxu1 %v6424_v7  ;;  %v2284_v42 = vld [vmem:[#allocation2 + $0x330] sm:$0xff]  ;;  %v2285_v7 = vld [vmem:[#allocation2 + $0x338] sm:$0xff] }
 0xedf   :  { %v1958_v21 = vadd.f32 %v1956_v61, %v1946_v1  ;;  %v6436_v1 = vpack.c.bf16 %v2157_v18, %v2156_v16  ;;  %v2268_v8 = vld [vmem:[#allocation2 + $0x2b0] sm:$0xff]  ;;  %v2286_v18 = vld [vmem:[#allocation2 + $0x340] sm:$0xff] }
 0xee0   :  { %v1971_v27 = vadd.f32 %v1969_v23, %v1959_v24  ;;  %6429 = vmatprep.subr.bf16.mxu1 %v6428_v9  ;;  %v2158_v24 = vld [vmem:[#allocation2 + $0x268] sm:$0xff]  ;;  %v6458_v16 = vpack.c.bf16 %v2269_v5, %v2268_v8  ;;  %v2305_v8 = vld [vmem:[#allocation2 + $0x3d8] sm:$0xff]  ;;  %v2306_v5 = vld [vmem:[#allocation2 + $0x3e0] sm:$0xff] }
 0xee1   :  { %v1970_v25 = vadd.f32 %v1968_v22, %v1958_v21 }
 0xee2   :  { %v5355_v47 = vmul.f32 -1.442695, %v1971_v27  ;;  %6431 = vmatpush3.bf16.msra.mxu1 %v6428_v9  ;;  %v6456_v9 = vpack.c.bf16 %v2285_v7, %v2284_v42  ;;  %v2304_v7 = vld [vmem:[#allocation2 + $0x3d0] sm:$0xff] }
 0xee3   :  { %v5354_v29 = vmul.f32 -1.442695, %v1970_v25  ;;  %6433 = vmatprep.subr.bf16.mxu1 %v6432_v14 }
 0xee5   :  { %6825 = vpow2.f32 %v5354_v29  ;;  %v2160_v29 = vld [vmem:[#allocation2 + $0x278] sm:$0xff] }
 0xee6   :  { %6827 = vpow2.f32 %v5355_v47  ;;  %6435 = vmatpush3.bf16.msra.mxu1 %v6432_v14  ;;  %v2161_v47 = vld [vmem:[#allocation2 + $0x280] sm:$0xff] }
 0xee7   :  { %6437 = vmatprep.subr.bf16.mxu1 %v6436_v1 }
 0xeea   :  { %6439 = vmatpush3.bf16.msra.mxu1 %v6436_v1  ;;  %v2287_v1 = vld [vmem:[#allocation2 + $0x348] sm:$0xff] }
 0xeef   :  { %v6826_v17 = vpop.eup %6825 }
 0xef0   :  { %v6828_v51 = vpop.eup %6827  ;;  %v1978_v56 = vadd.f32 1.0, %v6826_v17  ;;  %v2109_v17 = vrot.slane %v7326_v32, %v7342_v20 }
 0xef1   :  { %v1979_v54 = vadd.f32 1.0, %v6828_v51  ;;  %v6444_v51 = vpack.c.bf16 %v2161_v47, %v2160_v29  ;;  %v2273_v29 = vld [vmem:[#allocation2 + $0x2d8] sm:$0xff] }
 0xef2   :  { %6829 = vrcp.f32 %v1978_v56 }
 0xef3   :  { %6831 = vrcp.f32 %v1979_v54 }
 0xefc   :  { %v6830_v15 = vpop.eup %6829 }
 0xefd   :  { %v6832_v33 = vpop.eup %6831  ;;  %v1984_v34 = vmul.f32 %v6830_v15, %v1970_v25  ;;  %v2159_v25 = vld [vmem:[#allocation2 + $0x270] sm:$0xff] }
 0xefe   :  { %v1985_v35 = vmul.f32 %v6832_v33, %v1971_v27  ;;  %v6440_v27 = vpack.c.bf16 %v2159_v25, %v2158_v24  ;;  %v2115_v33 = vrot.slane %v7330_v36, %v7342_v20  ;;  %v2289_v24 = vld [vmem:[#allocation2 + $0x358] sm:$0xff]  ;;  %v2272_v25 = vld [vmem:[#allocation2 + $0x2d0] sm:$0xff] }
 0xeff   :  { %5986 = vmatprep.mubr.msk.f32.mxu0 %vm155_vm4, %v1984_v34  ;;  %v6466_v47 = vpack.c.bf16 %v2273_v29, %v2272_v25  ;;  %v2279_v29 = vld [vmem:[#allocation2 + $0x308] sm:$0xff] }
 0xf00   :  { %5987 = vmatmul.mubr.msk.f32.vlgmr.msra.gmra.mrb[22].mxu0 %vm155_vm4, %v1985_v35  ;;  %6441 = vmatprep.subr.bf16.mxu1 %v6440_v27 }
 0xf01   :  { %6443 = vmatpush3.bf16.msra.mxu1 %v6440_v27 }
 0xf02   :  { %6445 = vmatprep.subr.bf16.mxu1 %v6444_v51 }
 0xf05   :  { %6447 = vmatpush3.bf16.msra.mxu1 %v6444_v51  ;;  %v2291_v51 = vld [vmem:[#allocation2 + $0x368] sm:$0xff] }
 0xfd3   :  { %v5988_v38 = vpop.f32.mrb[22].mxu0 }
 0xfd4   :  { %v2072_v43 = vadd.f32 %v5988_v38, %v7311_v12  ;;  %v2062_v11 = vpop.f32.mrb[23].mxu0  ;;  %v2280_v38 = vld [vmem:[#allocation2 + $0x310] sm:$0xff] }
 0xfd5   :  { %v2071_v49 = vadd.f32 %v2062_v11, %v7313_v13 }
 0xfd6   :  { %v7373_v52 = vadd.f32 %v5358_v41, %v2072_v43  ;;  %v2264_v43 = vld [vmem:[#allocation2 + $0x290] sm:$0xff] }
 0xfd7   :  { %v7375_v10 = vadd.f32 %v5358_v41, %v2071_v49  ;;  %v2281_v41 = vld [vmem:[#allocation2 + $0x318] sm:$0xff] }
 0xfd8   :  { %v2083_v53 = vsel %vm155_vm4, %v7373_v52, 0.0  ;;  %v6448_v49 = vpack.c.bf16 %v2281_v41, %v2280_v38 }
 0xfd9   :  { %2084 = vadd.xlane.f32.xlu0 %v2083_v53  ;;  %v2080_v55 = vsel %vm155_vm4, %v7375_v10, 0.0  ;;  %v2265_v53 = vld [vmem:[#allocation2 + $0x298] sm:$0xff] }
 0xfda   :  { %2081 = vadd.xlane.f32.xlu1 %v2080_v55  ;;  %v2296_v55 = vld [vmem:[#allocation2 + $0x390] sm:$0xff]  ;;  %6449 = vmatprep.subr.bf16.mxu0 %v6448_v49 }
0x1066   :  { %v2085_v57 = vpop.xlane.xlu0 %2084 }
0x1067   :  { %v2087_v59 = vmul.f32 0.03125, %v2085_v57  ;;  %v2082_v60 = vpop.xlane.xlu1 %2081  ;;  %v2297_v57 = vld [vmem:[#allocation2 + $0x398] sm:$0xff] }
0x1068   :  { %v2086_v62 = vmul.f32 0.03125, %v2082_v60  ;;  %v6450_v60 = vpack.c.bf16 %v2265_v53, %v2264_v43 }
0x1069   :  { %v2089_v12 = vsub.f32 %v7373_v52, %v2087_v59 }
0x106a   :  { %v2088_v13 = vsub.f32 %v7375_v10, %v2086_v62  ;;  %v7391_v62 = vpack.c.bf16 %v2297_v57, %v2296_v55  ;;  %6451 = vmatpush3.bf16.msra.mxu0 %v6450_v60  ;;  %v2298_v55 = vld [vmem:[#allocation2 + $0x3a0] sm:$0xff]  ;;  %v2299_v57 = vld [vmem:[#allocation2 + $0x3a8] sm:$0xff] }
0x106b   :  { %v2091_v63 = vmul.f32 %v2089_v12, %v2089_v12 }
0x106c   :  { %v2090_v0 = vmul.f32 %v2088_v13, %v2088_v13  ;;  %6481 = vmatprep.subr.bf16.mxu1 %v7391_v62 }
0x106d   :  { %v2095_v2 = vsel %vm155_vm4, %v2091_v63, 0.0  ;;  %v2283_v63 = vld [vmem:[#allocation2 + $0x328] sm:$0xff] }
0x106e   :  { %2096 = vadd.xlane.f32.xlu1 %v2095_v2  ;;  %v2092_v3 = vsel %vm155_vm4, %v2090_v0, 0.0  ;;  %v2266_v0 = vld [vmem:[#allocation2 + $0x2a0] sm:$0xff] }
0x106f   :  { %2093 = vadd.xlane.f32.xlu0 %v2092_v3  ;;  %v2267_v3 = vld [vmem:[#allocation2 + $0x2a8] sm:$0xff] }
0x1070   :  { %v6454_v44 = vpack.c.bf16 %v2267_v3, %v2266_v0  ;;  %v6484_v0 = vpack.c.bf16 %v2299_v57, %v2298_v55 }
0x10fb   :  { %v2097_v61 = vpop.xlane.xlu1 %2096 }
0x10fc   :  { %v2099_v19 = vmul.f32 0.03125, %v2097_v61  ;;  %v2094_v6 = vpop.xlane.xlu0 %2093  ;;  %v2270_v61 = vld [vmem:[#allocation2 + $0x2c0] sm:$0xff] }
0x10fd   :  { %v2098_v21 = vmul.f32 0.03125, %v2094_v6  ;;  %v2271_v6 = vld [vmem:[#allocation2 + $0x2c8] sm:$0xff] }
0x10fe   :  { %v2101_v22 = vadd.f32 1e-12, %v2099_v19  ;;  %v6460_v19 = vpack.c.bf16 %v2287_v1, %v2286_v18  ;;  %v2276_v1 = vld [vmem:[#allocation2 + $0x2f0] sm:$0xff] }
0x10ff   :  { %v2100_v23 = vadd.f32 1e-12, %v2098_v21 }
0x1100   :  { %6833 = vrsqrt.f32 %v2101_v22  ;;  %v6462_v22 = vpack.c.bf16 %v2271_v6, %v2270_v61  ;;  %v2277_v61 = vld [vmem:[#allocation2 + $0x2f8] sm:$0xff] }
0x1101   :  { %6835 = vrsqrt.f32 %v2100_v23  ;;  %v2288_v23 = vld [vmem:[#allocation2 + $0x350] sm:$0xff]  ;;  %v6474_v6 = vpack.c.bf16 %v2277_v61, %v2276_v1 }
0x1102   :  { %v6464_v27 = vpack.c.bf16 %v2289_v24, %v2288_v23  ;;  %v2295_v23 = vld [vmem:[#allocation2 + $0x388] sm:$0xff] }
0x110a   :  { %v6834_v56 = vpop.eup %6833 }
0x110b   :  { %v6836_v54 = vpop.eup %6835  ;;  %v2105_v15 = vmul.f32 %v6834_v56, %v2089_v12  ;;  %v2282_v12 = vld [vmem:[#allocation2 + $0x320] sm:$0xff] }
0x110c   :  { %v2104_v34 = vmul.f32 %v6836_v54, %v2088_v13  ;;  %v6452_v13 = vpack.c.bf16 %v2283_v63, %v2282_v12  ;;  %v2274_v56 = vld [vmem:[#allocation2 + $0x2e0] sm:$0xff] }
0x110d   :  { %v2111_v35 = vmul.f32 %v2109_v17, %v2105_v15  ;;  %v2275_v15 = vld [vmem:[#allocation2 + $0x2e8] sm:$0xff] }
0x110e   :  { %v2110_v11 = vmul.f32 %v2109_v17, %v2104_v34  ;;  %6453 = vmatprep.subr.bf16.mxu0 %v6452_v13  ;;  %v2290_v17 = vld [vmem:[#allocation2 + $0x360] sm:$0xff]  ;;  %v2301_v13 = vld [vmem:[#allocation2 + $0x3b8] sm:$0xff] }
0x110f   :  { %v7389_v59 = vadd.f32 %v2115_v33, %v2111_v35  ;;  %6455 = vmatpush3.bf16.msra.mxu0 %v6454_v44  ;;  %v6468_v54 = vpack.c.bf16 %v2291_v51, %v2290_v17  ;;  %v2302_v44 = vld [vmem:[#allocation2 + $0x3c0] sm:$0xff]  ;;  %v2311_v51 = vld [vmem:[#allocation2 + $0x408] sm:$0xff] }
0x1110   :  { %v2116_v2 = vadd.f32 %v2115_v33, %v2110_v11  ;;  %6457 = vmatprep.subr.bf16.mxu0 %v6456_v9  ;;  %v6470_v33 = vpack.c.bf16 %v2275_v15, %v2274_v56  ;;  %v6496_v9 = vpack.c.bf16 %v2305_v8, %v2304_v7 }
0x1111   :  { %2134 = vrot.lane.b32.xlu1 %v7389_v59, %s6933_s0  ;;  %v2127_v14 = vrot.slane %v7389_v59, 1  ;;  %v2121_v41 = vrot.slane %v7389_v59, 7  ;;  %v2300_v59 = vld [vmem:[#allocation2 + $0x3b0] sm:$0xff] }
0x1112   :  { %2132 = vrot.lane.b32.xlu0 %v2116_v2, %s6933_s0  ;;  %v2126_v4 = vrot.slane %v2116_v2, 1  ;;  %v2120_v34 = vrot.slane %v2116_v2, 7  ;;  %v6488_v3 = vpack.c.bf16 %v2301_v13, %v2300_v59 }
0x1113   :  { %v2131_v21 = vsel %vm208_vm5, %v2127_v14, 0.0  ;;  %6459 = vmatpush3.bf16.msra.mxu0 %v6458_v16  ;;  %v2125_v60 = vsel %vm201_vm6, 0.0, %v2121_v41  ;;  %v2293_v16 = vld [vmem:[#allocation2 + $0x378] sm:$0xff] }
0x1114   :  { %v2130_v40 = vsel %vm208_vm5, %v2126_v4, 0.0  ;;  %6461 = vmatprep.subr.bf16.mxu0 %v6460_v19  ;;  %v2124_v43 = vsel %vm201_vm6, 0.0, %v2120_v34  ;;  %v2303_v4 = vld [vmem:[#allocation2 + $0x3c8] sm:$0xff]  ;;  %v2308_v19 = vld [vmem:[#allocation2 + $0x3f0] sm:$0xff] }
0x1115   :  { %2140 = vrot.lane.b32.xlu1 %v2130_v40, %s6934_s29  ;;  %v6492_v42 = vpack.c.bf16 %v2303_v4, %v2302_v44  ;;  %v2307_v40 = vld [vmem:[#allocation2 + $0x3e8] sm:$0xff] }
0x1116   :  { %v6500_v14 = vpack.c.bf16 %v2307_v40, %v2306_v5 }
0x1117   :  { %6463 = vmatpush3.bf16.msra.mxu0 %v6462_v22  ;;  %v2294_v22 = vld [vmem:[#allocation2 + $0x380] sm:$0xff] }
0x1118   :  { %6465 = vmatprep.subr.bf16.mxu0 %v6464_v27  ;;  %v6476_v25 = vpack.c.bf16 %v2295_v23, %v2294_v22  ;;  %v2278_v27 = vld [vmem:[#allocation2 + $0x300] sm:$0xff] }
0x1119   :  { %2142 = vrot.lane.b32.xlu1 %v2131_v21, %s6934_s29  ;;  %v2309_v21 = vld [vmem:[#allocation2 + $0x3f8] sm:$0xff]  ;;  %v6478_v17 = vpack.c.bf16 %v2279_v29, %v2278_v27 }
0x111a   :  { %v6504_v24 = vpack.c.bf16 %v2309_v21, %v2308_v19 }
0x111b   :  { %6467 = vmatpush3.bf16.msra.mxu0 %v6466_v47  ;;  %v2310_v47 = vld [vmem:[#allocation2 + $0x400] sm:$0xff] }
0x111c   :  { %6469 = vmatprep.subr.bf16.mxu0 %v6468_v54  ;;  %v6508_v56 = vpack.c.bf16 %v2311_v51, %v2310_v47  ;;  %v5359_v54 = vld [vmem:[#allocation2 + $0x288] ss:$0 sm:$0xff]  ;;  %v2500_v47 = vrot.slane %v7326_v32, %v7347_v26 }
0x111f   :  { %6471 = vmatpush3.bf16.msra.mxu0 %v6470_v33 }
0x1183   :  { %v2135_v35 = vpop.permute.xlu1 %2134 }
0x1184   :  { %v2133_v38 = vpop.permute.xlu0 %2132  ;;  %v2147_v12 = vsel %vm155_vm4, %v2125_v60, %v2135_v35 }
0x1185   :  { %v2146_v11 = vsel %vm155_vm4, %v2124_v43, %v2133_v38 }
0x1187   :  { %v2141_v49 = vpop.permute.xlu1 %2140 }
0x1188   :  { %v2148_v53 = vsel %vm227_vm7, %v2146_v11, %v2141_v49 }
0x1189   :  { %6013 = vmatprep.mubr.msk.f32.mxu1 %vm7875_vm8, %v2148_v53 }
0x118b   :  { %v2143_v63 = vpop.permute.xlu1 %2142 }
0x118c   :  { %v2149_v2 = vsel %vm227_vm7, %v2147_v12, %v2143_v63  ;;  %v5362_v12 = vld [vmem:[#allocation2 + $0x410] ss:$0 sm:$0xff] }
0x118d   :  { %6014 = vmatmul.mubr.msk.f32.vlgmr.msra.gmra.mrb[12].mxu1 %vm7875_vm8, %v2149_v2 }
0x118e   :  { %6483 = vmatpush3.bf16.msra.mxu1 %v7391_v62  ;;  %v2292_v62 = vld [vmem:[#allocation2 + $0x370] sm:$0xff] }
0x118f   :  { %6485 = vmatprep.subr.bf16.mxu1 %v6484_v0  ;;  %v6472_v18 = vpack.c.bf16 %v2293_v16, %v2292_v62 }
0x1191   :  { %6473 = vmatprep.subr.bf16.mxu0 %v6472_v18 }
0x1192   :  { %6487 = vmatpush3.bf16.msra.mxu1 %v6484_v0  ;;  %6475 = vmatpush3.bf16.msra.mxu0 %v6474_v6 }
0x1193   :  { %6489 = vmatprep.subr.bf16.mxu1 %v6488_v3  ;;  %6477 = vmatprep.subr.bf16.mxu0 %v6476_v25 }
0x1196   :  { %6491 = vmatpush3.bf16.msra.mxu1 %v6488_v3  ;;  %6479 = vmatpush3.bf16.msra.mxu0 %v6478_v17 }
0x1197   :  { %6493 = vmatprep.subr.bf16.mxu1 %v6492_v42 }
0x119a   :  { %6495 = vmatpush3.bf16.msra.mxu1 %v6492_v42 }
0x119b   :  { %6497 = vmatprep.subr.bf16.mxu1 %v6496_v9 }
0x119e   :  { %6499 = vmatpush3.bf16.msra.mxu1 %v6496_v9 }
0x119f   :  { %6501 = vmatprep.subr.bf16.mxu1 %v6500_v14 }
0x11a2   :  { %6503 = vmatpush3.bf16.msra.mxu1 %v6500_v14 }
0x11a3   :  { %6505 = vmatprep.subr.bf16.mxu1 %v6504_v24 }
0x11a6   :  { %6507 = vmatpush3.bf16.msra.mxu1 %v6504_v24 }
0x11a7   :  { %6509 = vmatprep.subr.bf16.mxu1 %v6508_v56 }
0x11aa   :  { %6511 = vmatpush3.bf16.msra.mxu1 %v6508_v56  ;;  %v2506_v56 = vrot.slane %v7330_v36, %v7347_v26 }
0x1260   :  { %v6015_v15 = vpop.f32.mrb[12].mxu1 }
0x1261   :  { %v2245_v33 = vadd.f32 %v6015_v15, %v5359_v54  ;;  %v2239_v34 = vpop.f32.mrb[13].mxu1 }
0x1262   :  { %v2240_v35 = vadd.f32 %v5359_v54, %v2239_v34 }
0x1263   :  { %v2249_v38 = vmax.f32 %v2245_v33, 0.0 }
0x1264   :  { %v2248_v41 = vmax.f32 %v2240_v35, 0.0 }
0x1265   :  { %v2259_v49 = vrot.slane %v2249_v38, 1  ;;  %v2253_v53 = vrot.slane %v2249_v38, 7 }
0x1266   :  { %v2252_v43 = vrot.slane %v2248_v41, 7  ;;  %v2258_v11 = vrot.slane %v2248_v41, 1  ;;  %2381 = vmatprep.mubr.f32.mxu0 %v2248_v41 }
0x1268   :  { %5364 = vmatmul.mubr.msk.f32.vlgmr.msra.gmra.mrb[24].mxu0 %vm7047_vm9, %v2252_v43  ;;  %6048 = vmatprep.mubr.msk.f32.mxu1 %vm208_vm5, %v2258_v11 }
0x1269   :  { %2386 = vmatprep.mubr.f32.mxu0 %v2249_v38  ;;  %6049 = vmatmul.mubr.msk.f32.vlgmr.msra.gmra.mrb[14].mxu1 %vm208_vm5, %v2259_v49 }
0x126c   :  { %5366 = vmatmul.mubr.msk.f32.gmra.mrb[26].mxu0 %vm7047_vm9, %v2253_v53 }
0x133b   :  { %v5602_v55 = vpop.f32.mrb[24].mxu0 }
0x133c   :  { %v5603_v57 = vpop.f32.mrb[25].mxu0  ;;  %v6050_v60 = vpop.f32.mrb[14].mxu1 }
0x133d   :  { %v5604_v63 = vadd.f32 %v5603_v57, %v5602_v55  ;;  %v2458_v0 = vpop.f32.mrb[15].mxu1 }
0x133f   :  { %v2384_v2 = vadd.f32 %v5604_v63, %v5362_v12  ;;  %v5605_v59 = vpop.f32.mrb[26].mxu0 }
0x1340   :  { %v5606_v13 = vpop.f32.mrb[27].mxu0 }
0x1341   :  { %v2459_v3 = vadd.f32 %v2458_v0, %v2384_v2  ;;  %v5607_v44 = vadd.f32 %v5606_v13, %v5605_v59  ;;  %v2581_v0 = vld [vmem:[#allocation2 + $0x540] sm:$0xff]  ;;  %v2582_v2 = vld [vmem:[#allocation2 + $0x548] sm:$0xff]  ;;  %v2583_v59 = vld [vmem:[#allocation2 + $0x550] sm:$0xff] }
0x1342   :  { %v6512_v13 = vpack.c.bf16 %v2582_v2, %v2581_v0 }
0x1343   :  { %v2467_v4 = vmul.f32 0.5, %v2459_v3  ;;  %v2389_v42 = vadd.f32 %v5607_v44, %v5362_v12  ;;  %v2584_v3 = vld [vmem:[#allocation2 + $0x558] sm:$0xff] }
0x1344   :  { %v6516_v44 = vpack.c.bf16 %v2584_v3, %v2583_v59  ;;  %6513 = vmatprep.subr.bf16.mxu1 %v6512_v13  ;;  %v2733_v59 = vld [vmem:[#allocation2 + $0x6d8] sm:$0xff] }
0x1345   :  { %v2464_v7 = vadd.f32 %v6050_v60, %v2389_v42  ;;  %v2469_v8 = vadd.f32 %v2467_v4, %v7375_v10  ;;  %v2585_v4 = vld [vmem:[#allocation2 + $0x560] sm:$0xff]  ;;  %v2586_v42 = vld [vmem:[#allocation2 + $0x568] sm:$0xff]  ;;  %6515 = vmatpush3.bf16.msra.mxu1 %v6512_v13 }
0x1346   :  { %6517 = vmatprep.subr.bf16.mxu1 %v6516_v44  ;;  %v2734_v13 = vld [vmem:[#allocation2 + $0x6e0] sm:$0xff] }
0x1347   :  { %v2471_v9 = vsel %vm155_vm4, %v2469_v8, 0.0  ;;  %v2468_v5 = vmul.f32 0.5, %v2464_v7  ;;  %v6520_v7 = vpack.c.bf16 %v2586_v42, %v2585_v4  ;;  %v6580_v3 = vpack.c.bf16 %v2734_v13, %v2733_v59  ;;  %v2736_v4 = vld [vmem:[#allocation2 + $0x6f0] sm:$0xff]  ;;  %v2722_v59 = vld [vmem:[#allocation2 + $0x680] sm:$0xff] }
0x1348   :  { %2472 = vadd.xlane.f32.xlu0 %v2471_v9 }
0x1349   :  { %v2470_v40 = vadd.f32 %v2468_v5, %v7373_v52  ;;  %6519 = vmatpush3.bf16.msra.mxu1 %v6516_v44  ;;  %v2735_v44 = vld [vmem:[#allocation2 + $0x6e8] sm:$0xff] }
0x134a   :  { %6521 = vmatprep.subr.bf16.mxu1 %v6520_v7  ;;  %v6584_v42 = vpack.c.bf16 %v2736_v4, %v2735_v44  ;;  %v2705_v44 = vld [vmem:[#allocation2 + $0x5f8] sm:$0xff]  ;;  %v2706_v4 = vld [vmem:[#allocation2 + $0x600] sm:$0xff] }
0x134b   :  { %v2474_v14 = vsel %vm155_vm4, %v2470_v40, 0.0 }
0x134c   :  { %2475 = vadd.xlane.f32.xlu1 %v2474_v14 }
0x134d   :  { %6523 = vmatpush3.bf16.msra.mxu1 %v6520_v7  ;;  %v2737_v7 = vld [vmem:[#allocation2 + $0x6f8] sm:$0xff] }
0x13d5   :  { %v2473_v62 = vpop.xlane.xlu0 %2472 }
0x13d6   :  { %v2477_v16 = vmul.f32 0.03125, %v2473_v62 }
0x13d8   :  { %v2479_v18 = vsub.f32 %v2469_v8, %v2477_v16  ;;  %v2587_v16 = vld [vmem:[#allocation2 + $0x570] sm:$0xff] }
0x13d9   :  { %v2476_v1 = vpop.xlane.xlu1 %2475 }
0x13da   :  { %v2478_v61 = vmul.f32 0.03125, %v2476_v1  ;;  %v2481_v19 = vmul.f32 %v2479_v18, %v2479_v18 }
0x13dc   :  { %v2480_v6 = vsub.f32 %v2470_v40, %v2478_v61  ;;  %v2483_v21 = vsel %vm155_vm4, %v2481_v19, 0.0  ;;  %v7440_v61 = vld [vmem:[#allocation2 + $0x530] sm:$0x1f]  ;;  %v2589_v19 = vld [vmem:[#allocation2 + $0x580] sm:$0xff] }
0x13dd   :  { %2484 = vadd.xlane.f32.xlu0 %v2483_v21  ;;  %v7442_v21 = vld [vmem:[#allocation2 + $0x538] sm:$0x1f] }
0x13de   :  { %v2482_v10 = vmul.f32 %v2480_v6, %v2480_v6 }
0x13e0   :  { %v2486_v22 = vsel %vm155_vm4, %v2482_v10, 0.0 }
0x13e1   :  { %2487 = vadd.xlane.f32.xlu0 %v2486_v22  ;;  %v2540_v22 = vrot.slane %v7440_v61, %v7008_v45 }
0x146a   :  { %v2485_v23 = vpop.xlane.xlu0 %2484 }
0x146b   :  { %v2489_v24 = vmul.f32 0.03125, %v2485_v23 }
0x146d   :  { %v2491_v52 = vadd.f32 1e-12, %v2489_v24 }
0x146e   :  { %v2488_v25 = vpop.xlane.xlu0 %2487 }
0x146f   :  { %6837 = vrsqrt.f32 %v2491_v52  ;;  %v2490_v27 = vmul.f32 0.03125, %v2488_v25  ;;  %v2546_v52 = vrot.slane %v7442_v21, %v7008_v45  ;;  %v2591_v25 = vld [vmem:[#allocation2 + $0x590] sm:$0xff] }
0x1471   :  { %v2492_v29 = vadd.f32 1e-12, %v2490_v27  ;;  %v2592_v27 = vld [vmem:[#allocation2 + $0x598] sm:$0xff] }
0x1473   :  { %6839 = vrsqrt.f32 %v2492_v29  ;;  %v6532_v29 = vpack.c.bf16 %v2592_v27, %v2591_v25 }
0x1479   :  { %v6838_v17 = vpop.eup %6837 }
0x147a   :  { %v2495_v51 = vmul.f32 %v6838_v17, %v2479_v18  ;;  %v2588_v18 = vld [vmem:[#allocation2 + $0x578] sm:$0xff] }
0x147b   :  { %v6524_v1 = vpack.c.bf16 %v2588_v18, %v2587_v16 }
0x147c   :  { %v2501_v54 = vmul.f32 %v2500_v47, %v2495_v51 }
0x147d   :  { %v6840_v15 = vpop.eup %6839  ;;  %6525 = vmatprep.subr.bf16.mxu1 %v6524_v1 }
0x147e   :  { %v7428_v33 = vadd.f32 %v2506_v56, %v2501_v54  ;;  %v2496_v34 = vmul.f32 %v6840_v15, %v2480_v6  ;;  %v2590_v6 = vld [vmem:[#allocation2 + $0x588] sm:$0xff]  ;;  %6527 = vmatpush3.bf16.msra.mxu1 %v6524_v1  ;;  %v2712_v15 = vld [vmem:[#allocation2 + $0x630] sm:$0xff] }
0x147f   :  { %v6528_v10 = vpack.c.bf16 %v2590_v6, %v2589_v19  ;;  %v2711_v54 = vld [vmem:[#allocation2 + $0x628] sm:$0xff] }
0x1480   :  { %v2511_v35 = vsel %vm155_vm4, %v7428_v33, 0.0  ;;  %v2502_v38 = vmul.f32 %v2500_v47, %v2496_v34  ;;  %v2695_v6 = vld [vmem:[#allocation2 + $0x5a8] sm:$0xff] }
0x1481   :  { %2512 = vadd.xlane.f32.xlu0 %v2511_v35  ;;  %6529 = vmatprep.subr.bf16.mxu1 %v6528_v10 }
0x1482   :  { %v7432_v41 = vadd.f32 %v2506_v56, %v2502_v38  ;;  %6531 = vmatpush3.bf16.msra.mxu1 %v6528_v10  ;;  %v6536_v38 = vpack.c.bf16 %v2712_v15, %v2711_v54  ;;  %v2696_v10 = vld [vmem:[#allocation2 + $0x5b0] sm:$0xff] }
0x1483   :  { %6533 = vmatprep.subr.bf16.mxu1 %v6532_v29  ;;  %v2716_v54 = vld [vmem:[#allocation2 + $0x650] sm:$0xff] }
0x1484   :  { %v2514_v32 = vsel %vm155_vm4, %v7432_v41, 0.0 }
0x1485   :  { %2515 = vadd.xlane.f32.xlu1 %v2514_v32  ;;  %v2727_v32 = vld [vmem:[#allocation2 + $0x6a8] sm:$0xff] }
0x1486   :  { %6535 = vmatpush3.bf16.msra.mxu1 %v6532_v29 }
0x1487   :  { %6537 = vmatprep.subr.bf16.mxu1 %v6536_v38  ;;  %v2700_v38 = vld [vmem:[#allocation2 + $0x5d0] sm:$0xff] }
0x150e   :  { %v2513_v43 = vpop.xlane.xlu0 %2512 }
0x150f   :  { %v2517_v11 = vmul.f32 0.03125, %v2513_v43  ;;  %v2728_v43 = vld [vmem:[#allocation2 + $0x6b0] sm:$0xff] }
0x1511   :  { %v2519_v36 = vsub.f32 %v7428_v33, %v2517_v11  ;;  %v6568_v11 = vpack.c.bf16 %v2728_v43, %v2727_v32  ;;  %v2717_v32 = vld [vmem:[#allocation2 + $0x658] sm:$0xff]  ;;  %v2718_v43 = vld [vmem:[#allocation2 + $0x660] sm:$0xff] }
0x1512   :  { %v2516_v49 = vpop.xlane.xlu1 %2515 }
0x1513   :  { %v2518_v53 = vmul.f32 0.03125, %v2516_v49  ;;  %v2521_v55 = vmul.f32 %v2519_v36, %v2519_v36  ;;  %6569 = vmatprep.subr.bf16.mxu0 %v6568_v11 }
0x1514   :  { %6571 = vmatpush3.bf16.msra.mxu0 %v6568_v11 }
0x1515   :  { %v2520_v57 = vsub.f32 %v7432_v41, %v2518_v53  ;;  %v2523_v60 = vsel %vm155_vm4, %v2521_v55, 0.0  ;;  %v2729_v53 = vld [vmem:[#allocation2 + $0x6b8] sm:$0xff]  ;;  %v2730_v55 = vld [vmem:[#allocation2 + $0x6c0] sm:$0xff] }
0x1516   :  { %2524 = vadd.xlane.f32.xlu0 %v2523_v60 }
0x1517   :  { %v2522_v12 = vmul.f32 %v2520_v57, %v2520_v57 }
0x1519   :  { %v2526_v63 = vsel %vm155_vm4, %v2522_v12, 0.0  ;;  %v2731_v12 = vld [vmem:[#allocation2 + $0x6c8] sm:$0xff] }
0x151a   :  { %2527 = vadd.xlane.f32.xlu1 %v2526_v63  ;;  %v2732_v63 = vld [vmem:[#allocation2 + $0x6d0] sm:$0xff] }
0x151b   :  { %v6576_v0 = vpack.c.bf16 %v2732_v63, %v2731_v12  ;;  %v2703_v63 = vld [vmem:[#allocation2 + $0x5e8] sm:$0xff] }
0x15a3   :  { %v2525_v8 = vpop.xlane.xlu0 %2524 }
0x15a4   :  { %v2529_v9 = vmul.f32 0.03125, %v2525_v8  ;;  %v2738_v8 = vld [vmem:[#allocation2 + $0x700] sm:$0xff] }
0x15a6   :  { %v2531_v5 = vadd.f32 1e-12, %v2529_v9  ;;  %v6588_v9 = vpack.c.bf16 %v2738_v8, %v2737_v7  ;;  %v2723_v7 = vld [vmem:[#allocation2 + $0x688] sm:$0xff]  ;;  %v2724_v8 = vld [vmem:[#allocation2 + $0x690] sm:$0xff] }
0x15a7   :  { %v2528_v40 = vpop.xlane.xlu1 %2527 }
0x15a8   :  { %6841 = vrsqrt.f32 %v2531_v5  ;;  %v2530_v14 = vmul.f32 0.03125, %v2528_v40 }
0x15aa   :  { %v2532_v62 = vadd.f32 1e-12, %v2530_v14 }
0x15ac   :  { %6843 = vrsqrt.f32 %v2532_v62 }
0x15b2   :  { %v6842_v23 = vpop.eup %6841 }
0x15b3   :  { %v2535_v24 = vmul.f32 %v6842_v23, %v2519_v36  ;;  %v2714_v23 = vld [vmem:[#allocation2 + $0x640] sm:$0xff] }
0x15b5   :  { %v2541_v47 = vmul.f32 %v2540_v22, %v2535_v24 }
0x15b6   :  { %v6844_v17 = vpop.eup %6843 }
0x15b7   :  { %v2547_v51 = vadd.f32 %v2546_v52, %v2541_v47  ;;  %v2536_v56 = vmul.f32 %v6844_v17, %v2520_v57  ;;  %v6572_v57 = vpack.c.bf16 %v2730_v55, %v2729_v53  ;;  %v2697_v47 = vld [vmem:[#allocation2 + $0x5b8] sm:$0xff]  ;;  %v2698_v17 = vld [vmem:[#allocation2 + $0x5c0] sm:$0xff]  ;;  %v2719_v55 = vld [vmem:[#allocation2 + $0x668] sm:$0xff] }
0x15b8   :  { %v6542_v15 = vpack.c.bf16 %v2698_v17, %v2697_v47  ;;  %v2702_v53 = vld [vmem:[#allocation2 + $0x5e0] sm:$0xff] }
0x15b9   :  { %2563 = vrot.lane.b32.xlu0 %v2547_v51, %s6933_s0  ;;  %v2557_v34 = vrot.slane %v2547_v51, 1  ;;  %v2542_v35 = vmul.f32 %v2540_v22, %v2536_v56  ;;  %6573 = vmatprep.subr.bf16.mxu0 %v6572_v57  ;;  %v2551_v5 = vrot.slane %v2547_v51, 7  ;;  %v2713_v22 = vld [vmem:[#allocation2 + $0x638] sm:$0xff]  ;;  %v2715_v56 = vld [vmem:[#allocation2 + $0x648] sm:$0xff] }
0x15ba   :  { %6575 = vmatpush3.bf16.msra.mxu0 %v6572_v57  ;;  %v6540_v29 = vpack.c.bf16 %v2714_v23, %v2713_v22  ;;  %v2720_v57 = vld [vmem:[#allocation2 + $0x670] sm:$0xff]  ;;  %v2710_v22 = vld [vmem:[#allocation2 + $0x620] sm:$0xff]  ;;  %v2741_v23 = vld [vmem:[#allocation2 + $0x718] sm:$0xff] }
0x15bb   :  { %v2561_v36 = vsel %vm208_vm5, %v2557_v34, 0.0  ;;  %v2548_v49 = vadd.f32 %v2546_v52, %v2542_v35  ;;  %6577 = vmatprep.subr.bf16.mxu0 %v6576_v0  ;;  %v2555_v14 = vsel %vm201_vm6, 0.0, %v2551_v5  ;;  %v6538_v52 = vpack.c.bf16 %v2696_v10, %v2695_v6  ;;  %v2699_v35 = vld [vmem:[#allocation2 + $0x5c8] sm:$0xff]  ;;  %v2709_v10 = vld [vmem:[#allocation2 + $0x618] sm:$0xff] }
0x15bc   :  { %2571 = vrot.lane.b32.xlu1 %v2561_v36, %s6934_s29  ;;  %v6544_v34 = vpack.c.bf16 %v2716_v54, %v2715_v56  ;;  %v6546_v11 = vpack.c.bf16 %v2700_v38, %v2699_v35  ;;  %v6548_v36 = vpack.c.bf16 %v2718_v43, %v2717_v32  ;;  %v6552_v12 = vpack.c.bf16 %v2720_v57, %v2719_v55  ;;  %v2707_v5 = vld [vmem:[#allocation2 + $0x608] sm:$0xff] }
0x15bd   :  { %v2558_v60 = vrot.slane %v2548_v49, 1  ;;  %v2552_v1 = vrot.slane %v2548_v49, 7 }
0x15be   :  { %6579 = vmatpush3.bf16.msra.mxu0 %v6576_v0  ;;  %v2704_v0 = vld [vmem:[#allocation2 + $0x5f0] sm:$0xff] }
0x15bf   :  { %v2562_v2 = vsel %vm208_vm5, %v2558_v60, 0.0  ;;  %6581 = vmatprep.subr.bf16.mxu0 %v6580_v3  ;;  %v2556_v24 = vsel %vm201_vm6, 0.0, %v2552_v1  ;;  %v6554_v13 = vpack.c.bf16 %v2704_v0, %v2703_v63  ;;  %v2726_v1 = vld [vmem:[#allocation2 + $0x6a0] sm:$0xff] }
0x15c0   :  { %2565 = vrot.lane.b32.xlu1 %v2548_v49, %s6933_s0  ;;  %v2701_v49 = vld [vmem:[#allocation2 + $0x5d8] sm:$0xff] }
0x15c1   :  { %v6550_v60 = vpack.c.bf16 %v2702_v53, %v2701_v49 }
0x15c2   :  { %6583 = vmatpush3.bf16.msra.mxu0 %v6580_v3 }
0x15c3   :  { %6585 = vmatprep.subr.bf16.mxu0 %v6584_v42 }
0x15c4   :  { %2573 = vrot.lane.b32.xlu1 %v2562_v2, %s6934_s29  ;;  %v2721_v2 = vld [vmem:[#allocation2 + $0x678] sm:$0xff] }
0x15c5   :  { %v6556_v3 = vpack.c.bf16 %v2722_v59, %v2721_v2 }
0x15c6   :  { %6587 = vmatpush3.bf16.msra.mxu0 %v6584_v42  ;;  %v6558_v42 = vpack.c.bf16 %v2706_v4, %v2705_v44 }
0x15c7   :  { %6589 = vmatprep.subr.bf16.mxu0 %v6588_v9 }
0x15ca   :  { %6591 = vmatpush3.bf16.msra.mxu0 %v6588_v9  ;;  %v6560_v9 = vpack.c.bf16 %v2724_v8, %v2723_v7 }
0x162b   :  { %v2564_v40 = vpop.permute.xlu0 %2563 }
0x162c   :  { %v2577_v62 = vsel %vm155_vm4, %v2555_v14, %v2564_v40  ;;  %v2708_v40 = vld [vmem:[#allocation2 + $0x610] sm:$0xff]  ;;  %v2739_v14 = vld [vmem:[#allocation2 + $0x708] sm:$0xff] }
0x162e   :  { %v2572_v16 = vpop.permute.xlu1 %2571 }
0x162f   :  { %v2579_v18 = vsel %vm227_vm7, %v2577_v62, %v2572_v16  ;;  %v6562_v62 = vpack.c.bf16 %v2708_v40, %v2707_v5  ;;  %v2740_v16 = vld [vmem:[#allocation2 + $0x710] sm:$0xff] }
0x1630   :  { %6075 = vmatprep.mubr.msk.f32.mxu1 %vm7875_vm8, %v2579_v18  ;;  %v2725_v18 = vld [vmem:[#allocation2 + $0x698] sm:$0xff] }
0x1631   :  { %v6564_v6 = vpack.c.bf16 %v2726_v1, %v2725_v18  ;;  %v2940_v18 = vld [vmem:[#allocation2 + $0x920] sm:$0xff]  ;;  %v2941_v1 = vld [vmem:[#allocation2 + $0x928] sm:$0xff] }
0x1632   :  { %v2566_v19 = vpop.permute.xlu1 %2565 }
0x1633   :  { %v2578_v25 = vsel %vm155_vm4, %v2556_v24, %v2566_v19  ;;  %v6592_v19 = vpack.c.bf16 %v2740_v16, %v2739_v14  ;;  %v6566_v24 = vpack.c.bf16 %v2710_v22, %v2709_v10  ;;  %v2943_v10 = vld [vmem:[#allocation2 + $0x938] sm:$0xff] }
0x1635   :  { %6593 = vmatprep.subr.bf16.mxu0 %v6592_v19 }
0x1636   :  { %v2574_v27 = vpop.permute.xlu1 %2573  ;;  %6595 = vmatpush3.bf16.msra.mxu0 %v6592_v19  ;;  %v2942_v19 = vld [vmem:[#allocation2 + $0x930] sm:$0xff] }
0x1637   :  { %v2580_v51 = vsel %vm227_vm7, %v2578_v25, %v2574_v27  ;;  %v5369_v27 = vld [vmem:[#allocation2 + $0x5a0] ss:$0 sm:$0xff]  ;;  %v6604_v22 = vpack.c.bf16 %v2943_v10, %v2942_v19 }
0x1638   :  { %6076 = vmatmul.mubr.msk.f32.vlgmr.msra.gmra.mrb[16].mxu1 %vm7875_vm8, %v2580_v51  ;;  %vm7883_vm8 = vmmov %vm7882_vm2 }
0x1639   :  { %6539 = vmatpush3.bf16.msra.mxu1 %v6538_v52  ;;  %v2742_v52 = vld [vmem:[#allocation2 + $0x720] sm:$0xff] }
0x163a   :  { %6541 = vmatprep.subr.bf16.mxu1 %v6540_v29  ;;  %v6596_v25 = vpack.c.bf16 %v2742_v52, %v2741_v23  ;;  %v3037_v23 = vld [vmem:[#allocation2 + $0x948] sm:$0xff] }
0x163c   :  { %6597 = vmatprep.subr.bf16.mxu0 %v6596_v25 }
0x163d   :  { %6543 = vmatpush3.bf16.msra.mxu1 %v6542_v15  ;;  %6599 = vmatpush3.bf16.msra.mxu0 %v6596_v25 }
0x163e   :  { %6545 = vmatprep.subr.bf16.mxu1 %v6544_v34 }
0x1641   :  { %6547 = vmatpush3.bf16.msra.mxu1 %v6546_v11 }
0x1642   :  { %6549 = vmatprep.subr.bf16.mxu1 %v6548_v36  ;;  %v5372_v36 = vld [vmem:[#allocation2 + $0x728] ss:$0 sm:$0xff] }
0x1645   :  { %6551 = vmatpush3.bf16.msra.mxu1 %v6550_v60 }
0x1646   :  { %6553 = vmatprep.subr.bf16.mxu1 %v6552_v12 }
0x1649   :  { %6555 = vmatpush3.bf16.msra.mxu1 %v6554_v13 }
0x164a   :  { %6557 = vmatprep.subr.bf16.mxu1 %v6556_v3 }
0x164d   :  { %6559 = vmatpush3.bf16.msra.mxu1 %v6558_v42 }
0x164e   :  { %6561 = vmatprep.subr.bf16.mxu1 %v6560_v9 }
0x1651   :  { %6563 = vmatpush3.bf16.msra.mxu1 %v6562_v62 }
0x1652   :  { %6565 = vmatprep.subr.bf16.mxu1 %v6564_v6  ;;  %v6600_v6 = vpack.c.bf16 %v2941_v1, %v2940_v18 }
0x1655   :  { %6567 = vmatpush3.bf16.msra.mxu1 %v6566_v24  ;;  %v3038_v24 = vld [vmem:[#allocation2 + $0x950] sm:$0xff] }
0x1656   :  { %6601 = vmatprep.subr.bf16.mxu1 %v6600_v6  ;;  %v6608_v52 = vpack.c.bf16 %v3038_v24, %v3037_v23 }
0x1658   :  { %6609 = vmatprep.subr.bf16.mxu0 %v6608_v52 }
0x170b   :  { %v6077_v29 = vpop.f32.mrb[16].mxu1 }
0x170c   :  { %v2676_v47 = vadd.f32 %v6077_v29, %v5369_v27  ;;  %v2670_v17 = vpop.f32.mrb[17].mxu1 }
0x170d   :  { %v2671_v51 = vadd.f32 %v5369_v27, %v2670_v17 }
0x170e   :  { %v2680_v56 = vmax.f32 %v2676_v47, 0.0 }
0x170f   :  { %v2679_v54 = vmax.f32 %v2671_v51, 0.0 }
0x1710   :  { %v2690_v35 = vrot.slane %v2680_v56, 1  ;;  %v2684_v38 = vrot.slane %v2680_v56, 7 }
0x1711   :  { %v2683_v15 = vrot.slane %v2679_v54, 7  ;;  %v2689_v34 = vrot.slane %v2679_v54, 1  ;;  %2812 = vmatprep.mubr.f32.mxu1 %v2679_v54 }
0x1713   :  { %5374 = vmatmul.mubr.msk.f32.vlgmr.msra.gmra.mrb[18].mxu1 %vm7047_vm9, %v2683_v15  ;;  %6110 = vmatprep.mubr.msk.f32.mxu0 %vm208_vm5, %v2689_v34  ;;  %v2937_v34 = vrot.slane %v7442_v21, %v7072_v28  ;;  %v5379_v21 = vld [vmem:[#allocation2 + $0x940] ss:$0 sm:$0xff] }
0x1714   :  { %2817 = vmatprep.mubr.f32.mxu1 %v2680_v56  ;;  %6111 = vmatmul.mubr.msk.f32.vlgmr.msra.gmra.mrb[28].mxu0 %vm208_vm5, %v2690_v35  ;;  %v2931_v56 = vrot.slane %v7440_v61, %v7072_v28  ;;  %v3040_v61 = vld [vmem:[#allocation2 + $0x960] sm:$0xff] }
0x1715   :  { %6603 = vmatpush3.bf16.msra.mxu1 %v6600_v6  ;;  %6611 = vmatpush3.bf16.msra.mxu0 %v6608_v52 }
0x1716   :  { %6605 = vmatprep.subr.bf16.mxu1 %v6604_v22 }
0x1717   :  { %5376 = vmatmul.mubr.msk.f32.gmra.mrb[20].mxu1 %vm7047_vm9, %v2684_v38 }
0x1719   :  { %6607 = vmatpush3.bf16.msra.mxu1 %v6604_v22 }
0x171a   :  { %6135 = vmatprep.subr.mxu1 %v6935_v46 }
0x17e6   :  { %v5672_v32 = vpop.f32.mrb[18].mxu1 }
0x17e7   :  { %v5673_v43 = vpop.f32.mrb[19].mxu1  ;;  %v6112_v11 = vpop.f32.mrb[28].mxu0 }
0x17e8   :  { %v5674_v49 = vadd.f32 %v5673_v43, %v5672_v32  ;;  %v2889_v53 = vpop.f32.mrb[29].mxu0 }
0x17ea   :  { %v2815_v55 = vadd.f32 %v5674_v49, %v5372_v36  ;;  %v5675_v57 = vpop.f32.mrb[20].mxu1  ;;  %v3039_v49 = vld [vmem:[#allocation2 + $0x958] sm:$0xff] }
0x17eb   :  { %v5676_v60 = vpop.f32.mrb[21].mxu1 }
0x17ec   :  { %v2890_v12 = vadd.f32 %v2889_v53, %v2815_v55  ;;  %v5677_v63 = vadd.f32 %v5676_v60, %v5675_v57  ;;  %v6612_v53 = vpack.c.bf16 %v3040_v61, %v3039_v49 }
0x17ee   :  { %v2898_v0 = vmul.f32 0.5, %v2890_v12  ;;  %v2820_v2 = vadd.f32 %v5677_v63, %v5372_v36  ;;  %6613 = vmatprep.subr.bf16.mxu0 %v6612_v53  ;;  %v5382_v12 = vld [vmem:[#allocation2 + $0x970] ss:$0 sm:$0xff] }
0x17ef   :  { %6615 = vmatpush3.bf16.msra.mxu0 %v6612_v53 }
0x17f0   :  { %v7469_v59 = vadd.f32 %v2898_v0, %v7428_v33  ;;  %v2895_v13 = vadd.f32 %v6112_v11, %v2820_v2  ;;  %6145 = vmatprep.subr.mxu0 %v6935_v46 }
0x17f2   :  { %v2899_v3 = vmul.f32 0.5, %v2895_v13  ;;  %v2902_v44 = vsel %vm155_vm4, %v7469_v59, 0.0 }
0x17f3   :  { %2903 = vadd.xlane.f32.xlu0 %v2902_v44 }
0x17f4   :  { %v7474_v4 = vadd.f32 %v2899_v3, %v7432_v41  ;;  %v5385_v3 = vld [vmem:[#allocation2 + $0x968] ss:$0 sm:$0xff] }
0x17f6   :  { %v2905_v42 = vsel %vm155_vm4, %v7474_v4, 0.0 }
0x17f7   :  { %2906 = vadd.xlane.f32.xlu1 %v2905_v42 }
0x1880   :  { %v2904_v7 = vpop.xlane.xlu0 %2903 }
0x1881   :  { %v2908_v8 = vmul.f32 0.03125, %v2904_v7 }
0x1883   :  { %v2910_v9 = vsub.f32 %v7469_v59, %v2908_v8 }
0x1884   :  { %v2907_v5 = vpop.xlane.xlu1 %2906 }
0x1885   :  { %v2909_v33 = vmul.f32 0.03125, %v2907_v5  ;;  %v2912_v40 = vmul.f32 %v2910_v9, %v2910_v9 }
0x1887   :  { %v2911_v14 = vsub.f32 %v7474_v4, %v2909_v33  ;;  %v2914_v62 = vsel %vm155_vm4, %v2912_v40, 0.0 }
0x1888   :  { %2915 = vadd.xlane.f32.xlu0 %v2914_v62 }
0x1889   :  { %v2913_v16 = vmul.f32 %v2911_v14, %v2911_v14 }
0x188b   :  { %v2917_v41 = vsel %vm155_vm4, %v2913_v16, 0.0 }
0x188c   :  { %2918 = vadd.xlane.f32.xlu0 %v2917_v41 }
0x1915   :  { %v2916_v25 = vpop.xlane.xlu0 %2915 }
0x1916   :  { %v2920_v27 = vmul.f32 0.03125, %v2916_v25 }
0x1918   :  { %v2922_v29 = vadd.f32 1e-12, %v2920_v27 }
0x1919   :  { %v2919_v47 = vpop.xlane.xlu0 %2918 }
0x191a   :  { %6845 = vrsqrt.f32 %v2922_v29  ;;  %v2921_v17 = vmul.f32 0.03125, %v2919_v47 }
0x191c   :  { %v2923_v51 = vadd.f32 1e-12, %v2921_v17 }
0x191e   :  { %6847 = vrsqrt.f32 %v2923_v51 }
0x1924   :  { %v6846_v54 = vpop.eup %6845 }
0x1925   :  { %v2926_v15 = vmul.f32 %v6846_v54, %v2910_v9 }
0x1927   :  { %v2932_v35 = vmul.f32 %v2931_v56, %v2926_v15 }
0x1928   :  { %v6848_v38 = vpop.eup %6847 }
0x1929   :  { %v2927_v32 = vmul.f32 %v6848_v38, %v2911_v14  ;;  %v2938_v43 = vadd.f32 %v2937_v34, %v2932_v35 }
0x192b   :  { %v2933_v11 = vmul.f32 %v2931_v56, %v2927_v32  ;;  %6121 = vmatprep.mubr.msk.f32.mxu1 %vm155_vm4, %v2938_v43 }
0x192d   :  { %v2939_v36 = vadd.f32 %v2937_v34, %v2933_v11 }
0x192f   :  { %6122 = vmatmul.mubr.msk.f32.vlgmr.msra.gmra.mrb[22].mxu1 %vm155_vm4, %v2939_v36 }
0x1930   :  { %6137 = vmatprep.mubr.msk.f32.mxu1 %vm6936_vm10, %v6935_v46 }
0x1a02   :  { %v6123_v55 = vpop.f32.mrb[22].mxu1 }
0x1a03   :  { %v7492_v57 = vadd.f32 %v6123_v55, %v5379_v21  ;;  %v3021_v60 = vpop.f32.mrb[23].mxu1 }
0x1a04   :  { %v7494_v63 = vadd.f32 %v5379_v21, %v3021_v60 }
0x1a05   :  { %3259 = vrot.lane.b32.xlu1 %v7492_v57, %s6937_s30  ;;  %v3036_v2 = vadd.f32 %v5382_v12, %v7492_v57  ;;  %v3248_v42 = vadd.f32 %v5385_v3, %v7492_v57 }
0x1a06   :  { %3257 = vrot.lane.b32.xlu0 %v7494_v63, %s6937_s30  ;;  %v3035_v0 = vadd.f32 %v5382_v12, %v7494_v63  ;;  %v3247_v8 = vadd.f32 %v5385_v3, %v7494_v63 }
0x1a08   :  { %6132 = vmatprep.mubr.msk.f32.mxu0 %vm155_vm4, %v3035_v0 }
0x1a09   :  { %3261 = vrot.lane.b32.xlu1 %v7494_v63, %s6938_s4  ;;  %6133 = vmatmul.mubr.msk.f32.vlgmr.msra.gmra.mrb[30].mxu0 %vm155_vm4, %v3036_v2 }
0x1a0a   :  { %6147 = vmatprep.mubr.msk.f32.mxu0 %vm6936_vm10, %v6935_v46 }
0x1a0d   :  { %3341 = vrot.lane.b32.xlu1 %v7492_v57, %s6938_s4 }
0x1a77   :  { %v7510_v13 = vpop.permute.xlu1 %3259 }
0x1a78   :  { %3501 = vrot.lane.b32.xlu1 %v7510_v13, %s6938_s4  ;;  %v7514_v44 = vpop.permute.xlu0 %3257 }
0x1a79   :  { %3421 = vrot.lane.b32.xlu0 %v7514_v44, %s6938_s4 }
0x1a7b   :  { %v3262_v7 = vpop.permute.xlu1 %3261 }
0x1a7c   :  { %3253 = vrot.lane.b32.xlu1 %v3248_v42, %s6937_s30  ;;  %6136 = vmatpush3.xpose.msk.msra.mxu1 %vm921_vm11, %v3262_v7 }
0x1a7d   :  { %3251 = vrot.lane.b32.xlu0 %v3247_v8, %s6937_s30  ;;  %6140 = vmatprep.subr.mxu1 %v6935_v46 }
0x1a7f   :  { %v3342_v9 = vpop.permute.xlu1 %3341  ;;  %6138 = vmatmul.mubr.msk.f32.vlgmr.msra.gmra.mrb[24].mxu1 %vm921_vm11, %v3247_v8 }
0x1a80   :  { %6141 = vmatpush3.xpose.msk.msra.mxu1 %vm921_vm11, %v3342_v9  ;;  %6142 = vmatprep.mubr.msk.f32.mxu1 %vm6936_vm10, %v6935_v46 }
0x1a81   :  { %6150 = vmatprep.subr.mxu1 %v6935_v46 }
0x1a83   :  { %6143 = vmatmul.mubr.msk.f32.vlgmr.msra.gmra.mrb[26].mxu1 %vm921_vm11, %v3248_v42 }
0x1a84   :  { %6152 = vmatprep.mubr.msk.f32.mxu1 %vm6936_vm10, %v6935_v46 }
0x1adc   :  { %v6134_v5 = vpop.f32.mrb[30].mxu0 }
0x1add   :  { %3126 = vrot.lane.b32.xlu1 %v6134_v5, %s6939_s5  ;;  %v7533_v33 = vpop.f32.mrb[31].mxu0 }
0x1ade   :  { %3124 = vrot.lane.b32.xlu0 %v7533_v33, %s6939_s5 }
0x1ae1   :  { %3132 = vrot.lane.b32.xlu1 %v6134_v5, %s6940_s6 }
0x1ae2   :  { %3168 = vrot.lane.b32.xlu0 %v6134_v5, %s6941_s7 }
0x1ae5   :  { %3144 = vrot.lane.b32.xlu1 %v6134_v5, %s6942_s8 }
0x1ae6   :  { %3180 = vrot.lane.b32.xlu0 %v6134_v5, %s6943_s9 }
0x1ae9   :  { %3156 = vrot.lane.b32.xlu1 %v6134_v5, %s6944_s10 }
0x1aea   :  { %v3502_v40 = vpop.permute.xlu1 %3501  ;;  %3192 = vrot.lane.b32.xlu0 %v6134_v5, %s6945_s11 }
0x1aeb   :  { %v3422_v14 = vpop.permute.xlu0 %3421  ;;  %6151 = vmatpush3.xpose.msk.msra.mxu1 %vm921_vm11, %v3502_v40 }
0x1aec   :  { %6146 = vmatpush3.xpose.msk.msra.mxu0 %vm921_vm11, %v3422_v14  ;;  %6160 = vmatprep.subr.mxu1 %v6935_v46 }
0x1aed   :  { %3178 = vrot.lane.b32.xlu1 %v7533_v33, %s6943_s9  ;;  %6155 = vmatprep.subr.mxu0 %v6935_v46 }
0x1aee   :  { %v3254_v62 = vpop.permute.xlu1 %3253  ;;  %3204 = vrot.lane.b32.xlu0 %v6134_v5, %s6946_s12 }
0x1aef   :  { %v3252_v16 = vpop.permute.xlu0 %3251  ;;  %6153 = vmatmul.mubr.msk.f32.vlgmr.msra.gmra.mrb[28].mxu1 %vm921_vm11, %v3254_v62 }
0x1af0   :  { %6148 = vmatmul.mubr.msk.f32.vlgmr.msra.gmra.mrb[32].mxu0 %vm921_vm11, %v3252_v16  ;;  %6162 = vmatprep.mubr.msk.f32.mxu1 %vm6936_vm10, %v6935_v46 }
0x1af1   :  { %3190 = vrot.lane.b32.xlu1 %v7533_v33, %s6945_s11  ;;  %6157 = vmatprep.mubr.msk.f32.mxu0 %vm6936_vm10, %v6935_v46 }
0x1af2   :  { %3130 = vrot.lane.b32.xlu0 %v7533_v33, %s6940_s6 }
0x1af5   :  { %3202 = vrot.lane.b32.xlu1 %v7533_v33, %s6946_s12 }
0x1af6   :  { %3142 = vrot.lane.b32.xlu0 %v7533_v33, %s6942_s8 }
0x1afa   :  { %3154 = vrot.lane.b32.xlu0 %v7533_v33, %s6944_s10 }
0x1afe   :  { %3166 = vrot.lane.b32.xlu0 %v7533_v33, %s6941_s7 }
0x1b4f   :  { %v7568_v41 = vpop.permute.xlu1 %3126 }
0x1b50   :  { %3172 = vrot.lane.b32.xlu1 %v7568_v41, %s6941_s7  ;;  %3136 = vrot.lane.b32.xlu0 %v7568_v41, %s6940_s6  ;;  %v7574_v18 = vpop.permute.xlu0 %3124 }
0x1b52   :  { %v7576_v1 = vpop.f32.mrb[24].mxu1 }
0x1b53   :  { %v6139_v19 = vpop.f32.mrb[25].mxu1  ;;  %v3133_v6 = vpop.permute.xlu1 %3132 }
0x1b54   :  { %3184 = vrot.lane.b32.xlu1 %v7568_v41, %s6943_s9  ;;  %3148 = vrot.lane.b32.xlu0 %v7568_v41, %s6942_s8  ;;  %v3169_v10 = vpop.permute.xlu0 %3168  ;;  %v3215_v47 = vsel %vm201_vm6, %v6134_v5, %v3133_v6 }
0x1b56   :  { %v7582_v22 = vpop.f32.mrb[26].mxu1 }
0x1b57   :  { %v6144_v23 = vpop.f32.mrb[27].mxu1  ;;  %v3145_v52 = vpop.permute.xlu1 %3144 }
0x1b58   :  { %3196 = vrot.lane.b32.xlu1 %v7568_v41, %s6945_s11  ;;  %3160 = vrot.lane.b32.xlu0 %v7568_v41, %s6944_s10  ;;  %v3181_v24 = vpop.permute.xlu0 %3180  ;;  %v3219_v17 = vsel %vm868_vm12, %v3215_v47, %v3145_v52 }
0x1b5b   :  { %v3157_v27 = vpop.permute.xlu1 %3156 }
0x1b5c   :  { %3182 = vrot.lane.b32.xlu0 %v7574_v18, %s6943_s9  ;;  %3134 = vrot.lane.b32.xlu1 %v7574_v18, %s6940_s6  ;;  %v3193_v25 = vpop.permute.xlu0 %3192  ;;  %v3223_v51 = vsel %vm873_vm13, %v3219_v17, %v3157_v27 }
0x1b5d   :  { %v3227_v54 = vsel %vm74_vm0, %v3223_v51, %v3169_v10 }
0x1b5e   :  { %v3231_v35 = vsel %vm882_vm14, %v3227_v54, %v3181_v24 }
0x1b5f   :  { %v3179_v15 = vpop.permute.xlu1 %3178  ;;  %v3235_v38 = vsel %vm7882_vm2, %v3231_v35, %v3193_v25 }
0x1b60   :  { %3194 = vrot.lane.b32.xlu0 %v7574_v18, %s6945_s11  ;;  %3146 = vrot.lane.b32.xlu1 %v7574_v18, %s6942_s8  ;;  %v3205_v29 = vpop.permute.xlu0 %3204 }
0x1b61   :  { %v3239_v36 = vsel %vm208_vm5, %v3235_v38, %v3205_v29 }
0x1b63   :  { %v3191_v43 = vpop.permute.xlu1 %3190 }
0x1b64   :  { %3206 = vrot.lane.b32.xlu0 %v7574_v18, %s6946_s12  ;;  %3158 = vrot.lane.b32.xlu1 %v7574_v18, %s6944_s10  ;;  %v3131_v56 = vpop.permute.xlu0 %3130 }
0x1b65   :  { %v3214_v11 = vsel %vm201_vm6, %v7533_v33, %v3131_v56 }
0x1b67   :  { %v3203_v60 = vpop.permute.xlu1 %3202 }
0x1b68   :  { %3170 = vrot.lane.b32.xlu1 %v7574_v18, %s6941_s7  ;;  %v3143_v34 = vpop.permute.xlu0 %3142 }
0x1b69   :  { %v3218_v49 = vsel %vm868_vm12, %v3214_v11, %v3143_v34 }
0x1b6c   :  { %3208 = vrot.lane.b32.xlu1 %v7568_v41, %s6946_s12  ;;  %v3155_v32 = vpop.permute.xlu0 %3154 }
0x1b6d   :  { %v3222_v61 = vsel %vm873_vm13, %v3218_v49, %v3155_v32 }
0x1b70   :  { %3344 = vrot.lane.b32.xlu1 %v3239_v36, %s6947_s13  ;;  %v3167_v53 = vpop.permute.xlu0 %3166 }
0x1b71   :  { %v3226_v21 = vsel %vm74_vm0, %v3222_v61, %v3167_v53 }
0x1b72   :  { %v3230_v55 = vsel %vm882_vm14, %v3226_v21, %v3179_v15 }
0x1b73   :  { %v3234_v12 = vsel %vm7882_vm2, %v3230_v55, %v3191_v43 }
0x1b74   :  { %v3238_v0 = vsel %vm208_vm5, %v3234_v12, %v3203_v60 }
0x1b75   :  { %3264 = vrot.lane.b32.xlu0 %v3238_v0, %s6947_s13 }
0x1bc2   :  { %v3577_v2 = vpop.f32.mrb[28].mxu1  ;;  %v3173_v3 = vpop.permute.xlu1 %3172 }
0x1bc3   :  { %v3137_v42 = vpop.permute.xlu0 %3136  ;;  %v3497_v7 = vpop.f32.mrb[32].mxu0 }
0x1bc4   :  { %v6154_v8 = vpop.f32.mrb[29].mxu1  ;;  %v6149_v9 = vpop.f32.mrb[33].mxu0  ;;  %v3217_v6 = vsel %vm201_vm6, %v7568_v41, %v3137_v42 }
0x1bc6   :  { %v3185_v5 = vpop.permute.xlu1 %3184 }
0x1bc7   :  { %v3149_v33 = vpop.permute.xlu0 %3148 }
0x1bc8   :  { %v3221_v10 = vsel %vm868_vm12, %v3217_v6, %v3149_v33 }
0x1bca   :  { %v3197_v40 = vpop.permute.xlu1 %3196 }
0x1bcb   :  { %v3161_v14 = vpop.permute.xlu0 %3160 }
0x1bcc   :  { %v3225_v23 = vsel %vm873_vm13, %v3221_v10, %v3161_v14 }
0x1bcd   :  { %v3229_v25 = vsel %vm74_vm0, %v3225_v23, %v3173_v3 }
0x1bce   :  { %v3135_v62 = vpop.permute.xlu1 %3134  ;;  %v3233_v41 = vsel %vm882_vm14, %v3229_v25, %v3185_v5 }
0x1bcf   :  { %v3183_v16 = vpop.permute.xlu0 %3182  ;;  %v3216_v27 = vsel %vm201_vm6, %v7574_v18, %v3135_v62  ;;  %v3237_v35 = vsel %vm7883_vm8, %v3233_v41, %v3197_v40 }
0x1bd2   :  { %v3147_v19 = vpop.permute.xlu1 %3146 }
0x1bd3   :  { %v3195_v52 = vpop.permute.xlu0 %3194  ;;  %v3220_v29 = vsel %vm868_vm12, %v3216_v27, %v3147_v19 }
0x1bd6   :  { %v3159_v24 = vpop.permute.xlu1 %3158 }
0x1bd7   :  { %v3224_v47 = vsel %vm873_vm13, %v3220_v29, %v3159_v24  ;;  %v3207_v54 = vpop.permute.xlu0 %3206  ;;  %vm5030_vm13 = vcmask 15360  }
0x1bda   :  { %v3171_v17 = vpop.permute.xlu1 %3170 }
0x1bdb   :  { %v3228_v51 = vsel %vm74_vm0, %v3224_v47, %v3171_v17  ;;  %vm7884_vm0 = vcmask 785408  }
0x1bdc   :  { %v3232_v56 = vsel %vm882_vm14, %v3228_v51, %v3183_v16  ;;  %vm7885_vm8 = vmmov %vm7884_vm0 }
0x1bdd   :  { %v3236_v15 = vsel %vm7882_vm2, %v3232_v56, %v3195_v52 }
0x1bde   :  { %v3209_v34 = vpop.permute.xlu1 %3208  ;;  %v3240_v38 = vsel %vm208_vm5, %v3236_v15, %v3207_v54 }
0x1bdf   :  { %v3241_v18 = vsel %vm208_vm5, %v3237_v35, %v3209_v34  ;;  %3424 = vrot.lane.b32.xlu0 %v3240_v38, %s6947_s13 }
0x1be0   :  { %3504 = vrot.lane.b32.xlu1 %v3241_v18, %s6947_s13 }
0x1be2   :  { %v3345_v11 = vpop.permute.xlu1 %3344 }
0x1be3   :  { %v3418_v49 = vadd.f32 %v7582_v22, %v3345_v11 }
0x1be5   :  { %v3582_v53 = vmul.f32 0.25, %v3418_v49 }
0x1be7   :  { %v3265_v32 = vpop.permute.xlu0 %3264  ;;  %v3586_v55 = vsel %vm7259_vm15, %v3582_v53, -1e+30 }
0x1be8   :  { %v3338_v43 = vadd.f32 %v7576_v1, %v3265_v32  ;;  %v3592_v60 = vsel %vm1256_vm1, %v3586_v55, -inf }
0x1bea   :  { %v3581_v36 = vmul.f32 0.25, %v3338_v43 }
0x1bec   :  { %v3585_v61 = vsel %vm7250_vm3, %v3581_v36, -1e+30 }
0x1bed   :  { %v3589_v21 = vsel %vm1256_vm1, %v3585_v61, -inf }
0x1bfe   :  { %3590 = vmax.xlane.f32.xlu0 %v3589_v21 }
0x1c04   :  { %3593 = vmax.xlane.f32.xlu1 %v3592_v60 }
0x1c51   :  { %v3425_v12 = vpop.permute.xlu0 %3424 }
0x1c52   :  { %v3498_v0 = vadd.f32 %v3497_v7, %v3425_v12  ;;  %v3505_v1 = vpop.permute.xlu1 %3504  ;;  %v3951_v12 = vld [vmem:[#allocation2 + $0x978] sm:$0xff] }
0x1c53   :  { %v3578_v3 = vadd.f32 %v3577_v2, %v3505_v1  ;;  %v3953_v1 = vld [vmem:[#allocation2 + $0x988] sm:$0xff] }
0x1c54   :  { %v3583_v42 = vmul.f32 0.25, %v3498_v0  ;;  %v3952_v0 = vld [vmem:[#allocation2 + $0x980] sm:$0xff] }
0x1c55   :  { %v3584_v8 = vmul.f32 0.25, %v3578_v3  ;;  %v3954_v3 = vld [vmem:[#allocation2 + $0x990] sm:$0xff] }
0x1c56   :  { %v3587_v22 = vsel %vm7250_vm3, %v3583_v42, -1e+30  ;;  %v6620_v37 = vpack.c.bf16 %v3954_v3, %v3953_v1 }
0x1c57   :  { %v3595_v9 = vsel %vm1256_vm1, %v3587_v22, -inf  ;;  %v3588_v5 = vsel %vm7259_vm15, %v3584_v8, -1e+30 }
0x1c58   :  { %3596 = vmax.xlane.f32.xlu0 %v3595_v9  ;;  %v3598_v33 = vsel %vm1256_vm1, %v3588_v5, -inf }
0x1c5c   :  { %3599 = vmax.xlane.f32.xlu0 %v3598_v33 }
0x1c8b   :  { %v3591_v40 = vpop.xlane.xlu0 %3590 }
0x1c8c   :  { %v3601_v14 = vsub.f32 %v3585_v61, %v3591_v40 }
0x1c8e   :  { %v3605_v62 = vmul.f32 1.442695, %v3601_v14 }
0x1c90   :  { %6849 = vpow2.f32 %v3605_v62 }
0x1c91   :  { %v3594_v7 = vpop.xlane.xlu1 %3593 }
0x1c92   :  { %v3602_v2 = vsub.f32 %v3586_v55, %v3594_v7 }
0x1c94   :  { %v3607_v16 = vmul.f32 1.442695, %v3602_v2 }
0x1c96   :  { %6851 = vpow2.f32 %v3607_v16 }
0x1c9a   :  { %v6850_v19 = vpop.eup %6849 }
0x1c9b   :  { %v3613_v6 = vsel %vm1256_vm1, %v6850_v19, 0.0 }
0x1c9c   :  { %3614 = vadd.xlane.f32.xlu0 %v3613_v6 }
0x1ca0   :  { %v6852_v10 = vpop.eup %6851 }
0x1ca1   :  { %v3616_v23 = vsel %vm1256_vm1, %v6852_v10, 0.0 }
0x1ca2   :  { %3617 = vadd.xlane.f32.xlu1 %v3616_v23 }
0x1ce5   :  { %v3597_v24 = vpop.xlane.xlu0 %3596 }
0x1ce6   :  { %v3603_v52 = vsub.f32 %v3587_v22, %v3597_v24 }
0x1ce8   :  { %v3609_v25 = vmul.f32 1.442695, %v3603_v52 }
0x1ce9   :  { %v3600_v27 = vpop.xlane.xlu0 %3599 }
0x1cea   :  { %6853 = vpow2.f32 %v3609_v25  ;;  %v3604_v29 = vsub.f32 %v3588_v5, %v3600_v27 }
0x1cec   :  { %v3611_v47 = vmul.f32 1.442695, %v3604_v29 }
0x1cee   :  { %6855 = vpow2.f32 %v3611_v47 }
0x1cf4   :  { %v6854_v17 = vpop.eup %6853 }
0x1cf5   :  { %v3619_v51 = vsel %vm1256_vm1, %v6854_v17, 0.0 }
0x1cf6   :  { %3620 = vadd.xlane.f32.xlu0 %v3619_v51 }
0x1cf8   :  { %v6856_v41 = vpop.eup %6855 }
0x1cf9   :  { %v3622_v56 = vsel %vm1256_vm1, %v6856_v41, 0.0 }
0x1cfa   :  { %3623 = vadd.xlane.f32.xlu1 %v3622_v56 }
0x1d0b   :  { %3713 = vrot.lane.b32.xlu1 %v7492_v57, %s6934_s29 }
0x1d0c   :  { %3637 = vrot.lane.b32.xlu0 %v7494_v63, %s6934_s29 }
0x1d0f   :  { %3789 = vrot.lane.b32.xlu1 %v7514_v44, %s6934_s29 }
0x1d13   :  { %3865 = vrot.lane.b32.xlu1 %v7510_v13, %s6934_s29 }
0x1d29   :  { %v3615_v54 = vpop.xlane.xlu0 %3614 }
0x1d2a   :  { %6857 = vrcp.f32 %v3615_v54 }
0x1d2f   :  { %v3618_v15 = vpop.xlane.xlu1 %3617 }
0x1d30   :  { %6859 = vrcp.f32 %v3618_v15 }
0x1d34   :  { %v6858_v34 = vpop.eup %6857 }
0x1d35   :  { %v3626_v38 = vmul.f32 %v6858_v34, %v6850_v19  ;;  %v5400_v19 = vld [vmem:[#allocation2 + $0x998] ss:$0 sm:$0xff]  ;;  %v4083_v34 = vld [vmem:[#allocation2 + $0x9a0] sm:$0xff] }
0x1d37   :  { %v3633_v63 = vsel %vm7250_vm3, %v3626_v38, 0.0  ;;  %v4085_v38 = vld [vmem:[#allocation2 + $0x9b0] sm:$0xff] }
0x1d3a   :  { %v6860_v18 = vpop.eup %6859 }
0x1d3b   :  { %v3628_v44 = vmul.f32 %v6860_v18, %v6852_v10 }
0x1d3d   :  { %v3634_v43 = vsel %vm7259_vm15, %v3628_v44, 0.0 }
0x1d83   :  { %v3621_v35 = vpop.xlane.xlu0 %3620 }
0x1d84   :  { %6861 = vrcp.f32 %v3621_v35  ;;  %v4084_v35 = vld [vmem:[#allocation2 + $0x9a8] sm:$0xff] }
0x1d85   :  { %v6624_v18 = vpack.c.bf16 %v4084_v35, %v4083_v34 }
0x1d87   :  { %v3624_v32 = vpop.xlane.xlu1 %3623  ;;  %v3638_v57 = vpop.permute.xlu0 %3637 }
0x1d88   :  { %6863 = vrcp.f32 %v3624_v32  ;;  %6156 = vmatpush3.msra.mxu0 %v3638_v57  ;;  %v4086_v32 = vld [vmem:[#allocation2 + $0x9b8] sm:$0xff] }
0x1d89   :  { %6158 = vmatmul.mubr.msk.f32.vlgmr.msra.gmra.mrb[34].mxu0 %vm1256_vm1, %v3633_v63  ;;  %6165 = vmatprep.subr.mxu0 %v6935_v46  ;;  %v6628_v57 = vpack.c.bf16 %v4086_v32, %v4085_v38  ;;  %v4197_v32 = vld [vmem:[#allocation2 + $0x9d8] sm:$0xff] }
0x1d8a   :  { %6167 = vmatprep.mubr.msk.f32.mxu0 %vm6936_vm10, %v6935_v46 }
0x1d8b   :  { %v3714_v13 = vpop.permute.xlu1 %3713 }
0x1d8c   :  { %6161 = vmatpush3.msra.mxu1 %v3714_v13 }
0x1d8d   :  { %6163 = vmatmul.mubr.msk.f32.vlgmr.msra.gmra.mrb[30].mxu1 %vm1256_vm1, %v3634_v43  ;;  %6170 = vmatprep.subr.mxu1 %v6935_v46 }
0x1d8e   :  { %v6862_v11 = vpop.eup %6861  ;;  %6172 = vmatprep.mubr.msk.f32.mxu1 %vm6936_vm10, %v6935_v46  ;;  %v6616_v46 = vpack.c.bf16 %v3952_v0, %v3951_v12  ;;  %vm7887_vm10 = vmmov %vm7882_vm2 }
0x1d8f   :  { %v3790_v36 = vpop.permute.xlu1 %3789  ;;  %v3630_v49 = vmul.f32 %v6862_v11, %v6854_v17 }
0x1d90   :  { %6166 = vmatpush3.msra.mxu0 %v3790_v36 }
0x1d91   :  { %v3635_v61 = vsel %vm7250_vm3, %v3630_v49, 0.0  ;;  %6617 = vmatprep.subr.bf16.mxu0 %v6616_v46  ;;  %v7703_v49 = vld [vmem:[#allocation2 + $0x530] sm:$0x1f]  ;;  %vm5045_vm3 = vcmask 39936  }
0x1d92   :  { %v6864_v53 = vpop.eup %6863  ;;  %6168 = vmatmul.mubr.msk.f32.vlgmr.msra.gmra.mrb[36].mxu0 %vm1256_vm1, %v3635_v61  ;;  %v4074_v61 = vrot.slane %v7703_v49, %v7324_v31 }
0x1d93   :  { %v3866_v21 = vpop.permute.xlu1 %3865  ;;  %v3632_v55 = vmul.f32 %v6864_v53, %v6856_v41  ;;  %6619 = vmatpush3.bf16.msra.mxu0 %v6616_v46 }
0x1d94   :  { %6171 = vmatpush3.msra.mxu1 %v3866_v21  ;;  %6621 = vmatprep.subr.bf16.mxu0 %v6620_v37 }
0x1d95   :  { %v3636_v60 = vsel %vm7259_vm15, %v3632_v55, 0.0  ;;  %6625 = vmatprep.subr.bf16.mxu1 %v6624_v18  ;;  %v7707_v55 = vld [vmem:[#allocation2 + $0x538] sm:$0x1f]  ;;  %vm5036_vm15 = vcmask 31744  }
0x1d96   :  { %6173 = vmatmul.mubr.msk.f32.vlgmr.msra.gmra.mrb[32].mxu1 %vm1256_vm1, %v3636_v60  ;;  %v4080_v60 = vrot.slane %v7707_v55, %v7324_v31  ;;  %vm7888_vm1 = vmmov %vm7882_vm2 }
0x1d97   :  { %6623 = vmatpush3.bf16.msra.mxu0 %v6620_v37  ;;  %6627 = vmatpush3.bf16.msra.mxu1 %v6624_v18 }
0x1d98   :  { %6629 = vmatprep.subr.bf16.mxu1 %v6628_v57 }
0x1d9b   :  { %6631 = vmatpush3.bf16.msra.mxu1 %v6628_v57 }
0x1e5c   :  { %v3709_v42 = vpop.f32.mrb[34].mxu0 }
0x1e5d   :  { %v6159_v8 = vpop.f32.mrb[35].mxu0 }
0x1e60   :  { %v3785_v22 = vpop.f32.mrb[30].mxu1 }
0x1e61   :  { %v6164_v9 = vpop.f32.mrb[31].mxu1 }
0x1e65   :  { %v3861_v5 = vpop.f32.mrb[36].mxu0 }
0x1e66   :  { %3943 = vrot.lane.b32.xlu0 %v3861_v5, %s6950_s1  ;;  %v6169_v48 = vpop.f32.mrb[37].mxu0 }
0x1e69   :  { %v3937_v33 = vpop.f32.mrb[32].mxu1 }
0x1e6a   :  { %3945 = vrot.lane.b32.xlu1 %v3937_v33, %s6950_s1  ;;  %v6174_v40 = vpop.f32.mrb[33].mxu1 }
0x1ed8   :  { %v3944_v14 = vpop.permute.xlu0 %3943 }
0x1ed9   :  { %v3949_v62 = vsel %vm921_vm11, %v3709_v42, %v3944_v14  ;;  %v5401_v42 = vld [vmem:[#allocation2 + $0x9c0] ss:$0 sm:$0xff] }
0x1eda   :  { %6183 = vmatprep.mubr.msk.f32.mxu0 %vm155_vm4, %v3949_v62 }
0x1edc   :  { %v3946_v7 = vpop.permute.xlu1 %3945 }
0x1edd   :  { %v3950_v2 = vsel %vm921_vm11, %v3785_v22, %v3946_v7  ;;  %vm5027_vm11 = vcmask 7168  }
0x1ede   :  { %6184 = vmatmul.mubr.msk.f32.vlgmr.msra.gmra.mrb[38].mxu0 %vm155_vm4, %v3950_v2  ;;  %v4318_v2 = vld [vmem:[#allocation2 + $0xa10] sm:$0xff] }
0x1fb1   :  { %v6185_v16 = vpop.f32.mrb[38].mxu0 }
0x1fb2   :  { %v4037_v6 = vadd.f32 %v6185_v16, %v7474_v4  ;;  %v4027_v10 = vpop.f32.mrb[39].mxu0  ;;  %v4319_v16 = vld [vmem:[#allocation2 + $0xa18] sm:$0xff] }
0x1fb3   :  { %v4036_v23 = vadd.f32 %v4027_v10, %v7469_v59  ;;  %v4321_v10 = vld [vmem:[#allocation2 + $0xa28] sm:$0xff] }
0x1fb4   :  { %v7691_v24 = vadd.f32 %v5400_v19, %v4037_v6  ;;  %v6632_v6 = vpack.c.bf16 %v4319_v16, %v4318_v2  ;;  %v4202_v16 = vld [vmem:[#allocation2 + $0xa00] sm:$0xff] }
0x1fb5   :  { %v7693_v52 = vadd.f32 %v5400_v19, %v4036_v23  ;;  %v4320_v19 = vld [vmem:[#allocation2 + $0xa20] sm:$0xff] }
0x1fb6   :  { %v4048_v25 = vsel %vm155_vm4, %v7691_v24, 0.0  ;;  %v6636_v23 = vpack.c.bf16 %v4321_v10, %v4320_v19  ;;  %6633 = vmatprep.subr.bf16.mxu0 %v6632_v6 }
0x1fb7   :  { %4049 = vadd.xlane.f32.xlu1 %v4048_v25  ;;  %v4045_v27 = vsel %vm155_vm4, %v7693_v52, 0.0  ;;  %6635 = vmatpush3.bf16.msra.mxu0 %v6632_v6 }
0x1fb8   :  { %4046 = vadd.xlane.f32.xlu0 %v4045_v27  ;;  %6637 = vmatprep.subr.bf16.mxu0 %v6636_v23 }
0x1fbb   :  { %6639 = vmatpush3.bf16.msra.mxu0 %v6636_v23 }
0x2044   :  { %v4050_v29 = vpop.xlane.xlu1 %4049 }
0x2045   :  { %v4052_v47 = vmul.f32 0.03125, %v4050_v29  ;;  %v4047_v17 = vpop.xlane.xlu0 %4046 }
0x2046   :  { %v4051_v51 = vmul.f32 0.03125, %v4047_v17 }
0x2047   :  { %v4054_v4 = vsub.f32 %v7691_v24, %v4052_v47 }
0x2048   :  { %v4053_v59 = vsub.f32 %v7693_v52, %v4051_v51 }
0x2049   :  { %v4056_v54 = vmul.f32 %v4054_v4, %v4054_v4 }
0x204a   :  { %v4055_v41 = vmul.f32 %v4053_v59, %v4053_v59 }
0x204b   :  { %v4060_v15 = vsel %vm155_vm4, %v4056_v54, 0.0 }
0x204c   :  { %v4057_v56 = vsel %vm155_vm4, %v4055_v41, 0.0  ;;  %v5406_v41 = vld [vmem:[#allocation2 + $0xa08] ss:$0 sm:$0xff] }
0x204d   :  { %4058 = vadd.xlane.f32.xlu0 %v4057_v56 }
0x2051   :  { %4061 = vadd.xlane.f32.xlu0 %v4060_v15  ;;  %v4196_v15 = vld [vmem:[#allocation2 + $0x9d0] sm:$0xff] }
0x20da   :  { %v4059_v63 = vpop.xlane.xlu0 %4058 }
0x20db   :  { %v4063_v44 = vmul.f32 0.03125, %v4059_v63 }
0x20dd   :  { %v4065_v13 = vadd.f32 1e-12, %v4063_v44 }
0x20de   :  { %v4062_v43 = vpop.xlane.xlu0 %4061 }
0x20df   :  { %6865 = vrsqrt.f32 %v4065_v13  ;;  %v4064_v11 = vmul.f32 0.03125, %v4062_v43 }
0x20e1   :  { %v4066_v36 = vadd.f32 1e-12, %v4064_v11  ;;  %v4198_v11 = vld [vmem:[#allocation2 + $0x9e0] sm:$0xff] }
0x20e3   :  { %6867 = vrsqrt.f32 %v4066_v36 }
0x20e9   :  { %v6866_v53 = vpop.eup %6865 }
0x20ea   :  { %v4069_v21 = vmul.f32 %v6866_v53, %v4053_v59 }
0x20ec   :  { %v4075_v12 = vmul.f32 %v4074_v61, %v4069_v21 }
0x20ed   :  { %v6868_v0 = vpop.eup %6867 }
0x20ee   :  { %v4070_v46 = vmul.f32 %v6868_v0, %v4054_v4  ;;  %v4081_v1 = vadd.f32 %v4080_v60, %v4075_v12  ;;  %v4195_v4 = vld [vmem:[#allocation2 + $0x9c8] sm:$0xff] }
0x20f0   :  { %v4076_v3 = vmul.f32 %v4074_v61, %v4070_v46  ;;  %6194 = vmatprep.mubr.msk.f32.mxu1 %vm155_vm4, %v4081_v1 }
0x20f2   :  { %v4082_v37 = vadd.f32 %v4080_v60, %v4076_v3  ;;  %v4200_v3 = vld [vmem:[#allocation2 + $0x9f0] sm:$0xff] }
0x20f4   :  { %6195 = vmatmul.mubr.msk.f32.vlgmr.msra.gmra.mrb[34].mxu1 %vm155_vm4, %v4082_v37 }
0x21c7   :  { %v6196_v8 = vpop.f32.mrb[34].mxu1 }
0x21c8   :  { %v4170_v22 = vadd.f32 %v6196_v8, %v5401_v42  ;;  %v4164_v9 = vpop.f32.mrb[35].mxu1 }
0x21c9   :  { %v4165_v5 = vadd.f32 %v5401_v42, %v4164_v9 }
0x21ca   :  { %v5405_v48 = vmul.f32 -1.442695, %v4170_v22 }
0x21cb   :  { %v5404_v33 = vmul.f32 -1.442695, %v4165_v5 }
0x21cc   :  { %6869 = vpow2.f32 %v5405_v48  ;;  %v4201_v48 = vld [vmem:[#allocation2 + $0x9f8] sm:$0xff] }
0x21cd   :  { %6871 = vpow2.f32 %v5404_v33 }
0x21d6   :  { %v6870_v40 = vpop.eup %6869 }
0x21d7   :  { %v6872_v14 = vpop.eup %6871  ;;  %v4180_v62 = vadd.f32 1.0, %v6870_v40 }
0x21d8   :  { %v4179_v7 = vadd.f32 1.0, %v6872_v14 }
0x21d9   :  { %6873 = vrcp.f32 %v4180_v62 }
0x21da   :  { %6875 = vrcp.f32 %v4179_v7 }
0x21e3   :  { %v6874_v25 = vpop.eup %6873 }
0x21e4   :  { %v6876_v27 = vpop.eup %6875  ;;  %4189 = vrot.lane.b32.xlu1 %v6874_v25, %s6938_s4 }
0x21e5   :  { %4187 = vrot.lane.b32.xlu0 %v6876_v27, %s6938_s4 }
0x2256   :  { %v4190_v29 = vpop.permute.xlu1 %4189 }
0x2257   :  { %v4194_v47 = vmul.f32 %v4190_v29, %v4170_v22  ;;  %v4188_v17 = vpop.permute.xlu0 %4187 }
0x2258   :  { %v4193_v51 = vmul.f32 %v4188_v17, %v4165_v5 }
0x2259   :  { %v4215_v59 = vrot.slane %v4194_v47, %v7008_v45  ;;  %v4227_v35 = vrot.slane %v4194_v47, %v7072_v28  ;;  %v4239_v63 = vrot.slane %v4194_v47, %v7324_v31  ;;  %v4263_v12 = vrot.slane %v4194_v47, %v7347_v26 }
0x225a   :  { %v4211_v56 = vrot.slane %v4193_v51, %v7008_v45  ;;  %v4223_v54 = vrot.slane %v4193_v51, %v7072_v28  ;;  %v4235_v18 = vrot.slane %v4193_v51, %v7324_v31  ;;  %v4247_v43 = vrot.slane %v4193_v51, %v7342_v20  ;;  %v4199_v28 = vld [vmem:[#allocation2 + $0x9e8] sm:$0xff] }
0x225b   :  { %v4217_v34 = vmul.f32 %v4215_v59, %v4195_v4  ;;  %v4229_v36 = vmul.f32 %v4227_v35, %v4196_v15  ;;  %v4251_v45 = vrot.slane %v4194_v47, %v7342_v20  ;;  %v4259_v21 = vrot.slane %v4193_v51, %v7347_v26 }
0x225c   :  { %v4216_v38 = vmul.f32 %v4211_v56, %v4195_v4  ;;  %v4228_v13 = vmul.f32 %v4223_v54, %v4196_v15  ;;  %v4240_v53 = vmul.f32 %v4235_v18, %v4197_v32  ;;  %v4241_v60 = vmul.f32 %v4239_v63, %v4197_v32 }
0x225d   :  { %v4219_v57 = vadd.f32 %v5406_v41, %v4217_v34  ;;  %v4252_v1 = vmul.f32 %v4247_v43, %v4198_v11  ;;  %v4271_v31 = vrot.slane %v4193_v51, %v7352_v30  ;;  %v4253_v37 = vmul.f32 %v4251_v45, %v4198_v11 }
0x225e   :  { %v4218_v44 = vadd.f32 %v5406_v41, %v4216_v38  ;;  %v4275_v42 = vrot.slane %v4194_v47, %v7352_v30  ;;  %v4264_v9 = vmul.f32 %v4259_v21, %v4199_v28  ;;  %v4283_v5 = vrot.slane %v4193_v51, %v7357_v50 }
0x225f   :  { %v4231_v0 = vadd.f32 %v4229_v36, %v4219_v57  ;;  %v4265_v33 = vmul.f32 %v4263_v12, %v4199_v28  ;;  %v4287_v40 = vrot.slane %v4194_v47, %v7357_v50  ;;  %v4276_v7 = vmul.f32 %v4271_v31, %v4200_v3  ;;  %v5411_v57 = vld [vmem:[#allocation2 + $0xa30] ss:$0 sm:$0xff]  ;;  %v4483_v31 = vld [vmem:[#allocation2 + $0x738] sm:$0xff] }
0x2260   :  { %v4230_v61 = vadd.f32 %v4228_v13, %v4218_v44  ;;  %v4295_v2 = vrot.slane %v4193_v51, %v7362_v58  ;;  %v4277_v19 = vmul.f32 %v4275_v42, %v4200_v3  ;;  %v4299_v6 = vrot.slane %v4194_v47, %v7362_v58  ;;  %v4484_v3 = vld [vmem:[#allocation2 + $0x740] sm:$0xff]  ;;  %v4485_v42 = vld [vmem:[#allocation2 + $0x748] sm:$0xff] }
0x2261   :  { %v4243_v8 = vadd.f32 %v4241_v60, %v4231_v0  ;;  %v4288_v23 = vmul.f32 %v4283_v5, %v4201_v48  ;;  %v4289_v25 = vmul.f32 %v4287_v40, %v4201_v48  ;;  %v4488_v48 = vld [vmem:[#allocation2 + $0x760] sm:$0xff] }
0x2262   :  { %v4242_v46 = vadd.f32 %v4240_v53, %v4230_v61  ;;  %v4300_v17 = vmul.f32 %v4295_v2, %v4202_v16  ;;  %v4301_v4 = vmul.f32 %v4299_v6, %v4202_v16  ;;  %v4490_v6 = vld [vmem:[#allocation2 + $0x770] sm:$0xff] }
0x2263   :  { %v4255_v14 = vadd.f32 %v4253_v37, %v4243_v8  ;;  %v6644_v8 = vpack.c.bf16 %v4485_v42, %v4484_v3  ;;  %v4602_v3 = vld [vmem:[#allocation2 + $0x7c8] sm:$0xff]  ;;  %v4603_v42 = vld [vmem:[#allocation2 + $0x7d0] sm:$0xff] }
0x2264   :  { %v4254_v22 = vadd.f32 %v4252_v1, %v4242_v46  ;;  %v4482_v1 = vld [vmem:[#allocation2 + $0x730] sm:$0xff] }
0x2265   :  { %v4267_v10 = vadd.f32 %v4265_v33, %v4255_v14  ;;  %v6640_v37 = vpack.c.bf16 %v4483_v31, %v4482_v1  ;;  %v4489_v33 = vld [vmem:[#allocation2 + $0x768] sm:$0xff]  ;;  %v4619_v31 = vld [vmem:[#allocation2 + $0x850] sm:$0xff] }
0x2266   :  { %v4266_v62 = vadd.f32 %v4264_v9, %v4254_v22  ;;  %v4486_v22 = vld [vmem:[#allocation2 + $0x750] sm:$0xff]  ;;  %v4487_v9 = vld [vmem:[#allocation2 + $0x758] sm:$0xff]  ;;  %v6652_v40 = vpack.c.bf16 %v4489_v33, %v4488_v48  ;;  %v4618_v1 = vld [vmem:[#allocation2 + $0x848] sm:$0xff] }
0x2267   :  { %v4279_v27 = vadd.f32 %v4277_v19, %v4267_v10  ;;  %6641 = vmatprep.subr.bf16.mxu1 %v6640_v37  ;;  %v6648_v5 = vpack.c.bf16 %v4487_v9, %v4486_v22  ;;  %v4491_v10 = vld [vmem:[#allocation2 + $0x778] sm:$0xff]  ;;  %v6678_v22 = vpack.c.bf16 %v4603_v42, %v4602_v3  ;;  %v4642_v3 = vld [vmem:[#allocation2 + $0x908] sm:$0xff]  ;;  %v4643_v42 = vld [vmem:[#allocation2 + $0x910] sm:$0xff] }
0x2268   :  { %v4278_v30 = vadd.f32 %v4276_v7, %v4266_v62  ;;  %6643 = vmatpush3.bf16.msra.mxu1 %v6640_v37  ;;  %v6676_v37 = vpack.c.bf16 %v4619_v31, %v4618_v1  ;;  %v4620_v9 = vld [vmem:[#allocation2 + $0x858] sm:$0xff]  ;;  %v4610_v1 = vld [vmem:[#allocation2 + $0x808] sm:$0xff]  ;;  %v4611_v31 = vld [vmem:[#allocation2 + $0x810] sm:$0xff] }
0x2269   :  { %v4291_v59 = vadd.f32 %v4289_v25, %v4279_v27  ;;  %6645 = vmatprep.subr.bf16.mxu1 %v6644_v8  ;;  %v4493_v25 = vld [vmem:[#allocation2 + $0x788] sm:$0xff]  ;;  %v4441_v27 = vrot.slane %v7703_v49, %v7342_v20  ;;  %v4604_v48 = vld [vmem:[#allocation2 + $0x7d8] sm:$0xff] }
0x226a   :  { %v4290_v29 = vadd.f32 %v4288_v23, %v4278_v30  ;;  %v6656_v30 = vpack.c.bf16 %v4491_v10, %v4490_v6  ;;  %v4492_v23 = vld [vmem:[#allocation2 + $0x780] sm:$0xff] }
0x226b   :  { %v4303_v50 = vadd.f32 %v4301_v4, %v4291_v59 }
0x226c   :  { %v4302_v41 = vadd.f32 %v4300_v17, %v4290_v29  ;;  %6647 = vmatpush3.bf16.msra.mxu1 %v6644_v8  ;;  %v6660_v29 = vpack.c.bf16 %v4493_v25, %v4492_v23 }
0x226d   :  { %v5408_v54 = vmul.f32 -1.442695, %v4303_v50  ;;  %6649 = vmatprep.subr.bf16.mxu1 %v6648_v5 }
0x226e   :  { %v5407_v56 = vmul.f32 -1.442695, %v4302_v41 }
0x2270   :  { %6877 = vpow2.f32 %v5407_v56  ;;  %6651 = vmatpush3.bf16.msra.mxu1 %v6648_v5  ;;  %v4621_v5 = vld [vmem:[#allocation2 + $0x860] sm:$0xff] }
0x2271   :  { %6879 = vpow2.f32 %v5408_v54  ;;  %6653 = vmatprep.subr.bf16.mxu1 %v6652_v40  ;;  %v4612_v54 = vld [vmem:[#allocation2 + $0x818] sm:$0xff]  ;;  %v6680_v33 = vpack.c.bf16 %v4621_v5, %v4620_v9 }
0x2274   :  { %6655 = vmatpush3.bf16.msra.mxu1 %v6652_v40  ;;  %v4605_v40 = vld [vmem:[#allocation2 + $0x7e0] sm:$0xff] }
0x2275   :  { %6657 = vmatprep.subr.bf16.mxu1 %v6656_v30 }
0x2278   :  { %6659 = vmatpush3.bf16.msra.mxu1 %v6656_v30 }
0x2279   :  { %6661 = vmatprep.subr.bf16.mxu1 %v6660_v29 }
0x227a   :  { %v6878_v51 = vpop.eup %6877 }
0x227b   :  { %v6880_v15 = vpop.eup %6879  ;;  %v4310_v34 = vadd.f32 1.0, %v6878_v51  ;;  %v4613_v51 = vld [vmem:[#allocation2 + $0x820] sm:$0xff] }
0x227c   :  { %v4311_v35 = vadd.f32 1.0, %v6880_v15  ;;  %6663 = vmatpush3.bf16.msra.mxu1 %v6660_v29  ;;  %v4596_v15 = vld [vmem:[#allocation2 + $0x798] sm:$0xff] }
0x227d   :  { %6881 = vrcp.f32 %v4310_v34 }
0x227e   :  { %6883 = vrcp.f32 %v4311_v35  ;;  %v6664_v35 = vpack.c.bf16 %v4613_v51, %v4612_v54 }
0x2280   :  { %6665 = vmatprep.subr.bf16.mxu0 %v6664_v35  ;;  %v4633_v35 = vld [vmem:[#allocation2 + $0x8c0] sm:$0xff] }
0x2287   :  { %v6882_v58 = vpop.eup %6881 }
0x2288   :  { %v6884_v47 = vpop.eup %6883  ;;  %v4316_v38 = vmul.f32 %v6882_v58, %v4302_v41  ;;  %v4447_v41 = vrot.slane %v7707_v55, %v7342_v20  ;;  %v4597_v58 = vld [vmem:[#allocation2 + $0x7a0] sm:$0xff]  ;;  %v4598_v20 = vld [vmem:[#allocation2 + $0x7a8] sm:$0xff] }
0x2289   :  { %v4317_v18 = vmul.f32 %v6884_v47, %v4303_v50  ;;  %v4628_v47 = vld [vmem:[#allocation2 + $0x898] sm:$0xff] }
0x228a   :  { %6205 = vmatprep.mubr.msk.f32.mxu0 %vm155_vm4, %v4316_v38  ;;  %v4629_v38 = vld [vmem:[#allocation2 + $0x8a0] sm:$0xff] }
0x228b   :  { %6206 = vmatmul.mubr.msk.f32.vlgmr.msra.gmra.mrb[40].mxu0 %vm155_vm4, %v4317_v18 }
0x235e   :  { %v6207_v32 = vpop.f32.mrb[40].mxu0 }
0x235f   :  { %v4404_v63 = vadd.f32 %v6207_v32, %v7691_v24  ;;  %v4394_v44 = vpop.f32.mrb[41].mxu0  ;;  %v6666_v32 = vpack.c.bf16 %v4597_v58, %v4596_v15 }
0x2360   :  { %v4403_v13 = vadd.f32 %v4394_v44, %v7693_v52  ;;  %v4615_v44 = vld [vmem:[#allocation2 + $0x830] sm:$0xff] }
0x2361   :  { %v7735_v43 = vadd.f32 %v5411_v57, %v4404_v63  ;;  %v4614_v63 = vld [vmem:[#allocation2 + $0x828] sm:$0xff]  ;;  %6667 = vmatpush3.bf16.msra.mxu0 %v6666_v32  ;;  %v4636_v32 = vld [vmem:[#allocation2 + $0x8d8] sm:$0xff] }
0x2362   :  { %v7737_v11 = vadd.f32 %v5411_v57, %v4403_v13  ;;  %v7753_v57 = vpack.c.bf16 %v4629_v38, %v4628_v47  ;;  %v4634_v47 = vld [vmem:[#allocation2 + $0x8c8] sm:$0xff]  ;;  %v4635_v38 = vld [vmem:[#allocation2 + $0x8d0] sm:$0xff] }
0x2363   :  { %v4415_v36 = vsel %vm155_vm4, %v7735_v43, 0.0 }
0x2364   :  { %4416 = vadd.xlane.f32.xlu0 %v4415_v36  ;;  %v4412_v45 = vsel %vm155_vm4, %v7737_v11, 0.0  ;;  %v6668_v36 = vpack.c.bf16 %v4615_v44, %v4614_v63  ;;  %6697 = vmatprep.subr.bf16.mxu1 %v7753_v57  ;;  %v4637_v63 = vld [vmem:[#allocation2 + $0x8e0] sm:$0xff] }
0x2365   :  { %4413 = vadd.xlane.f32.xlu1 %v4412_v45  ;;  %v4599_v45 = vld [vmem:[#allocation2 + $0x7b0] sm:$0xff]  ;;  %v6712_v44 = vpack.c.bf16 %v4637_v63, %v4636_v32 }
0x2366   :  { %6669 = vmatprep.subr.bf16.mxu0 %v6668_v36 }
0x23f1   :  { %v4417_v61 = vpop.xlane.xlu0 %4416 }
0x23f2   :  { %v4419_v53 = vmul.f32 0.03125, %v4417_v61  ;;  %v4414_v21 = vpop.xlane.xlu1 %4413  ;;  %v6670_v61 = vpack.c.bf16 %v4599_v45, %v4598_v20  ;;  %v4638_v20 = vld [vmem:[#allocation2 + $0x8e8] sm:$0xff]  ;;  %v4625_v45 = vld [vmem:[#allocation2 + $0x880] sm:$0xff] }
0x23f3   :  { %v4418_v28 = vmul.f32 0.03125, %v4414_v21  ;;  %v4616_v21 = vld [vmem:[#allocation2 + $0x838] sm:$0xff] }
0x23f4   :  { %v4421_v24 = vsub.f32 %v7735_v43, %v4419_v53  ;;  %6671 = vmatpush3.bf16.msra.mxu0 %v6670_v61 }
0x23f5   :  { %v4420_v52 = vsub.f32 %v7737_v11, %v4418_v28  ;;  %v4617_v28 = vld [vmem:[#allocation2 + $0x840] sm:$0xff] }
0x23f6   :  { %v4423_v60 = vmul.f32 %v4421_v24, %v4421_v24 }
0x23f7   :  { %v4422_v12 = vmul.f32 %v4420_v52, %v4420_v52 }
0x23f8   :  { %v4427_v0 = vsel %vm155_vm4, %v4423_v60, 0.0  ;;  %v4601_v60 = vld [vmem:[#allocation2 + $0x7c0] sm:$0xff] }
0x23f9   :  { %4428 = vadd.xlane.f32.xlu1 %v4427_v0  ;;  %v4424_v46 = vsel %vm155_vm4, %v4422_v12, 0.0 }
0x23fa   :  { %4425 = vadd.xlane.f32.xlu0 %v4424_v46 }
0x2486   :  { %v4429_v14 = vpop.xlane.xlu1 %4428 }
0x2487   :  { %v4431_v62 = vmul.f32 0.03125, %v4429_v14  ;;  %v4426_v7 = vpop.xlane.xlu0 %4425  ;;  %v6682_v14 = vpack.c.bf16 %v4605_v40, %v4604_v48 }
0x2488   :  { %v4430_v2 = vmul.f32 0.03125, %v4426_v7  ;;  %v4623_v7 = vld [vmem:[#allocation2 + $0x870] sm:$0xff] }
0x2489   :  { %v4433_v16 = vadd.f32 1e-12, %v4431_v62  ;;  %v4622_v62 = vld [vmem:[#allocation2 + $0x868] sm:$0xff] }
0x248a   :  { %v4432_v19 = vadd.f32 1e-12, %v4430_v2  ;;  %v4606_v2 = vld [vmem:[#allocation2 + $0x7e8] sm:$0xff] }
0x248b   :  { %6885 = vrsqrt.f32 %v4433_v16  ;;  %v6684_v16 = vpack.c.bf16 %v4623_v7, %v4622_v62 }
0x248c   :  { %6887 = vrsqrt.f32 %v4432_v19  ;;  %v4607_v19 = vld [vmem:[#allocation2 + $0x7f0] sm:$0xff] }
0x248d   :  { %v6686_v6 = vpack.c.bf16 %v4607_v19, %v4606_v2 }
0x2495   :  { %v6886_v17 = vpop.eup %6885 }
0x2496   :  { %v6888_v4 = vpop.eup %6887  ;;  %v4437_v59 = vmul.f32 %v6886_v17, %v4421_v24  ;;  %v4600_v24 = vld [vmem:[#allocation2 + $0x7b8] sm:$0xff] }
0x2497   :  { %v4436_v50 = vmul.f32 %v6888_v4, %v4420_v52  ;;  %v6672_v52 = vpack.c.bf16 %v4617_v28, %v4616_v21  ;;  %v6674_v46 = vpack.c.bf16 %v4601_v60, %v4600_v24  ;;  %v4609_v21 = vld [vmem:[#allocation2 + $0x800] sm:$0xff]  ;;  %v4640_v28 = vld [vmem:[#allocation2 + $0x8f8] sm:$0xff]  ;;  %v4626_v60 = vld [vmem:[#allocation2 + $0x888] sm:$0xff] }
0x2498   :  { %v4443_v56 = vmul.f32 %v4441_v27, %v4437_v59  ;;  %v4630_v59 = vld [vmem:[#allocation2 + $0x8a8] sm:$0xff] }
0x2499   :  { %v4442_v34 = vmul.f32 %v4441_v27, %v4436_v50  ;;  %6673 = vmatprep.subr.bf16.mxu0 %v6672_v52  ;;  %v4641_v52 = vld [vmem:[#allocation2 + $0x900] sm:$0xff] }
0x249a   :  { %v7751_v18 = vadd.f32 %v4447_v41, %v4443_v56  ;;  %6675 = vmatpush3.bf16.msra.mxu0 %v6674_v46 }
0x249b   :  { %v4448_v13 = vadd.f32 %v4447_v41, %v4442_v34  ;;  %6677 = vmatprep.subr.bf16.mxu0 %v6676_v37  ;;  %v4631_v41 = vld [vmem:[#allocation2 + $0x8b0] sm:$0xff]  ;;  %v4632_v34 = vld [vmem:[#allocation2 + $0x8b8] sm:$0xff]  ;;  %v6694_v37 = vpack.c.bf16 %v4611_v31, %v4610_v1 }
0x249c   :  { %4466 = vrot.lane.b32.xlu1 %v7751_v18, %s6933_s0  ;;  %v4459_v0 = vrot.slane %v7751_v18, 1  ;;  %v4453_v25 = vrot.slane %v7751_v18, 7  ;;  %v6700_v51 = vpack.c.bf16 %v4631_v41, %v4630_v59  ;;  %v6704_v58 = vpack.c.bf16 %v4633_v35, %v4632_v34 }
0x249d   :  { %4464 = vrot.lane.b32.xlu0 %v4448_v13, %s6933_s0  ;;  %v4458_v53 = vrot.slane %v4448_v13, 1  ;;  %v4452_v10 = vrot.slane %v4448_v13, 7  ;;  %v6708_v18 = vpack.c.bf16 %v4635_v38, %v4634_v47  ;;  %v4639_v13 = vld [vmem:[#allocation2 + $0x8f0] sm:$0xff] }
0x249e   :  { %v4463_v8 = vsel %vm208_vm5, %v4459_v0, 0.0  ;;  %6679 = vmatpush3.bf16.msra.mxu0 %v6678_v22  ;;  %v4457_v50 = vsel %vm201_vm6, 0.0, %v4453_v25  ;;  %v6716_v36 = vpack.c.bf16 %v4639_v13, %v4638_v20  ;;  %v6720_v0 = vpack.c.bf16 %v4641_v52, %v4640_v28  ;;  %v5412_v22 = vld [vmem:[#allocation2 + $0x790] ss:$0 sm:$0xff] }
0x249f   :  { %v4462_v12 = vsel %vm208_vm5, %v4458_v53, 0.0  ;;  %6681 = vmatprep.subr.bf16.mxu0 %v6680_v33  ;;  %v4456_v27 = vsel %vm201_vm6, 0.0, %v4452_v10  ;;  %v4608_v53 = vld [vmem:[#allocation2 + $0x7f8] sm:$0xff] }
0x24a0   :  { %4472 = vrot.lane.b32.xlu1 %v4462_v12, %s6934_s29  ;;  %v6690_v24 = vpack.c.bf16 %v4609_v21, %v4608_v53  ;;  %v4627_v12 = vld [vmem:[#allocation2 + $0x890] sm:$0xff]  ;;  %v4832_v53 = vrot.slane %v7703_v49, %v7347_v26 }
0x24a1   :  { %v6692_v46 = vpack.c.bf16 %v4627_v12, %v4626_v60 }
0x24a2   :  { %6683 = vmatpush3.bf16.msra.mxu0 %v6682_v14 }
0x24a3   :  { %6685 = vmatprep.subr.bf16.mxu0 %v6684_v16 }
0x24a4   :  { %4474 = vrot.lane.b32.xlu1 %v4463_v8, %s6934_s29  ;;  %v6724_v8 = vpack.c.bf16 %v4643_v42, %v4642_v3 }
0x24a6   :  { %6687 = vmatpush3.bf16.msra.mxu0 %v6686_v6 }
0x250e   :  { %v4467_v30 = vpop.permute.xlu1 %4466 }
0x250f   :  { %v4465_v23 = vpop.permute.xlu0 %4464  ;;  %v4479_v56 = vsel %vm155_vm4, %v4457_v50, %v4467_v30  ;;  %v5415_v30 = vld [vmem:[#allocation2 + $0x918] ss:$0 sm:$0xff] }
0x2510   :  { %v4478_v29 = vsel %vm155_vm4, %v4456_v27, %v4465_v23 }
0x2512   :  { %v4473_v17 = vpop.permute.xlu1 %4472 }
0x2513   :  { %v4480_v4 = vsel %vm227_vm7, %v4478_v29, %v4473_v17 }
0x2514   :  { %6232 = vmatprep.mubr.msk.f32.mxu1 %vm7884_vm0, %v4480_v4 }
0x2516   :  { %v4475_v54 = vpop.permute.xlu1 %4474 }
0x2517   :  { %v4481_v15 = vsel %vm227_vm7, %v4479_v56, %v4475_v54 }
0x2518   :  { %6233 = vmatmul.mubr.msk.f32.vlgmr.msra.gmra.mrb[36].mxu1 %vm7885_vm8, %v4481_v15 }
0x2519   :  { %6699 = vmatpush3.bf16.msra.mxu1 %v7753_v57  ;;  %v4624_v57 = vld [vmem:[#allocation2 + $0x878] sm:$0xff] }
0x251a   :  { %6701 = vmatprep.subr.bf16.mxu1 %v6700_v51  ;;  %v6688_v61 = vpack.c.bf16 %v4625_v45, %v4624_v57 }
0x251c   :  { %6689 = vmatprep.subr.bf16.mxu0 %v6688_v61 }
0x251d   :  { %6703 = vmatpush3.bf16.msra.mxu1 %v6700_v51  ;;  %6691 = vmatpush3.bf16.msra.mxu0 %v6690_v24  ;;  %v4838_v24 = vrot.slane %v7707_v55, %v7347_v26 }
0x251e   :  { %6705 = vmatprep.subr.bf16.mxu1 %v6704_v58  ;;  %6693 = vmatprep.subr.bf16.mxu0 %v6692_v46 }
0x2521   :  { %6707 = vmatpush3.bf16.msra.mxu1 %v6704_v58  ;;  %6695 = vmatpush3.bf16.msra.mxu0 %v6694_v37 }
0x2522   :  { %6709 = vmatprep.subr.bf16.mxu1 %v6708_v18 }
0x2525   :  { %6711 = vmatpush3.bf16.msra.mxu1 %v6708_v18 }
0x2526   :  { %6713 = vmatprep.subr.bf16.mxu1 %v6712_v44 }
0x2529   :  { %6715 = vmatpush3.bf16.msra.mxu1 %v6712_v44 }
0x252a   :  { %6717 = vmatprep.subr.bf16.mxu1 %v6716_v36 }
0x252d   :  { %6719 = vmatpush3.bf16.msra.mxu1 %v6716_v36 }
0x252e   :  { %6721 = vmatprep.subr.bf16.mxu1 %v6720_v0 }
0x2531   :  { %6723 = vmatpush3.bf16.msra.mxu1 %v6720_v0 }
0x2532   :  { %6725 = vmatprep.subr.bf16.mxu1 %v6724_v8 }
0x2535   :  { %6727 = vmatpush3.bf16.msra.mxu1 %v6724_v8 }
0x25eb   :  { %v6234_v9 = vpop.f32.mrb[36].mxu1 }
0x25ec   :  { %v4577_v5 = vadd.f32 %v6234_v9, %v5412_v22  ;;  %v4571_v48 = vpop.f32.mrb[37].mxu1 }
0x25ed   :  { %v4572_v33 = vadd.f32 %v5412_v22, %v4571_v48 }
0x25ee   :  { %v4581_v40 = vmax.f32 %v4577_v5, 0.0 }
0x25ef   :  { %v4580_v14 = vmax.f32 %v4572_v33, 0.0  ;;  %v4881_v33 = vld [vmem:[#allocation2 + $0xa48] sm:$0xff] }
0x25f0   :  { %v4591_v2 = vrot.slane %v4581_v40, 1  ;;  %v4585_v16 = vrot.slane %v4581_v40, 7 }
0x25f1   :  { %v4584_v62 = vrot.slane %v4580_v14, 7  ;;  %v4590_v7 = vrot.slane %v4580_v14, 1  ;;  %4713 = vmatprep.mubr.f32.mxu0 %v4580_v14  ;;  %v4883_v14 = vld [vmem:[#allocation2 + $0xa58] sm:$0xff] }
0x25f3   :  { %5417 = vmatmul.mubr.msk.f32.vlgmr.msra.gmra.mrb[42].mxu0 %vm7047_vm9, %v4584_v62  ;;  %6267 = vmatprep.mubr.msk.f32.mxu1 %vm208_vm5, %v4590_v7  ;;  %v4884_v7 = vld [vmem:[#allocation2 + $0xa60] sm:$0xff] }
0x25f4   :  { %4718 = vmatprep.mubr.f32.mxu0 %v4581_v40  ;;  %6268 = vmatmul.mubr.msk.f32.vlgmr.msra.gmra.mrb[38].mxu1 %vm208_vm5, %v4591_v2  ;;  %v4882_v40 = vld [vmem:[#allocation2 + $0xa50] sm:$0xff]  ;;  %v6732_v2 = vpack.c.bf16 %v4884_v7, %v4883_v14  ;;  %v5191_v7 = vld [vmem:[#allocation2 + $0xaa8] sm:$0xff] }
0x25f5   :  { %v6728_v62 = vpack.c.bf16 %v4882_v40, %v4881_v33  ;;  %v5189_v40 = vld [vmem:[#allocation2 + $0xa98] sm:$0xff] }
0x25f7   :  { %5419 = vmatmul.mubr.msk.f32.gmra.mrb[44].mxu0 %vm7047_vm9, %v4585_v16  ;;  %6729 = vmatprep.subr.bf16.mxu0 %v6728_v62  ;;  %vm7886_vm9 = vmmov %vm7882_vm2 }
0x25f8   :  { %6731 = vmatpush3.bf16.msra.mxu0 %v6728_v62  ;;  %v5190_v62 = vld [vmem:[#allocation2 + $0xaa0] sm:$0xff]  ;;  %vm7891_vm2 = vmmov %vm7884_vm0 }
0x25f9   :  { %6733 = vmatprep.subr.bf16.mxu0 %v6732_v2 }
0x25fc   :  { %6735 = vmatpush3.bf16.msra.mxu0 %v6732_v2  ;;  %v6743_v2 = vpack.c.bf16 %v5191_v7, %v5190_v62 }
0x26c6   :  { %v5788_v19 = vpop.f32.mrb[42].mxu0 }
0x26c7   :  { %v5789_v6 = vpop.f32.mrb[43].mxu0  ;;  %v6269_v10 = vpop.f32.mrb[38].mxu1 }
0x26c8   :  { %v5790_v23 = vadd.f32 %v5789_v6, %v5788_v19  ;;  %v4790_v25 = vpop.f32.mrb[39].mxu1 }
0x26ca   :  { %v4716_v27 = vadd.f32 %v5790_v23, %v5415_v30  ;;  %v5791_v29 = vpop.f32.mrb[44].mxu0 }
0x26cb   :  { %v5792_v17 = vpop.f32.mrb[45].mxu0 }
0x26cc   :  { %v4791_v4 = vadd.f32 %v4790_v25, %v4716_v27  ;;  %v5793_v59 = vadd.f32 %v5792_v17, %v5791_v29  ;;  %v5422_v27 = vld [vmem:[#allocation2 + $0xa38] ss:$0 sm:$0xff]  ;;  %v5423_v17 = vld [vmem:[#allocation2 + $0xa40] ss:$0 sm:$0xff] }
0x26ce   :  { %v4799_v41 = vmul.f32 0.5, %v4791_v4  ;;  %v4721_v50 = vadd.f32 %v5793_v59, %v5415_v30 }
0x26d0   :  { %v4801_v56 = vadd.f32 %v4799_v41, %v7737_v11  ;;  %v4796_v54 = vadd.f32 %v6269_v10, %v4721_v50 }
0x26d2   :  { %v4800_v51 = vmul.f32 0.5, %v4796_v54  ;;  %v4803_v39 = vsel %vm155_vm4, %v4801_v56, 0.0 }
0x26d3   :  { %4804 = vadd.xlane.f32.xlu0 %v4803_v39 }
0x26d4   :  { %v4802_v15 = vadd.f32 %v4800_v51, %v7735_v43  ;;  %v5424_v51 = vld [vmem:[#allocation2 + $0xa68] ss:$0 sm:$0xff] }
0x26d6   :  { %v4806_v34 = vsel %vm155_vm4, %v4802_v15, 0.0 }
0x26d7   :  { %4807 = vadd.xlane.f32.xlu1 %v4806_v34 }
0x2760   :  { %v4805_v35 = vpop.xlane.xlu0 %4804 }
0x2761   :  { %v4809_v58 = vmul.f32 0.03125, %v4805_v35 }
0x2763   :  { %v4811_v47 = vsub.f32 %v4801_v56, %v4809_v58  ;;  %v5039_v58 = vld [vmem:[#allocation2 + $0xa70] sm:$0x1f] }
0x2764   :  { %v4808_v38 = vpop.xlane.xlu1 %4807  ;;  %6281 = vmatprep.subr.msk.mxu0 %vm882_vm14, %v5039_v58 }
0x2765   :  { %v4810_v18 = vmul.f32 0.03125, %v4808_v38  ;;  %v4813_v32 = vmul.f32 %v4811_v47, %v4811_v47 }
0x2767   :  { %v4812_v63 = vsub.f32 %v4802_v15, %v4810_v18  ;;  %v4815_v44 = vsel %vm155_vm4, %v4813_v32, 0.0 }
0x2768   :  { %4816 = vadd.xlane.f32.xlu0 %v4815_v44 }
0x2769   :  { %v4814_v11 = vmul.f32 %v4812_v63, %v4812_v63 }
0x276b   :  { %v4818_v20 = vsel %vm155_vm4, %v4814_v11, 0.0 }
0x276c   :  { %4819 = vadd.xlane.f32.xlu0 %v4818_v20 }
0x27f5   :  { %v4817_v13 = vpop.xlane.xlu0 %4816 }
0x27f6   :  { %v4821_v36 = vmul.f32 0.03125, %v4817_v13 }
0x27f8   :  { %v4823_v43 = vadd.f32 1e-12, %v4821_v36 }
0x27f9   :  { %v4820_v57 = vpop.xlane.xlu0 %4819 }
0x27fa   :  { %6889 = vrsqrt.f32 %v4823_v43  ;;  %v4822_v45 = vmul.f32 0.03125, %v4820_v57 }
0x27fc   :  { %v4824_v61 = vadd.f32 1e-12, %v4822_v45 }
0x27fe   :  { %6891 = vrsqrt.f32 %v4824_v61 }
0x2804   :  { %v6890_v21 = vpop.eup %6889 }
0x2805   :  { %v4827_v28 = vmul.f32 %v6890_v21, %v4811_v47 }
0x2807   :  { %v4833_v52 = vmul.f32 %v4832_v53, %v4827_v28 }
0x2808   :  { %v6892_v60 = vpop.eup %6891 }
0x2809   :  { %v4839_v12 = vadd.f32 %v4838_v24, %v4833_v52  ;;  %v4828_v0 = vmul.f32 %v6892_v60, %v4812_v63 }
0x280b   :  { %v4843_v46 = vsel %vm155_vm4, %v4839_v12, 0.0  ;;  %v4834_v1 = vmul.f32 %v4832_v53, %v4828_v0 }
0x280c   :  { %4844 = vadd.xlane.f32.xlu0 %v4843_v46 }
0x280d   :  { %v4840_v31 = vadd.f32 %v4838_v24, %v4834_v1 }
0x280f   :  { %v4846_v3 = vsel %vm155_vm4, %v4840_v31, 0.0 }
0x2810   :  { %4847 = vadd.xlane.f32.xlu1 %v4846_v3 }
0x2899   :  { %v4845_v37 = vpop.xlane.xlu0 %4844 }
0x289a   :  { %v4849_v42 = vmul.f32 0.03125, %v4845_v37 }
0x289c   :  { %v4851_v49 = vsub.f32 %v4839_v12, %v4849_v42 }
0x289d   :  { %v4848_v8 = vpop.xlane.xlu1 %4847 }
0x289e   :  { %v4850_v22 = vmul.f32 0.03125, %v4848_v8  ;;  %v4853_v9 = vmul.f32 %v4851_v49, %v4851_v49 }
0x28a0   :  { %v4852_v5 = vsub.f32 %v4840_v31, %v4850_v22  ;;  %v4855_v26 = vsel %vm155_vm4, %v4853_v9, 0.0 }
0x28a1   :  { %4856 = vadd.xlane.f32.xlu0 %v4855_v26  ;;  %v5187_v26 = vld [vmem:[#allocation2 + $0xa88] sm:$0xff] }
0x28a2   :  { %v4854_v55 = vmul.f32 %v4852_v5, %v4852_v5 }
0x28a4   :  { %v4858_v48 = vsel %vm155_vm4, %v4854_v55, 0.0  ;;  %v5188_v55 = vld [vmem:[#allocation2 + $0xa90] sm:$0xff] }
0x28a5   :  { %4859 = vadd.xlane.f32.xlu1 %v4858_v48  ;;  %v6951_v48 = vmov 0.0|0.0   ;;  %v6740_v14 = vpack.c.bf16 %v5189_v40, %v5188_v55 }
0x292e   :  { %v4857_v16 = vpop.xlane.xlu0 %4856 }
0x292f   :  { %v4861_v19 = vmul.f32 0.03125, %v4857_v16  ;;  %v5192_v16 = vld [vmem:[#allocation2 + $0xab0] sm:$0xff] }
0x2931   :  { %v4863_v6 = vadd.f32 1e-12, %v4861_v19  ;;  %v5193_v19 = vld [vmem:[#allocation2 + $0xab8] sm:$0xff] }
0x2932   :  { %v4860_v10 = vpop.xlane.xlu1 %4859 }
0x2933   :  { %6893 = vrsqrt.f32 %v4863_v6  ;;  %v4862_v30 = vmul.f32 0.03125, %v4860_v10  ;;  %v6746_v6 = vpack.c.bf16 %v5193_v19, %v5192_v16  ;;  %v5194_v10 = vld [vmem:[#allocation2 + $0xac0] sm:$0xff] }
0x2935   :  { %v4864_v23 = vadd.f32 1e-12, %v4862_v30  ;;  %v5195_v30 = vld [vmem:[#allocation2 + $0xac8] sm:$0xff] }
0x2937   :  { %6895 = vrsqrt.f32 %v4864_v23  ;;  %v6749_v23 = vpack.c.bf16 %v5195_v30, %v5194_v10 }
0x293d   :  { %v6894_v25 = vpop.eup %6893 }
0x293e   :  { %v4867_v29 = vmul.f32 %v6894_v25, %v4851_v49  ;;  %v5196_v25 = vld [vmem:[#allocation2 + $0xad0] sm:$0xff] }
0x2940   :  { %v4873_v4 = vmul.f32 %v5422_v27, %v4867_v29 }
0x2941   :  { %v6896_v59 = vpop.eup %6895 }
0x2942   :  { %v4868_v41 = vmul.f32 %v6896_v59, %v4852_v5  ;;  %v4879_v50 = vadd.f32 %v5423_v17, %v4873_v4  ;;  %v5186_v5 = vld [vmem:[#allocation2 + $0xa80] sm:$0xff]  ;;  %v5199_v4 = vld [vmem:[#allocation2 + $0xae8] sm:$0xff] }
0x2943   :  { %v6737_v33 = vpack.c.bf16 %v5187_v26, %v5186_v5 }
0x2944   :  { %v4874_v56 = vmul.f32 %v5422_v27, %v4868_v41  ;;  %6278 = vmatprep.mubr.msk.f32.mxu0 %vm155_vm4, %v4879_v50  ;;  %v5197_v27 = vld [vmem:[#allocation2 + $0xad8] sm:$0xff]  ;;  %v5200_v41 = vld [vmem:[#allocation2 + $0xaf0] sm:$0xff] }
0x2945   :  { %v6752_v29 = vpack.c.bf16 %v5197_v27, %v5196_v25  ;;  %v5201_v50 = vld [vmem:[#allocation2 + $0xaf8] sm:$0xff] }
0x2946   :  { %v4880_v54 = vadd.f32 %v5423_v17, %v4874_v56  ;;  %v5198_v17 = vld [vmem:[#allocation2 + $0xae0] sm:$0xff]  ;;  %v6758_v56 = vpack.c.bf16 %v5201_v50, %v5200_v41 }
0x2947   :  { %v6755_v59 = vpack.c.bf16 %v5199_v4, %v5198_v17 }
0x2948   :  { %6279 = vmatmul.mubr.msk.f32.vlgmr.msra.gmra.mrb[46].mxu0 %vm155_vm4, %v4880_v54  ;;  %v5427_v54 = vld [vmem:[#allocation2 + $0xa78] ss:$0 sm:$0xff] }
0x2949   :  { %6282 = vmatpush3.msk.msra.mxu0 %vm882_vm14, %v5039_v58  ;;  %vm5033_vm14 = vcmask 23552   ;;  %v5202_v58 = vld [vmem:[#allocation2 + $0xb00] sm:$0xff] }
0x294a   :  { %6736 = vmatprep.subr.bf16.mxu0 %v6951_v48 }
0x2a1b   :  { %v6280_v39 = vpop.f32.mrb[46].mxu0 }
0x2a1c   :  { %v7796_v15 = vadd.f32 %v6280_v39, %v5424_v51  ;;  %v4962_v34 = vpop.f32.mrb[47].mxu0 }
0x2a1d   :  { %v7798_v35 = vadd.f32 %v5424_v51, %v4962_v34 }
0x2a1e   :  { %5007 = vrot.lane.b32.xlu1 %v7796_v15, %s6942_s8  ;;  %v4980_v18 = vrot.slane %v7796_v15, 7  ;;  %v4986_v11 = vrot.slane %v7796_v15, 1  ;;  %v4992_v43 = vrot.slane %v7796_v15, 2  ;;  %v4974_v24 = vrot.slane %v7796_v15, 6 }
0x2a1f   :  { %v4979_v47 = vrot.slane %v7798_v35, 7  ;;  %v4985_v32 = vrot.slane %v7798_v35, 1  ;;  %v4991_v20 = vrot.slane %v7798_v35, 2  ;;  %v4973_v61 = vrot.slane %v7798_v35, 6 }
0x2a20   :  { %v4984_v63 = vsel %vm201_vm6, 0.0, %v4980_v18  ;;  %v4990_v13 = vsel %vm208_vm5, %v4986_v11, 0.0  ;;  %v4996_v57 = vsel %vm7887_vm10, %v4992_v43, 0.0  ;;  %v4978_v0 = vsel %vm868_vm12, 0.0, %v4974_v24 }
0x2a21   :  { %v4983_v38 = vsel %vm201_vm6, 0.0, %v4979_v47  ;;  %v4989_v44 = vsel %vm208_vm5, %v4985_v32, 0.0  ;;  %v4995_v36 = vsel %vm7886_vm9, %v4991_v20, 0.0  ;;  %v4977_v28 = vsel %vm868_vm12, 0.0, %v4973_v61  ;;  %v5203_v47 = vld [vmem:[#allocation2 + $0xb08] sm:$0xff]  ;;  %v5204_v32 = vld [vmem:[#allocation2 + $0xb10] sm:$0xff] }
0x2a22   :  { %5005 = vrot.lane.b32.xlu1 %v7798_v35, %s6942_s8  ;;  %4999 = vrot.lane.b32.xlu0 %v4983_v38, %s6940_s6  ;;  %v6761_v18 = vpack.c.bf16 %v5203_v47, %v5202_v58 }
0x2a26   :  { %5001 = vrot.lane.b32.xlu1 %v4984_v63, %s6940_s6  ;;  %5013 = vrot.lane.b32.xlu0 %v4989_v44, %s6944_s10  ;;  %v5205_v63 = vld [vmem:[#allocation2 + $0xb18] sm:$0xff] }
0x2a27   :  { %v6764_v44 = vpack.c.bf16 %v5205_v63, %v5204_v32 }
0x2a2a   :  { %5015 = vrot.lane.b32.xlu1 %v4990_v13, %s6944_s10  ;;  %5021 = vrot.lane.b32.xlu0 %v4995_v36, %s6941_s7 }
0x2a2e   :  { %5023 = vrot.lane.b32.xlu1 %v4996_v57, %s6941_s7 }
0x2a90   :  { %v5008_v45 = vpop.permute.xlu1 %5007 }
0x2a94   :  { %v5006_v53 = vpop.permute.xlu1 %5005  ;;  %v5000_v21 = vpop.permute.xlu0 %4999 }
0x2a95   :  { %v5028_v52 = vsel %vm5027_vm11, %v4977_v28, %v5000_v21 }
0x2a96   :  { %v5031_v46 = vsel %vm5030_vm13, %v5028_v52, %v5006_v53 }
0x2a98   :  { %v5002_v60 = vpop.permute.xlu1 %5001  ;;  %v5014_v12 = vpop.permute.xlu0 %5013 }
0x2a99   :  { %v5029_v1 = vsel %vm5027_vm11, %v4978_v0, %v5002_v60  ;;  %v5034_v31 = vsel %vm5033_vm14, %v5031_v46, %v5014_v12 }
0x2a9a   :  { %v5032_v49 = vsel %vm5030_vm13, %v5029_v1, %v5008_v45 }
0x2a9c   :  { %v5016_v3 = vpop.permute.xlu1 %5015  ;;  %v5022_v37 = vpop.permute.xlu0 %5021 }
0x2a9d   :  { %v5037_v42 = vsel %vm5036_vm15, %v5034_v31, %v5022_v37  ;;  %v5035_v8 = vsel %vm5033_vm14, %v5032_v49, %v5016_v3 }
0x2a9e   :  { %6283 = vmatprep.mubr.msk.f32.mxu0 %vm5045_vm3, %v5037_v42 }
0x2aa0   :  { %v5024_v22 = vpop.permute.xlu1 %5023 }
0x2aa1   :  { %v5038_v9 = vsel %vm5036_vm15, %v5035_v8, %v5024_v22 }
0x2aa2   :  { %6284 = vmatmul.mubr.msk.f32.vlgmr.msra.gmra.mrb[48].mxu0 %vm5045_vm3, %v5038_v9 }
0x2aa3   :  { %6738 = vmatpush1.bf16.msra.mxu0 %v6737_v33  ;;  %v5431_v33 = vld [vmem:[#allocation2 + $0xb20] ss:$0 sm:$0xff] }
0x2aa4   :  { %6739 = vmatprep.subr.bf16.mxu0 %v6951_v48 }
0x2aa7   :  { %6741 = vmatpush1.bf16.msra.mxu0 %v6740_v14 }
0x2aa8   :  { %6742 = vmatprep.subr.bf16.mxu0 %v6951_v48 }
0x2aab   :  { %6744 = vmatpush1.bf16.msra.mxu0 %v6743_v2 }
0x2aac   :  { %6745 = vmatprep.subr.bf16.mxu0 %v6951_v48 }
0x2aaf   :  { %6747 = vmatpush1.bf16.msra.mxu0 %v6746_v6 }
0x2ab0   :  { %6748 = vmatprep.subr.bf16.mxu0 %v6951_v48 }
0x2ab3   :  { %6750 = vmatpush1.bf16.msra.mxu0 %v6749_v23 }
0x2ab4   :  { %6751 = vmatprep.subr.bf16.mxu0 %v6951_v48 }
0x2ab7   :  { %6753 = vmatpush1.bf16.msra.mxu0 %v6752_v29 }
0x2ab8   :  { %6754 = vmatprep.subr.bf16.mxu0 %v6951_v48 }
0x2abb   :  { %6756 = vmatpush1.bf16.msra.mxu0 %v6755_v59 }
0x2abc   :  { %6757 = vmatprep.subr.bf16.mxu0 %v6951_v48 }
0x2abf   :  { %6759 = vmatpush1.bf16.msra.mxu0 %v6758_v56 }
0x2ac0   :  { %6760 = vmatprep.subr.bf16.mxu0 %v6951_v48 }
0x2ac3   :  { %6762 = vmatpush1.bf16.msra.mxu0 %v6761_v18 }
0x2ac4   :  { %6763 = vmatprep.subr.bf16.mxu0 %v6951_v48 }
0x2ac7   :  { %6765 = vmatpush1.bf16.msra.mxu0 %v6764_v44 }
0x2b75   :  { %v6285_v51 = vpop.f32.mrb[48].mxu0 }
0x2b76   :  { %v5127_v39 = vadd.f32 %v6285_v51, %v5427_v54  ;;  %v5121_v34 = vpop.f32.mrb[49].mxu0 }
0x2b77   :  { %v5122_v38 = vadd.f32 %v5427_v54, %v5121_v34 }
0x2b78   :  { %6897 = vtanh.f32 %v5127_v39 }
0x2b79   :  { %6899 = vtanh.f32 %v5122_v38 }
0x2b82   :  { %v6898_v11 = vpop.eup %6897 }
0x2b83   :  { %v6900_v20 = vpop.eup %6899  ;;  %v5141_v13 = vrot.slane %v6898_v11, 7  ;;  %v5147_v21 = vrot.slane %v6898_v11, 1  ;;  %v5153_v1 = vrot.slane %v6898_v11, 2  ;;  %v5135_v31 = vrot.slane %v6898_v11, 6 }
0x2b84   :  { %5166 = vrot.lane.b32.xlu1 %v6900_v20, %s6934_s29  ;;  %v5152_v36 = vrot.slane %v6900_v20, 2  ;;  %v5140_v43 = vrot.slane %v6900_v20, 7  ;;  %v5146_v61 = vrot.slane %v6900_v20, 1  ;;  %v5134_v52 = vrot.slane %v6900_v20, 6 }
0x2b85   :  { %v5145_v53 = vsel %vm201_vm6, 0.0, %v5141_v13  ;;  %v5151_v24 = vsel %vm208_vm5, %v5147_v21, 0.0  ;;  %v5139_v22 = vsel %vm868_vm12, 0.0, %v5135_v31 }
0x2b86   :  { %v5156_v57 = vsel %vm7888_vm1, %v5152_v36, 0.0  ;;  %v5144_v45 = vsel %vm201_vm6, 0.0, %v5140_v43  ;;  %v5150_v28 = vsel %vm208_vm5, %v5146_v61, 0.0  ;;  %v5138_v0 = vsel %vm868_vm12, 0.0, %v5134_v52  ;;  %vm7889_vm6 = vmmov %vm7884_vm0 }
0x2b87   :  { %5432 = vmatprep.mubr.msk.f32.mxu0 %vm155_vm4, %v5156_v57  ;;  %5160 = vrot.lane.b32.xlu0 %v5144_v45, %s6933_s0  ;;  %vm7890_vm5 = vmmov %vm7888_vm1 }
0x2b88   :  { %5162 = vrot.lane.b32.xlu1 %v5145_v53, %s6933_s0  ;;  %v5157_v8 = vsel %vm7890_vm5, %v5153_v1, 0.0 }
0x2b8b   :  { %5174 = vrot.lane.b32.xlu0 %v5150_v28, %s6938_s4 }
0x2b8c   :  { %5176 = vrot.lane.b32.xlu1 %v5151_v24, %s6938_s4 }
0x2b8f   :  { %5168 = vrot.lane.b32.xlu0 %v6898_v11, %s6934_s29 }
0x2bf6   :  { %v5167_v60 = vpop.permute.xlu1 %5166 }
0x2bf9   :  { %v5161_v12 = vpop.permute.xlu0 %5160 }
0x2bfa   :  { %v5180_v46 = vsel %vm155_vm4, %v5138_v0, %v5161_v12  ;;  %v5163_v3 = vpop.permute.xlu1 %5162 }
0x2bfb   :  { %v5182_v42 = vsel %vm227_vm7, %v5180_v46, %v5167_v60  ;;  %v5181_v9 = vsel %vm155_vm4, %v5139_v22, %v5163_v3 }
0x2bfd   :  { %v5175_v37 = vpop.permute.xlu0 %5174 }
0x2bfe   :  { %v5184_v49 = vsel %vm7889_vm6, %v5182_v42, %v5175_v37  ;;  %v5177_v26 = vpop.permute.xlu1 %5176 }
0x2bff   :  { %5282 = vmatmul.mubr.f32.vlgmr.msra.gmra.mrb[50].mxu0 %v5184_v49 }
0x2c00   :  { %5433 = vmatprep.mubr.msk.f32.mxu0 %vm155_vm4, %v5157_v8 }
0x2c01   :  { %v5169_v5 = vpop.permute.xlu0 %5168 }
0x2c02   :  { %v5183_v55 = vsel %vm227_vm7, %v5181_v9, %v5169_v5 }
0x2c03   :  { %v5185_v48 = vsel %vm7891_vm2, %v5183_v55, %v5177_v26 }
0x2c04   :  { %5287 = vmatmul.mubr.f32.gmra.mrb[52].mxu0 %v5185_v48 }
0x2cd2   :  { %v5283_v40 = vpop.f32.mrb[50].mxu0 }
0x2cd3   :  { %v5284_v14 = vadd.f32 %v5431_v33, %v5283_v40  ;;  %v5285_v62 = vpop.f32.mrb[51].mxu0 }
0x2cd5   :  { %v5292_v7 = vadd.f32 %v5284_v14, %v7798_v35 }
0x2cd7   :  { %v5288_v2 = vpop.f32.mrb[52].mxu0  ;;  %5296 = vrot.lane.b32.xlu0 %v5292_v7, %s6940_s6 }
0x2cd8   :  { %v5289_v16 = vadd.f32 %v5431_v33, %v5288_v2  ;;  %v5290_v19 = vpop.f32.mrb[53].mxu0 }
0x2cda   :  { %v5293_v6 = vadd.f32 %v5289_v16, %v7796_v15 }
0x2cdc   :  { %5298 = vrot.lane.b32.xlu1 %v5293_v6, %s6940_s6 }
0x2d49   :  { %v5297_v10 = vpop.permute.xlu0 %5296 }
0x2d4a   :  { %v5302_v30 = vsel %vm5027_vm11, %v7798_v35, %v5297_v10 }
0x2d4b   :  { %5304 = vst.msk [vmem:[%s7873_s3] sm:$0xff] %vm5030_vm13, %v5302_v30 }
0x2d4e   :  { %v5299_v23 = vpop.permute.xlu1 %5298 }
0x2d4f   :  { %v5303_v25 = vsel %vm5027_vm11, %v7796_v15, %v5299_v23 }
0x2d50   :  { %5305 = vst.msk [vmem:[%s7873_s3 + $0x8] sm:$0xff] %vm5030_vm13, %v5303_v25 }
0x2d51   :  { %5310 = vsyncpa [#allocation3], 1 }

</bundles_post_ra>
